<compile_context>
chip_gen: v6e
topology: v6e:2x2x1
jax: 0.10.0
libtpu: 0.0.40
codegen_flags: <defaults>
</compile_context>

<pallas_src>
import jax
import jax.numpy as jnp
from jax.experimental import pallas as pl
from jax.experimental.pallas import tpu as pltpu


def _round_up(x, m):
    return ((x + m - 1) // m) * m


def _largest_divisor_tile(dim, candidates=(512, 256, 128, 64, 32, 16, 8)):
    for c in candidates:
        if dim % c == 0:
            return c
    return dim


# ----------------------------------------------------------------------------
# Recurrent kernel: h = tanh(x@W_ih + b + h@W_hh), Tb timesteps per grid step.
# ----------------------------------------------------------------------------
def rnn_recurrent_kernel(x_ref, wih_ref, whh_ref, b_ref, hs_ref, h_ref, xw_ref):
    # x_ref : (Tb, Bt, E)   f32 time-major embedding block
    # hs_ref: (Tb, Bt, H)   bf16 hidden-state output block
    # h_ref : (Bt, H)       f32 hidden carry (VMEM scratch, persists across time blocks)
    # xw_ref: (Tb*Bt, H)    f32 staging for the block input projection
    @pl.when(pl.program_id(1) == 0)          # time axis is axis 1 (innermost / sequential)
    def _():
        h_ref[...] = jnp.zeros_like(h_ref)

    Tb, Bt, E = x_ref.shape

    # Non-recurrent input projection for the whole block in ONE tall MXU matmul,
    # staged to VMEM so the unrolled recurrence never holds (Tb, Bt, H) in vregs.
    x2d = x_ref[...].reshape(Tb * Bt, E)
    xw_ref[...] = (jnp.dot(x2d, wih_ref[...], preferred_element_type=jnp.float32)
                   + b_ref[...])

    # Sequential recurrence, statically unrolled (Tb is a small compile-time constant).
    # Carry stays f32; only the stored hidden states are cast to bf16.
    for tb in range(Tb):
        h = jnp.tanh(xw_ref[pl.ds(tb * Bt, Bt), :]
                     + jnp.dot(h_ref[...], whh_ref[...],
                               preferred_element_type=jnp.float32))
        h_ref[...] = h
        hs_ref[tb] = h.astype(hs_ref.dtype)


# ----------------------------------------------------------------------------
# Output projection kernel: logits = hs @ W_out + b_out.
# Full-K tile (RNN hidden dims easily fit VMEM) -> no accumulator, no reduction axis,
# bf16 MXU inputs with f32 accumulation, bias fused into the single lane-dense store.
# ----------------------------------------------------------------------------
def matmul_bias_kernel(x_ref, w_ref, b_ref, o_ref):
    o_ref[...] = (jnp.dot(x_ref[...], w_ref[...], preferred_element_type=jnp.float32)
                  + b_ref[...]).astype(o_ref.dtype)


# ----------------------------------------------------------------------------
# Wrapper
# ----------------------------------------------------------------------------
def rnn_language_model_forward(inputs, params, *, time_block=16):
    """inputs: (B, T) int32 token ids. Returns logits (B, T, V) float32."""
    emb = params["embedding"]          # (V, E)
    w_ih = params["w_ih"]              # (E, H)
    w_hh = params["w_hh"]              # (H, H)
    b = params["b"]                    # (1, H)  (= b_ih + b_hh)
    w_out = params["w_out"]            # (H, V)
    b_out = params["b_out"]            # (1, V)

    B, T = inputs.shape
    V, E = emb.shape
    H = w_hh.shape[0]

    # ---- hardware-friendly padding (zeros are inert, sliced away at the end) ----
    E_pad = _round_up(E, 128)
    H_pad = _round_up(H, 128)
    B_pad = _round_up(B, 8)
    Tb = time_block
    T_pad = _round_up(T, Tb)

    # Projection tiles: pad V UP to the tile (don't let the tile collapse to 128).
    VT_TARGET = 512
    V_pad = _round_up(V, 128)
    if V_pad >= VT_TARGET:
        V_pad = _round_up(V_pad, VT_TARGET)
        Vt = VT_TARGET
    else:
        Vt = V_pad
    M = B_pad * T_pad                    # multiple of 128 by construction (8 * Tb)
    Mt = _largest_divisor_tile(M)

    emb_p = jnp.pad(emb, ((0, 0), (0, E_pad - E)))
    w_ih_p = jnp.pad(w_ih, ((0, E_pad - E), (0, H_pad - H)))
    w_hh_p = jnp.pad(w_hh, ((0, H_pad - H), (0, H_pad - H)))
    b_p = jnp.pad(b, ((0, 0), (0, H_pad - H)))
    w_out_bf16 = jnp.pad(w_out, ((0, H_pad - H), (0, V_pad - V))).astype(jnp.bfloat16)
    b_out_p = jnp.pad(b_out, ((0, 0), (0, V_pad - V)))

    # Embedding gather (plain-JAX glue), produced directly in time-major layout.
    # TODO(synk): fuse the gather into the recurrent kernel via scalar-prefetched ids.
    embeds_tm = jnp.take(emb_p, inputs.T, axis=0)                       # (T, B, E_pad)
    embeds_tm = jnp.pad(embeds_tm, ((0, T_pad - T), (0, B_pad - B), (0, 0)))

    # Megacore: on 2-TensorCore chips (v7x-class), split the batch across cores.
    kind = jax.devices()[0].device_kind.lower()
    two_tc = ("v7" in kind) or ("7x" in kind)
    Bt = B_pad // 2 if (two_tc and B_pad % 16 == 0) else B_pad

    # ---- recurrent kernel (batch parallel, time sequential) ----
    def recurrent_call(single_buffer_weights):
        def const_spec(shape):
            idx = lambda bi, ti: (0,) * len(shape)
            if single_buffer_weights:
                # Constant-index weights don't need double buffering; halving their
                # residency matters on v7x's 64 MiB VMEM at large H.
                return pl.BlockSpec(shape, idx, pipeline_mode=pl.Buffered(1))
            return pl.BlockSpec(shape, idx)

        return pl.pallas_call(
            rnn_recurrent_kernel,
            out_shape=jax.ShapeDtypeStruct((T_pad, B_pad, H_pad), jnp.bfloat16),
            grid_spec=pltpu.PrefetchScalarGridSpec(
                num_scalar_prefetch=0,
                grid=(B_pad // Bt, T_pad // Tb),
                in_specs=[
                    pl.BlockSpec((Tb, Bt, E_pad), lambda bi, ti: (ti, bi, 0)),  # x block
                    const_spec((E_pad, H_pad)),                                 # W_ih
                    const_spec((H_pad, H_pad)),                                 # W_hh
                    const_spec((1, H_pad)),                                     # b
                ],
                out_specs=pl.BlockSpec((Tb, Bt, H_pad), lambda bi, ti: (ti, bi, 0)),
                scratch_shapes=[
                    pltpu.VMEM((Bt, H_pad), jnp.float32),        # hidden carry
                    pltpu.VMEM((Tb * Bt, H_pad), jnp.float32),   # staged x @ W_ih + b
                ],
            ),
            compiler_params=pltpu.CompilerParams(
                # Recurrence: the time axis MUST stay sequential; batch is independent.
                dimension_semantics=("parallel", "arbitrary"),
            ),
        )

    try:
        hs_tm = recurrent_call(True)(embeds_tm, w_ih_p, w_hh_p, b_p)
    except Exception:
        # pl.Buffered / pipeline_mode not supported on this JAX version; default buffering.
        hs_tm = recurrent_call(False)(embeds_tm, w_ih_p, w_hh_p, b_p)

    # Transpose only the (small, bf16, H-wide) hidden-state tensor so logits come out
    # directly in (B, T, V) row-major order -- no post-kernel transpose of the big tensor.
    hs_bt = jnp.transpose(hs_tm, (1, 0, 2)).reshape(M, H_pad)       # bf16 (M, H_pad)

    # ---- output projection: (M, H) @ (H, V) + b_out, fully parallel ----
    logits_p = pl.pallas_call(
        matmul_bias_kernel,
        out_shape=jax.ShapeDtypeStruct((M, V_pad), jnp.float32),
        grid_spec=pltpu.PrefetchScalarGridSpec(
            num_scalar_prefetch=0,
            grid=(M // Mt, V_pad // Vt),
            in_specs=[
                pl.BlockSpec((Mt, H_pad), lambda i, j: (i, 0)),     # hs (bf16)
                pl.BlockSpec((H_pad, Vt), lambda i, j: (0, j)),     # W_out (bf16)
                pl.BlockSpec((1, Vt), lambda i, j: (0, j)),         # b_out (f32)
            ],
            out_specs=pl.BlockSpec((Mt, Vt), lambda i, j: (i, j)),
        ),
        compiler_params=pltpu.CompilerParams(
            dimension_semantics=("parallel", "parallel"),
        ),
    )(hs_bt, w_out_bf16, b_out_p)

    return logits_p.reshape(B_pad, T_pad, V_pad)[:B, :T, :V]


# ----------------------------------------------------------------------------
# Params + pure-JAX reference (matches PyTorch Embedding -> RNN(tanh) -> Linear)
# ----------------------------------------------------------------------------
def init_params(key, vocab_size, embedding_dim, hidden_dim):
    k = jax.random.split(key, 6)
    s = 1.0 / jnp.sqrt(hidden_dim)
    emb = jax.random.normal(k[0], (vocab_size, embedding_dim), jnp.float32)
    w_ih = jax.random.uniform(k[1], (embedding_dim, hidden_dim), jnp.float32, -s, s)
    w_hh = jax.random.uniform(k[2], (hidden_dim, hidden_dim), jnp.float32, -s, s)
    b_ih = jax.random.uniform(k[3], (1, hidden_dim), jnp.float32, -s, s)
    b_hh = jax.random.uniform(k[4], (1, hidden_dim), jnp.float32, -s, s)
    w_out = jax.random.uniform(k[5], (hidden_dim, vocab_size), jnp.float32, -s, s)
    b_out = jnp.zeros((1, vocab_size), jnp.float32)
    return {
        "embedding": emb,
        "w_ih": w_ih,
        "w_hh": w_hh,
        "b": b_ih + b_hh,   # PyTorch adds both biases; fold them
        "w_out": w_out,
        "b_out": b_out,
    }


def reference_forward(inputs, params):
    embeds = jnp.take(params["embedding"], inputs, axis=0)  # (B, T, E)
    B, T, E = embeds.shape
    H = params["w_hh"].shape[0]

    def step(h, x_t):
        h_new = jnp.tanh(x_t @ params["w_ih"] + h @ params["w_hh"] + params["b"])
        return h_new, h_new

    h0 = jnp.zeros((B, H), jnp.float32)
    _, hs = jax.lax.scan(step, h0, jnp.transpose(embeds, (1, 0, 2)))  # (T, B, H)
    out = jnp.transpose(hs, (1, 0, 2)) @ params["w_out"] + params["b_out"]
    return out


if __name__ == "__main__":
    vocab_size = 64
    embedding_dim = 32
    hidden_dim = 32
    batch = 2
    seq_len = 12   # deliberately NOT a multiple of the time block to exercise padding

    key = jax.random.PRNGKey(0)
    pkey, ikey = jax.random.split(key)
    params = init_params(pkey, vocab_size, embedding_dim, hidden_dim)
    inputs = jax.random.randint(ikey, (batch, seq_len), 0, vocab_size, jnp.int32)

    logits = rnn_language_model_forward(inputs, params)
    logits = jax.block_until_ready(logits)
    assert logits.shape == (batch, seq_len, vocab_size)

    ref = reference_forward(inputs, params)
    # bf16 MXU inputs in the vocab projection -> ~1e-2 class tolerance (deliberate tradeoff).
    assert jnp.allclose(logits, ref, rtol=2e-2, atol=3e-2), "mismatch vs JAX reference"

    print("KERNEL_OK")
</pallas_src>

<mosaic_0001>
module attributes {stable_mosaic.version = 11 : i64} {
  func.func @rnn_recurrent_kernel(%arg0: i32, %arg1: i32, %arg2: memref<16x8x128xf32, #tpu.memory_space<vmem>>, %arg3: memref<128x128xf32, #tpu.memory_space<vmem>>, %arg4: memref<128x128xf32, #tpu.memory_space<vmem>>, %arg5: memref<1x128xf32, #tpu.memory_space<vmem>>, %arg6: memref<16x8x128xbf16, #tpu.memory_space<vmem>>, %arg7: memref<8x128xf32, #tpu.memory_space<vmem>>, %arg8: memref<128x128xf32, #tpu.memory_space<vmem>>) attributes {dimension_semantics = [#tpu.dimension_semantics<parallel>, #tpu.dimension_semantics<arbitrary>], iteration_bounds = array<i64: 1, 1>, scalar_prefetch = 0 : i64, scratch_operands = 2 : i64, tpu.core_type = #tpu.core_type<tc>, window_params = [{transform_indices = @transform_0, window_bounds = array<i64: 16, 8, 128>}, {pipeline_mode = #tpu.pipeline_mode<synchronous>, transform_indices = @transform_1, window_bounds = array<i64: 128, 128>}, {pipeline_mode = #tpu.pipeline_mode<synchronous>, transform_indices = @transform_2, window_bounds = array<i64: 128, 128>}, {pipeline_mode = #tpu.pipeline_mode<synchronous>, transform_indices = @transform_3, window_bounds = array<i64: 1, 128>}, {transform_indices = @transform_4, window_bounds = array<i64: 16, 8, 128>}]} {
    %c0_i32 = arith.constant 0 : i32
    %0 = arith.cmpi eq, %arg1, %c0_i32 : i32
    %1 = arith.extui %0 : i1 to i32
    %c0_i32_0 = arith.constant 0 : i32
    %2 = arith.cmpi ne, %1, %c0_i32_0 : i32
    scf.if %2 {
      %cst_172 = arith.constant 0.000000e+00 : f32
      %187 = vector.broadcast %cst_172 : f32 to vector<8x128xf32>
      %c0_173 = arith.constant 0 : index
      %c0_174 = arith.constant 0 : index
      %188 = vector.load %arg7[%c0_173, %c0_174] : memref<8x128xf32, #tpu.memory_space<vmem>>, vector<8x128xf32>
      tpu.vector_store %arg7[%c0_173, %c0_174], %187 {strides = array<i32>} : memref<8x128xf32, #tpu.memory_space<vmem>>, vector<8x128xf32>,
    } else {
    }
    %c0 = arith.constant 0 : index
    %c0_1 = arith.constant 0 : index
    %c0_2 = arith.constant 0 : index
    %3 = vector.load %arg2[%c0, %c0_1, %c0_2] : memref<16x8x128xf32, #tpu.memory_space<vmem>>, vector<16x8x128xf32>
    %4 = vector.shape_cast %3 : vector<16x8x128xf32> to vector<128x128xf32>
    %c0_3 = arith.constant 0 : index
    %c0_4 = arith.constant 0 : index
    %5 = vector.load %arg3[%c0_3, %c0_4] : memref<128x128xf32, #tpu.memory_space<vmem>>, vector<128x128xf32>
    %cst = arith.constant dense<0.000000e+00> : vector<128x128xf32>
    %6 = tpu.matmul %4, %5, %cst {dimension_numbers = #tpu.dot_dimension_numbers<[1], [0], [0], [1], [0, 0, 1, 1], [], []>} : vector<128x128xf32>, vector<128x128xf32>, vector<128x128xf32> -> vector<128x128xf32>
    %c0_5 = arith.constant 0 : index
    %c0_6 = arith.constant 0 : index
    %7 = vector.load %arg5[%c0_5, %c0_6] : memref<1x128xf32, #tpu.memory_space<vmem>>, vector<1x128xf32>
    %8 = vector.broadcast %7 : vector<1x128xf32> to vector<128x128xf32>
    %9 = arith.addf %6, %8 : vector<128x128xf32>
    %c0_7 = arith.constant 0 : index
    %c0_8 = arith.constant 0 : index
    %10 = vector.load %arg8[%c0_7, %c0_8] : memref<128x128xf32, #tpu.memory_space<vmem>>, vector<128x128xf32>
    tpu.vector_store %arg8[%c0_7, %c0_8], %9 {strides = array<i32>} : memref<128x128xf32, #tpu.memory_space<vmem>>, vector<128x128xf32>,
    %c0_9 = arith.constant 0 : index
    %c0_10 = arith.constant 0 : index
    %11 = vector.load %arg8[%c0_9, %c0_10] : memref<128x128xf32, #tpu.memory_space<vmem>>, vector<8x128xf32>
    %c0_11 = arith.constant 0 : index
    %c0_12 = arith.constant 0 : index
    %12 = vector.load %arg7[%c0_11, %c0_12] : memref<8x128xf32, #tpu.memory_space<vmem>>, vector<8x128xf32>
    %c0_13 = arith.constant 0 : index
    %c0_14 = arith.constant 0 : index
    %13 = vector.load %arg4[%c0_13, %c0_14] : memref<128x128xf32, #tpu.memory_space<vmem>>, vector<128x128xf32>
    %cst_15 = arith.constant dense<0.000000e+00> : vector<8x128xf32>
    %14 = tpu.matmul %12, %13, %cst_15 {dimension_numbers = #tpu.dot_dimension_numbers<[1], [0], [0], [1], [0, 0, 1, 1], [], []>} : vector<8x128xf32>, vector<128x128xf32>, vector<8x128xf32> -> vector<8x128xf32>
    %15 = arith.addf %11, %14 : vector<8x128xf32>
    %16 = math.tanh %15 : vector<8x128xf32>
    %c0_16 = arith.constant 0 : index
    %c0_17 = arith.constant 0 : index
    %17 = vector.load %arg7[%c0_16, %c0_17] : memref<8x128xf32, #tpu.memory_space<vmem>>, vector<8x128xf32>
    tpu.vector_store %arg7[%c0_16, %c0_17], %16 {strides = array<i32>} : memref<8x128xf32, #tpu.memory_space<vmem>>, vector<8x128xf32>,
    %18 = arith.truncf %16 : vector<8x128xf32> to vector<8x128xbf16>
    %c0_18 = arith.constant 0 : index
    %c0_19 = arith.constant 0 : index
    %c0_20 = arith.constant 0 : index
    %19 = vector.load %arg6[%c0_18, %c0_19, %c0_20] : memref<16x8x128xbf16, #tpu.memory_space<vmem>>, vector<1x8x128xbf16>
    %20 = vector.shape_cast %19 : vector<1x8x128xbf16> to vector<8x128xbf16>
    %21 = vector.shape_cast %18 : vector<8x128xbf16> to vector<1x8x128xbf16>
    tpu.vector_store %arg6[%c0_18, %c0_19, %c0_20], %21 {strides = array<i32>} : memref<16x8x128xbf16, #tpu.memory_space<vmem>>, vector<1x8x128xbf16>,
    %c8 = arith.constant 8 : index
    %c0_21 = arith.constant 0 : index
    %22 = vector.load %arg8[%c8, %c0_21] : memref<128x128xf32, #tpu.memory_space<vmem>>, vector<8x128xf32>
    %c0_22 = arith.constant 0 : index
    %c0_23 = arith.constant 0 : index
    %23 = vector.load %arg7[%c0_22, %c0_23] : memref<8x128xf32, #tpu.memory_space<vmem>>, vector<8x128xf32>
    %c0_24 = arith.constant 0 : index
    %c0_25 = arith.constant 0 : index
    %24 = vector.load %arg4[%c0_24, %c0_25] : memref<128x128xf32, #tpu.memory_space<vmem>>, vector<128x128xf32>
    %cst_26 = arith.constant dense<0.000000e+00> : vector<8x128xf32>
    %25 = tpu.matmul %23, %24, %cst_26 {dimension_numbers = #tpu.dot_dimension_numbers<[1], [0], [0], [1], [0, 0, 1, 1], [], []>} : vector<8x128xf32>, vector<128x128xf32>, vector<8x128xf32> -> vector<8x128xf32>
    %26 = arith.addf %22, %25 : vector<8x128xf32>
    %27 = math.tanh %26 : vector<8x128xf32>
    %c0_27 = arith.constant 0 : index
    %c0_28 = arith.constant 0 : index
    %28 = vector.load %arg7[%c0_27, %c0_28] : memref<8x128xf32, #tpu.memory_space<vmem>>, vector<8x128xf32>
    tpu.vector_store %arg7[%c0_27, %c0_28], %27 {strides = array<i32>} : memref<8x128xf32, #tpu.memory_space<vmem>>, vector<8x128xf32>,
    %29 = arith.truncf %27 : vector<8x128xf32> to vector<8x128xbf16>
    %c1 = arith.constant 1 : index
    %c0_29 = arith.constant 0 : index
    %c0_30 = arith.constant 0 : index
    %30 = vector.load %arg6[%c1, %c0_29, %c0_30] : memref<16x8x128xbf16, #tpu.memory_space<vmem>>, vector<1x8x128xbf16>
    %31 = vector.shape_cast %30 : vector<1x8x128xbf16> to vector<8x128xbf16>
    %32 = vector.shape_cast %29 : vector<8x128xbf16> to vector<1x8x128xbf16>
    tpu.vector_store %arg6[%c1, %c0_29, %c0_30], %32 {strides = array<i32>} : memref<16x8x128xbf16, #tpu.memory_space<vmem>>, vector<1x8x128xbf16>,
    %c16 = arith.constant 16 : index
    %c0_31 = arith.constant 0 : index
    %33 = vector.load %arg8[%c16, %c0_31] : memref<128x128xf32, #tpu.memory_space<vmem>>, vector<8x128xf32>
    %c0_32 = arith.constant 0 : index
    %c0_33 = arith.constant 0 : index
    %34 = vector.load %arg7[%c0_32, %c0_33] : memref<8x128xf32, #tpu.memory_space<vmem>>, vector<8x128xf32>
    %c0_34 = arith.constant 0 : index
    %c0_35 = arith.constant 0 : index
    %35 = vector.load %arg4[%c0_34, %c0_35] : memref<128x128xf32, #tpu.memory_space<vmem>>, vector<128x128xf32>
    %cst_36 = arith.constant dense<0.000000e+00> : vector<8x128xf32>
    %36 = tpu.matmul %34, %35, %cst_36 {dimension_numbers = #tpu.dot_dimension_numbers<[1], [0], [0], [1], [0, 0, 1, 1], [], []>} : vector<8x128xf32>, vector<128x128xf32>, vector<8x128xf32> -> vector<8x128xf32>
    %37 = arith.addf %33, %36 : vector<8x128xf32>
    %38 = math.tanh %37 : vector<8x128xf32>
    %c0_37 = arith.constant 0 : index
    %c0_38 = arith.constant 0 : index
    %39 = vector.load %arg7[%c0_37, %c0_38] : memref<8x128xf32, #tpu.memory_space<vmem>>, vector<8x128xf32>
    tpu.vector_store %arg7[%c0_37, %c0_38], %38 {strides = array<i32>} : memref<8x128xf32, #tpu.memory_space<vmem>>, vector<8x128xf32>,
    %40 = arith.truncf %38 : vector<8x128xf32> to vector<8x128xbf16>
    %c2 = arith.constant 2 : index
    %c0_39 = arith.constant 0 : index
    %c0_40 = arith.constant 0 : index
    %41 = vector.load %arg6[%c2, %c0_39, %c0_40] : memref<16x8x128xbf16, #tpu.memory_space<vmem>>, vector<1x8x128xbf16>
    %42 = vector.shape_cast %41 : vector<1x8x128xbf16> to vector<8x128xbf16>
    %43 = vector.shape_cast %40 : vector<8x128xbf16> to vector<1x8x128xbf16>
    tpu.vector_store %arg6[%c2, %c0_39, %c0_40], %43 {strides = array<i32>} : memref<16x8x128xbf16, #tpu.memory_space<vmem>>, vector<1x8x128xbf16>,
    %c24 = arith.constant 24 : index
    %c0_41 = arith.constant 0 : index
    %44 = vector.load %arg8[%c24, %c0_41] : memref<128x128xf32, #tpu.memory_space<vmem>>, vector<8x128xf32>
    %c0_42 = arith.constant 0 : index
    %c0_43 = arith.constant 0 : index
    %45 = vector.load %arg7[%c0_42, %c0_43] : memref<8x128xf32, #tpu.memory_space<vmem>>, vector<8x128xf32>
    %c0_44 = arith.constant 0 : index
    %c0_45 = arith.constant 0 : index
    %46 = vector.load %arg4[%c0_44, %c0_45] : memref<128x128xf32, #tpu.memory_space<vmem>>, vector<128x128xf32>
    %cst_46 = arith.constant dense<0.000000e+00> : vector<8x128xf32>
    %47 = tpu.matmul %45, %46, %cst_46 {dimension_numbers = #tpu.dot_dimension_numbers<[1], [0], [0], [1], [0, 0, 1, 1], [], []>} : vector<8x128xf32>, vector<128x128xf32>, vector<8x128xf32> -> vector<8x128xf32>
    %48 = arith.addf %44, %47 : vector<8x128xf32>
    %49 = math.tanh %48 : vector<8x128xf32>
    %c0_47 = arith.constant 0 : index
    %c0_48 = arith.constant 0 : index
    %50 = vector.load %arg7[%c0_47, %c0_48] : memref<8x128xf32, #tpu.memory_space<vmem>>, vector<8x128xf32>
    tpu.vector_store %arg7[%c0_47, %c0_48], %49 {strides = array<i32>} : memref<8x128xf32, #tpu.memory_space<vmem>>, vector<8x128xf32>,
    %51 = arith.truncf %49 : vector<8x128xf32> to vector<8x128xbf16>
    %c3 = arith.constant 3 : index
    %c0_49 = arith.constant 0 : index
    %c0_50 = arith.constant 0 : index
    %52 = vector.load %arg6[%c3, %c0_49, %c0_50] : memref<16x8x128xbf16, #tpu.memory_space<vmem>>, vector<1x8x128xbf16>
    %53 = vector.shape_cast %52 : vector<1x8x128xbf16> to vector<8x128xbf16>
    %54 = vector.shape_cast %51 : vector<8x128xbf16> to vector<1x8x128xbf16>
    tpu.vector_store %arg6[%c3, %c0_49, %c0_50], %54 {strides = array<i32>} : memref<16x8x128xbf16, #tpu.memory_space<vmem>>, vector<1x8x128xbf16>,
    %c32 = arith.constant 32 : index
    %c0_51 = arith.constant 0 : index
    %55 = vector.load %arg8[%c32, %c0_51] : memref<128x128xf32, #tpu.memory_space<vmem>>, vector<8x128xf32>
    %c0_52 = arith.constant 0 : index
    %c0_53 = arith.constant 0 : index
    %56 = vector.load %arg7[%c0_52, %c0_53] : memref<8x128xf32, #tpu.memory_space<vmem>>, vector<8x128xf32>
    %c0_54 = arith.constant 0 : index
    %c0_55 = arith.constant 0 : index
    %57 = vector.load %arg4[%c0_54, %c0_55] : memref<128x128xf32, #tpu.memory_space<vmem>>, vector<128x128xf32>
    %cst_56 = arith.constant dense<0.000000e+00> : vector<8x128xf32>
    %58 = tpu.matmul %56, %57, %cst_56 {dimension_numbers = #tpu.dot_dimension_numbers<[1], [0], [0], [1], [0, 0, 1, 1], [], []>} : vector<8x128xf32>, vector<128x128xf32>, vector<8x128xf32> -> vector<8x128xf32>
    %59 = arith.addf %55, %58 : vector<8x128xf32>
    %60 = math.tanh %59 : vector<8x128xf32>
    %c0_57 = arith.constant 0 : index
    %c0_58 = arith.constant 0 : index
    %61 = vector.load %arg7[%c0_57, %c0_58] : memref<8x128xf32, #tpu.memory_space<vmem>>, vector<8x128xf32>
    tpu.vector_store %arg7[%c0_57, %c0_58], %60 {strides = array<i32>} : memref<8x128xf32, #tpu.memory_space<vmem>>, vector<8x128xf32>,
    %62 = arith.truncf %60 : vector<8x128xf32> to vector<8x128xbf16>
    %c4 = arith.constant 4 : index
    %c0_59 = arith.constant 0 : index
    %c0_60 = arith.constant 0 : index
    %63 = vector.load %arg6[%c4, %c0_59, %c0_60] : memref<16x8x128xbf16, #tpu.memory_space<vmem>>, vector<1x8x128xbf16>
    %64 = vector.shape_cast %63 : vector<1x8x128xbf16> to vector<8x128xbf16>
    %65 = vector.shape_cast %62 : vector<8x128xbf16> to vector<1x8x128xbf16>
    tpu.vector_store %arg6[%c4, %c0_59, %c0_60], %65 {strides = array<i32>} : memref<16x8x128xbf16, #tpu.memory_space<vmem>>, vector<1x8x128xbf16>,
    %c40 = arith.constant 40 : index
    %c0_61 = arith.constant 0 : index
    %66 = vector.load %arg8[%c40, %c0_61] : memref<128x128xf32, #tpu.memory_space<vmem>>, vector<8x128xf32>
    %c0_62 = arith.constant 0 : index
    %c0_63 = arith.constant 0 : index
    %67 = vector.load %arg7[%c0_62, %c0_63] : memref<8x128xf32, #tpu.memory_space<vmem>>, vector<8x128xf32>
    %c0_64 = arith.constant 0 : index
    %c0_65 = arith.constant 0 : index
    %68 = vector.load %arg4[%c0_64, %c0_65] : memref<128x128xf32, #tpu.memory_space<vmem>>, vector<128x128xf32>
    %cst_66 = arith.constant dense<0.000000e+00> : vector<8x128xf32>
    %69 = tpu.matmul %67, %68, %cst_66 {dimension_numbers = #tpu.dot_dimension_numbers<[1], [0], [0], [1], [0, 0, 1, 1], [], []>} : vector<8x128xf32>, vector<128x128xf32>, vector<8x128xf32> -> vector<8x128xf32>
    %70 = arith.addf %66, %69 : vector<8x128xf32>
    %71 = math.tanh %70 : vector<8x128xf32>
    %c0_67 = arith.constant 0 : index
    %c0_68 = arith.constant 0 : index
    %72 = vector.load %arg7[%c0_67, %c0_68] : memref<8x128xf32, #tpu.memory_space<vmem>>, vector<8x128xf32>
    tpu.vector_store %arg7[%c0_67, %c0_68], %71 {strides = array<i32>} : memref<8x128xf32, #tpu.memory_space<vmem>>, vector<8x128xf32>,
    %73 = arith.truncf %71 : vector<8x128xf32> to vector<8x128xbf16>
    %c5 = arith.constant 5 : index
    %c0_69 = arith.constant 0 : index
    %c0_70 = arith.constant 0 : index
    %74 = vector.load %arg6[%c5, %c0_69, %c0_70] : memref<16x8x128xbf16, #tpu.memory_space<vmem>>, vector<1x8x128xbf16>
    %75 = vector.shape_cast %74 : vector<1x8x128xbf16> to vector<8x128xbf16>
    %76 = vector.shape_cast %73 : vector<8x128xbf16> to vector<1x8x128xbf16>
    tpu.vector_store %arg6[%c5, %c0_69, %c0_70], %76 {strides = array<i32>} : memref<16x8x128xbf16, #tpu.memory_space<vmem>>, vector<1x8x128xbf16>,
    %c48 = arith.constant 48 : index
    %c0_71 = arith.constant 0 : index
    %77 = vector.load %arg8[%c48, %c0_71] : memref<128x128xf32, #tpu.memory_space<vmem>>, vector<8x128xf32>
    %c0_72 = arith.constant 0 : index
    %c0_73 = arith.constant 0 : index
    %78 = vector.load %arg7[%c0_72, %c0_73] : memref<8x128xf32, #tpu.memory_space<vmem>>, vector<8x128xf32>
    %c0_74 = arith.constant 0 : index
    %c0_75 = arith.constant 0 : index
    %79 = vector.load %arg4[%c0_74, %c0_75] : memref<128x128xf32, #tpu.memory_space<vmem>>, vector<128x128xf32>
    %cst_76 = arith.constant dense<0.000000e+00> : vector<8x128xf32>
    %80 = tpu.matmul %78, %79, %cst_76 {dimension_numbers = #tpu.dot_dimension_numbers<[1], [0], [0], [1], [0, 0, 1, 1], [], []>} : vector<8x128xf32>, vector<128x128xf32>, vector<8x128xf32> -> vector<8x128xf32>
    %81 = arith.addf %77, %80 : vector<8x128xf32>
    %82 = math.tanh %81 : vector<8x128xf32>
    %c0_77 = arith.constant 0 : index
    %c0_78 = arith.constant 0 : index
    %83 = vector.load %arg7[%c0_77, %c0_78] : memref<8x128xf32, #tpu.memory_space<vmem>>, vector<8x128xf32>
    tpu.vector_store %arg7[%c0_77, %c0_78], %82 {strides = array<i32>} : memref<8x128xf32, #tpu.memory_space<vmem>>, vector<8x128xf32>,
    %84 = arith.truncf %82 : vector<8x128xf32> to vector<8x128xbf16>
    %c6 = arith.constant 6 : index
    %c0_79 = arith.constant 0 : index
    %c0_80 = arith.constant 0 : index
    %85 = vector.load %arg6[%c6, %c0_79, %c0_80] : memref<16x8x128xbf16, #tpu.memory_space<vmem>>, vector<1x8x128xbf16>
    %86 = vector.shape_cast %85 : vector<1x8x128xbf16> to vector<8x128xbf16>
    %87 = vector.shape_cast %84 : vector<8x128xbf16> to vector<1x8x128xbf16>
    tpu.vector_store %arg6[%c6, %c0_79, %c0_80], %87 {strides = array<i32>} : memref<16x8x128xbf16, #tpu.memory_space<vmem>>, vector<1x8x128xbf16>,
    %c56 = arith.constant 56 : index
    %c0_81 = arith.constant 0 : index
    %88 = vector.load %arg8[%c56, %c0_81] : memref<128x128xf32, #tpu.memory_space<vmem>>, vector<8x128xf32>
    %c0_82 = arith.constant 0 : index
    %c0_83 = arith.constant 0 : index
    %89 = vector.load %arg7[%c0_82, %c0_83] : memref<8x128xf32, #tpu.memory_space<vmem>>, vector<8x128xf32>
    %c0_84 = arith.constant 0 : index
    %c0_85 = arith.constant 0 : index
    %90 = vector.load %arg4[%c0_84, %c0_85] : memref<128x128xf32, #tpu.memory_space<vmem>>, vector<128x128xf32>
    %cst_86 = arith.constant dense<0.000000e+00> : vector<8x128xf32>
    %91 = tpu.matmul %89, %90, %cst_86 {dimension_numbers = #tpu.dot_dimension_numbers<[1], [0], [0], [1], [0, 0, 1, 1], [], []>} : vector<8x128xf32>, vector<128x128xf32>, vector<8x128xf32> -> vector<8x128xf32>
    %92 = arith.addf %88, %91 : vector<8x128xf32>
    %93 = math.tanh %92 : vector<8x128xf32>
    %c0_87 = arith.constant 0 : index
    %c0_88 = arith.constant 0 : index
    %94 = vector.load %arg7[%c0_87, %c0_88] : memref<8x128xf32, #tpu.memory_space<vmem>>, vector<8x128xf32>
    tpu.vector_store %arg7[%c0_87, %c0_88], %93 {strides = array<i32>} : memref<8x128xf32, #tpu.memory_space<vmem>>, vector<8x128xf32>,
    %95 = arith.truncf %93 : vector<8x128xf32> to vector<8x128xbf16>
    %c7 = arith.constant 7 : index
    %c0_89 = arith.constant 0 : index
    %c0_90 = arith.constant 0 : index
    %96 = vector.load %arg6[%c7, %c0_89, %c0_90] : memref<16x8x128xbf16, #tpu.memory_space<vmem>>, vector<1x8x128xbf16>
    %97 = vector.shape_cast %96 : vector<1x8x128xbf16> to vector<8x128xbf16>
    %98 = vector.shape_cast %95 : vector<8x128xbf16> to vector<1x8x128xbf16>
    tpu.vector_store %arg6[%c7, %c0_89, %c0_90], %98 {strides = array<i32>} : memref<16x8x128xbf16, #tpu.memory_space<vmem>>, vector<1x8x128xbf16>,
    %c64 = arith.constant 64 : index
    %c0_91 = arith.constant 0 : index
    %99 = vector.load %arg8[%c64, %c0_91] : memref<128x128xf32, #tpu.memory_space<vmem>>, vector<8x128xf32>
    %c0_92 = arith.constant 0 : index
    %c0_93 = arith.constant 0 : index
    %100 = vector.load %arg7[%c0_92, %c0_93] : memref<8x128xf32, #tpu.memory_space<vmem>>, vector<8x128xf32>
    %c0_94 = arith.constant 0 : index
    %c0_95 = arith.constant 0 : index
    %101 = vector.load %arg4[%c0_94, %c0_95] : memref<128x128xf32, #tpu.memory_space<vmem>>, vector<128x128xf32>
    %cst_96 = arith.constant dense<0.000000e+00> : vector<8x128xf32>
    %102 = tpu.matmul %100, %101, %cst_96 {dimension_numbers = #tpu.dot_dimension_numbers<[1], [0], [0], [1], [0, 0, 1, 1], [], []>} : vector<8x128xf32>, vector<128x128xf32>, vector<8x128xf32> -> vector<8x128xf32>
    %103 = arith.addf %99, %102 : vector<8x128xf32>
    %104 = math.tanh %103 : vector<8x128xf32>
    %c0_97 = arith.constant 0 : index
    %c0_98 = arith.constant 0 : index
    %105 = vector.load %arg7[%c0_97, %c0_98] : memref<8x128xf32, #tpu.memory_space<vmem>>, vector<8x128xf32>
    tpu.vector_store %arg7[%c0_97, %c0_98], %104 {strides = array<i32>} : memref<8x128xf32, #tpu.memory_space<vmem>>, vector<8x128xf32>,
    %106 = arith.truncf %104 : vector<8x128xf32> to vector<8x128xbf16>
    %c8_99 = arith.constant 8 : index
    %c0_100 = arith.constant 0 : index
    %c0_101 = arith.constant 0 : index
    %107 = vector.load %arg6[%c8_99, %c0_100, %c0_101] : memref<16x8x128xbf16, #tpu.memory_space<vmem>>, vector<1x8x128xbf16>
    %108 = vector.shape_cast %107 : vector<1x8x128xbf16> to vector<8x128xbf16>
    %109 = vector.shape_cast %106 : vector<8x128xbf16> to vector<1x8x128xbf16>
    tpu.vector_store %arg6[%c8_99, %c0_100, %c0_101], %109 {strides = array<i32>} : memref<16x8x128xbf16, #tpu.memory_space<vmem>>, vector<1x8x128xbf16>,
    %c72 = arith.constant 72 : index
    %c0_102 = arith.constant 0 : index
    %110 = vector.load %arg8[%c72, %c0_102] : memref<128x128xf32, #tpu.memory_space<vmem>>, vector<8x128xf32>
    %c0_103 = arith.constant 0 : index
    %c0_104 = arith.constant 0 : index
    %111 = vector.load %arg7[%c0_103, %c0_104] : memref<8x128xf32, #tpu.memory_space<vmem>>, vector<8x128xf32>
    %c0_105 = arith.constant 0 : index
    %c0_106 = arith.constant 0 : index
    %112 = vector.load %arg4[%c0_105, %c0_106] : memref<128x128xf32, #tpu.memory_space<vmem>>, vector<128x128xf32>
    %cst_107 = arith.constant dense<0.000000e+00> : vector<8x128xf32>
    %113 = tpu.matmul %111, %112, %cst_107 {dimension_numbers = #tpu.dot_dimension_numbers<[1], [0], [0], [1], [0, 0, 1, 1], [], []>} : vector<8x128xf32>, vector<128x128xf32>, vector<8x128xf32> -> vector<8x128xf32>
    %114 = arith.addf %110, %113 : vector<8x128xf32>
    %115 = math.tanh %114 : vector<8x128xf32>
    %c0_108 = arith.constant 0 : index
    %c0_109 = arith.constant 0 : index
    %116 = vector.load %arg7[%c0_108, %c0_109] : memref<8x128xf32, #tpu.memory_space<vmem>>, vector<8x128xf32>
    tpu.vector_store %arg7[%c0_108, %c0_109], %115 {strides = array<i32>} : memref<8x128xf32, #tpu.memory_space<vmem>>, vector<8x128xf32>,
    %117 = arith.truncf %115 : vector<8x128xf32> to vector<8x128xbf16>
    %c9 = arith.constant 9 : index
    %c0_110 = arith.constant 0 : index
    %c0_111 = arith.constant 0 : index
    %118 = vector.load %arg6[%c9, %c0_110, %c0_111] : memref<16x8x128xbf16, #tpu.memory_space<vmem>>, vector<1x8x128xbf16>
    %119 = vector.shape_cast %118 : vector<1x8x128xbf16> to vector<8x128xbf16>
    %120 = vector.shape_cast %117 : vector<8x128xbf16> to vector<1x8x128xbf16>
    tpu.vector_store %arg6[%c9, %c0_110, %c0_111], %120 {strides = array<i32>} : memref<16x8x128xbf16, #tpu.memory_space<vmem>>, vector<1x8x128xbf16>,
    %c80 = arith.constant 80 : index
    %c0_112 = arith.constant 0 : index
    %121 = vector.load %arg8[%c80, %c0_112] : memref<128x128xf32, #tpu.memory_space<vmem>>, vector<8x128xf32>
    %c0_113 = arith.constant 0 : index
    %c0_114 = arith.constant 0 : index
    %122 = vector.load %arg7[%c0_113, %c0_114] : memref<8x128xf32, #tpu.memory_space<vmem>>, vector<8x128xf32>
    %c0_115 = arith.constant 0 : index
    %c0_116 = arith.constant 0 : index
    %123 = vector.load %arg4[%c0_115, %c0_116] : memref<128x128xf32, #tpu.memory_space<vmem>>, vector<128x128xf32>
    %cst_117 = arith.constant dense<0.000000e+00> : vector<8x128xf32>
    %124 = tpu.matmul %122, %123, %cst_117 {dimension_numbers = #tpu.dot_dimension_numbers<[1], [0], [0], [1], [0, 0, 1, 1], [], []>} : vector<8x128xf32>, vector<128x128xf32>, vector<8x128xf32> -> vector<8x128xf32>
    %125 = arith.addf %121, %124 : vector<8x128xf32>
    %126 = math.tanh %125 : vector<8x128xf32>
    %c0_118 = arith.constant 0 : index
    %c0_119 = arith.constant 0 : index
    %127 = vector.load %arg7[%c0_118, %c0_119] : memref<8x128xf32, #tpu.memory_space<vmem>>, vector<8x128xf32>
    tpu.vector_store %arg7[%c0_118, %c0_119], %126 {strides = array<i32>} : memref<8x128xf32, #tpu.memory_space<vmem>>, vector<8x128xf32>,
    %128 = arith.truncf %126 : vector<8x128xf32> to vector<8x128xbf16>
    %c10 = arith.constant 10 : index
    %c0_120 = arith.constant 0 : index
    %c0_121 = arith.constant 0 : index
    %129 = vector.load %arg6[%c10, %c0_120, %c0_121] : memref<16x8x128xbf16, #tpu.memory_space<vmem>>, vector<1x8x128xbf16>
    %130 = vector.shape_cast %129 : vector<1x8x128xbf16> to vector<8x128xbf16>
    %131 = vector.shape_cast %128 : vector<8x128xbf16> to vector<1x8x128xbf16>
    tpu.vector_store %arg6[%c10, %c0_120, %c0_121], %131 {strides = array<i32>} : memref<16x8x128xbf16, #tpu.memory_space<vmem>>, vector<1x8x128xbf16>,
    %c88 = arith.constant 88 : index
    %c0_122 = arith.constant 0 : index
    %132 = vector.load %arg8[%c88, %c0_122] : memref<128x128xf32, #tpu.memory_space<vmem>>, vector<8x128xf32>
    %c0_123 = arith.constant 0 : index
    %c0_124 = arith.constant 0 : index
    %133 = vector.load %arg7[%c0_123, %c0_124] : memref<8x128xf32, #tpu.memory_space<vmem>>, vector<8x128xf32>
    %c0_125 = arith.constant 0 : index
    %c0_126 = arith.constant 0 : index
    %134 = vector.load %arg4[%c0_125, %c0_126] : memref<128x128xf32, #tpu.memory_space<vmem>>, vector<128x128xf32>
    %cst_127 = arith.constant dense<0.000000e+00> : vector<8x128xf32>
    %135 = tpu.matmul %133, %134, %cst_127 {dimension_numbers = #tpu.dot_dimension_numbers<[1], [0], [0], [1], [0, 0, 1, 1], [], []>} : vector<8x128xf32>, vector<128x128xf32>, vector<8x128xf32> -> vector<8x128xf32>
    %136 = arith.addf %132, %135 : vector<8x128xf32>
    %137 = math.tanh %136 : vector<8x128xf32>
    %c0_128 = arith.constant 0 : index
    %c0_129 = arith.constant 0 : index
    %138 = vector.load %arg7[%c0_128, %c0_129] : memref<8x128xf32, #tpu.memory_space<vmem>>, vector<8x128xf32>
    tpu.vector_store %arg7[%c0_128, %c0_129], %137 {strides = array<i32>} : memref<8x128xf32, #tpu.memory_space<vmem>>, vector<8x128xf32>,
    %139 = arith.truncf %137 : vector<8x128xf32> to vector<8x128xbf16>
    %c11 = arith.constant 11 : index
    %c0_130 = arith.constant 0 : index
    %c0_131 = arith.constant 0 : index
    %140 = vector.load %arg6[%c11, %c0_130, %c0_131] : memref<16x8x128xbf16, #tpu.memory_space<vmem>>, vector<1x8x128xbf16>
    %141 = vector.shape_cast %140 : vector<1x8x128xbf16> to vector<8x128xbf16>
    %142 = vector.shape_cast %139 : vector<8x128xbf16> to vector<1x8x128xbf16>
    tpu.vector_store %arg6[%c11, %c0_130, %c0_131], %142 {strides = array<i32>} : memref<16x8x128xbf16, #tpu.memory_space<vmem>>, vector<1x8x128xbf16>,
    %c96 = arith.constant 96 : index
    %c0_132 = arith.constant 0 : index
    %143 = vector.load %arg8[%c96, %c0_132] : memref<128x128xf32, #tpu.memory_space<vmem>>, vector<8x128xf32>
    %c0_133 = arith.constant 0 : index
    %c0_134 = arith.constant 0 : index
    %144 = vector.load %arg7[%c0_133, %c0_134] : memref<8x128xf32, #tpu.memory_space<vmem>>, vector<8x128xf32>
    %c0_135 = arith.constant 0 : index
    %c0_136 = arith.constant 0 : index
    %145 = vector.load %arg4[%c0_135, %c0_136] : memref<128x128xf32, #tpu.memory_space<vmem>>, vector<128x128xf32>
    %cst_137 = arith.constant dense<0.000000e+00> : vector<8x128xf32>
    %146 = tpu.matmul %144, %145, %cst_137 {dimension_numbers = #tpu.dot_dimension_numbers<[1], [0], [0], [1], [0, 0, 1, 1], [], []>} : vector<8x128xf32>, vector<128x128xf32>, vector<8x128xf32> -> vector<8x128xf32>
    %147 = arith.addf %143, %146 : vector<8x128xf32>
    %148 = math.tanh %147 : vector<8x128xf32>
    %c0_138 = arith.constant 0 : index
    %c0_139 = arith.constant 0 : index
    %149 = vector.load %arg7[%c0_138, %c0_139] : memref<8x128xf32, #tpu.memory_space<vmem>>, vector<8x128xf32>
    tpu.vector_store %arg7[%c0_138, %c0_139], %148 {strides = array<i32>} : memref<8x128xf32, #tpu.memory_space<vmem>>, vector<8x128xf32>,
    %150 = arith.truncf %148 : vector<8x128xf32> to vector<8x128xbf16>
    %c12 = arith.constant 12 : index
    %c0_140 = arith.constant 0 : index
    %c0_141 = arith.constant 0 : index
    %151 = vector.load %arg6[%c12, %c0_140, %c0_141] : memref<16x8x128xbf16, #tpu.memory_space<vmem>>, vector<1x8x128xbf16>
    %152 = vector.shape_cast %151 : vector<1x8x128xbf16> to vector<8x128xbf16>
    %153 = vector.shape_cast %150 : vector<8x128xbf16> to vector<1x8x128xbf16>
    tpu.vector_store %arg6[%c12, %c0_140, %c0_141], %153 {strides = array<i32>} : memref<16x8x128xbf16, #tpu.memory_space<vmem>>, vector<1x8x128xbf16>,
    %c104 = arith.constant 104 : index
    %c0_142 = arith.constant 0 : index
    %154 = vector.load %arg8[%c104, %c0_142] : memref<128x128xf32, #tpu.memory_space<vmem>>, vector<8x128xf32>
    %c0_143 = arith.constant 0 : index
    %c0_144 = arith.constant 0 : index
    %155 = vector.load %arg7[%c0_143, %c0_144] : memref<8x128xf32, #tpu.memory_space<vmem>>, vector<8x128xf32>
    %c0_145 = arith.constant 0 : index
    %c0_146 = arith.constant 0 : index
    %156 = vector.load %arg4[%c0_145, %c0_146] : memref<128x128xf32, #tpu.memory_space<vmem>>, vector<128x128xf32>
    %cst_147 = arith.constant dense<0.000000e+00> : vector<8x128xf32>
    %157 = tpu.matmul %155, %156, %cst_147 {dimension_numbers = #tpu.dot_dimension_numbers<[1], [0], [0], [1], [0, 0, 1, 1], [], []>} : vector<8x128xf32>, vector<128x128xf32>, vector<8x128xf32> -> vector<8x128xf32>
    %158 = arith.addf %154, %157 : vector<8x128xf32>
    %159 = math.tanh %158 : vector<8x128xf32>
    %c0_148 = arith.constant 0 : index
    %c0_149 = arith.constant 0 : index
    %160 = vector.load %arg7[%c0_148, %c0_149] : memref<8x128xf32, #tpu.memory_space<vmem>>, vector<8x128xf32>
    tpu.vector_store %arg7[%c0_148, %c0_149], %159 {strides = array<i32>} : memref<8x128xf32, #tpu.memory_space<vmem>>, vector<8x128xf32>,
    %161 = arith.truncf %159 : vector<8x128xf32> to vector<8x128xbf16>
    %c13 = arith.constant 13 : index
    %c0_150 = arith.constant 0 : index
    %c0_151 = arith.constant 0 : index
    %162 = vector.load %arg6[%c13, %c0_150, %c0_151] : memref<16x8x128xbf16, #tpu.memory_space<vmem>>, vector<1x8x128xbf16>
    %163 = vector.shape_cast %162 : vector<1x8x128xbf16> to vector<8x128xbf16>
    %164 = vector.shape_cast %161 : vector<8x128xbf16> to vector<1x8x128xbf16>
    tpu.vector_store %arg6[%c13, %c0_150, %c0_151], %164 {strides = array<i32>} : memref<16x8x128xbf16, #tpu.memory_space<vmem>>, vector<1x8x128xbf16>,
    %c112 = arith.constant 112 : index
    %c0_152 = arith.constant 0 : index
    %165 = vector.load %arg8[%c112, %c0_152] : memref<128x128xf32, #tpu.memory_space<vmem>>, vector<8x128xf32>
    %c0_153 = arith.constant 0 : index
    %c0_154 = arith.constant 0 : index
    %166 = vector.load %arg7[%c0_153, %c0_154] : memref<8x128xf32, #tpu.memory_space<vmem>>, vector<8x128xf32>
    %c0_155 = arith.constant 0 : index
    %c0_156 = arith.constant 0 : index
    %167 = vector.load %arg4[%c0_155, %c0_156] : memref<128x128xf32, #tpu.memory_space<vmem>>, vector<128x128xf32>
    %cst_157 = arith.constant dense<0.000000e+00> : vector<8x128xf32>
    %168 = tpu.matmul %166, %167, %cst_157 {dimension_numbers = #tpu.dot_dimension_numbers<[1], [0], [0], [1], [0, 0, 1, 1], [], []>} : vector<8x128xf32>, vector<128x128xf32>, vector<8x128xf32> -> vector<8x128xf32>
    %169 = arith.addf %165, %168 : vector<8x128xf32>
    %170 = math.tanh %169 : vector<8x128xf32>
    %c0_158 = arith.constant 0 : index
    %c0_159 = arith.constant 0 : index
    %171 = vector.load %arg7[%c0_158, %c0_159] : memref<8x128xf32, #tpu.memory_space<vmem>>, vector<8x128xf32>
    tpu.vector_store %arg7[%c0_158, %c0_159], %170 {strides = array<i32>} : memref<8x128xf32, #tpu.memory_space<vmem>>, vector<8x128xf32>,
    %172 = arith.truncf %170 : vector<8x128xf32> to vector<8x128xbf16>
    %c14 = arith.constant 14 : index
    %c0_160 = arith.constant 0 : index
    %c0_161 = arith.constant 0 : index
    %173 = vector.load %arg6[%c14, %c0_160, %c0_161] : memref<16x8x128xbf16, #tpu.memory_space<vmem>>, vector<1x8x128xbf16>
    %174 = vector.shape_cast %173 : vector<1x8x128xbf16> to vector<8x128xbf16>
    %175 = vector.shape_cast %172 : vector<8x128xbf16> to vector<1x8x128xbf16>
    tpu.vector_store %arg6[%c14, %c0_160, %c0_161], %175 {strides = array<i32>} : memref<16x8x128xbf16, #tpu.memory_space<vmem>>, vector<1x8x128xbf16>,
    %c120 = arith.constant 120 : index
    %c0_162 = arith.constant 0 : index
    %176 = vector.load %arg8[%c120, %c0_162] : memref<128x128xf32, #tpu.memory_space<vmem>>, vector<8x128xf32>
    %c0_163 = arith.constant 0 : index
    %c0_164 = arith.constant 0 : index
    %177 = vector.load %arg7[%c0_163, %c0_164] : memref<8x128xf32, #tpu.memory_space<vmem>>, vector<8x128xf32>
    %c0_165 = arith.constant 0 : index
    %c0_166 = arith.constant 0 : index
    %178 = vector.load %arg4[%c0_165, %c0_166] : memref<128x128xf32, #tpu.memory_space<vmem>>, vector<128x128xf32>
    %cst_167 = arith.constant dense<0.000000e+00> : vector<8x128xf32>
    %179 = tpu.matmul %177, %178, %cst_167 {dimension_numbers = #tpu.dot_dimension_numbers<[1], [0], [0], [1], [0, 0, 1, 1], [], []>} : vector<8x128xf32>, vector<128x128xf32>, vector<8x128xf32> -> vector<8x128xf32>
    %180 = arith.addf %176, %179 : vector<8x128xf32>
    %181 = math.tanh %180 : vector<8x128xf32>
    %c0_168 = arith.constant 0 : index
    %c0_169 = arith.constant 0 : index
    %182 = vector.load %arg7[%c0_168, %c0_169] : memref<8x128xf32, #tpu.memory_space<vmem>>, vector<8x128xf32>
    tpu.vector_store %arg7[%c0_168, %c0_169], %181 {strides = array<i32>} : memref<8x128xf32, #tpu.memory_space<vmem>>, vector<8x128xf32>,
    %183 = arith.truncf %181 : vector<8x128xf32> to vector<8x128xbf16>
    %c15 = arith.constant 15 : index
    %c0_170 = arith.constant 0 : index
    %c0_171 = arith.constant 0 : index
    %184 = vector.load %arg6[%c15, %c0_170, %c0_171] : memref<16x8x128xbf16, #tpu.memory_space<vmem>>, vector<1x8x128xbf16>
    %185 = vector.shape_cast %184 : vector<1x8x128xbf16> to vector<8x128xbf16>
    %186 = vector.shape_cast %183 : vector<8x128xbf16> to vector<1x8x128xbf16>
    tpu.vector_store %arg6[%c15, %c0_170, %c0_171], %186 {strides = array<i32>} : memref<16x8x128xbf16, #tpu.memory_space<vmem>>, vector<1x8x128xbf16>,
    return
  }
  func.func @transform_0(%arg0: i32, %arg1: i32) -> (i32, i32, i32) {
    %c0_i32 = arith.constant 0 : i32
    %c0_i32_0 = arith.constant 0 : i32
    return %arg1, %arg0, %c0_i32 : i32, i32, i32
  }
  func.func @transform_1(%arg0: i32, %arg1: i32) -> (i32, i32) {
    %c0_i32 = arith.constant 0 : i32
    %c0_i32_0 = arith.constant 0 : i32
    %c0_i32_1 = arith.constant 0 : i32
    return %c0_i32, %c0_i32_0 : i32, i32
  }
  func.func @transform_2(%arg0: i32, %arg1: i32) -> (i32, i32) {
    %c0_i32 = arith.constant 0 : i32
    %c0_i32_0 = arith.constant 0 : i32
    %c0_i32_1 = arith.constant 0 : i32
    return %c0_i32, %c0_i32_0 : i32, i32
  }
  func.func @transform_3(%arg0: i32, %arg1: i32) -> (i32, i32) {
    %c0_i32 = arith.constant 0 : i32
    %c0_i32_0 = arith.constant 0 : i32
    %c0_i32_1 = arith.constant 0 : i32
    return %c0_i32, %c0_i32_0 : i32, i32
  }
  func.func @transform_4(%arg0: i32, %arg1: i32) -> (i32, i32, i32) {
    %c0_i32 = arith.constant 0 : i32
    %c0_i32_0 = arith.constant 0 : i32
    return %arg1, %arg0, %c0_i32 : i32, i32, i32
  }
}

module attributes {stable_mosaic.version = 11 : i64} {
  func.func @rnn_recurrent_kernel(%arg0: i32, %arg1: i32, %arg2: memref<16x8x128xf32, #tpu.memory_space<vmem>>, %arg3: memref<128x128xf32, #tpu.memory_space<vmem>>, %arg4: memref<128x128xf32, #tpu.memory_space<vmem>>, %arg5: memref<1x128xf32, #tpu.memory_space<vmem>>, %arg6: memref<16x8x128xbf16, #tpu.memory_space<vmem>>, %arg7: memref<8x128xf32, #tpu.memory_space<vmem>>, %arg8: memref<128x128xf32, #tpu.memory_space<vmem>>) attributes {dimension_semantics = [#tpu.dimension_semantics<parallel>, #tpu.dimension_semantics<arbitrary>], iteration_bounds = array<i64: 1, 1>, scalar_prefetch = 0 : i64, scratch_operands = 2 : i64, tpu.core_type = #tpu.core_type<tc>, window_params = [{transform_indices = @transform_0, window_bounds = array<i64: 16, 8, 128>}, {pipeline_mode = #tpu.pipeline_mode<synchronous>, transform_indices = @transform_1, window_bounds = array<i64: 128, 128>}, {pipeline_mode = #tpu.pipeline_mode<synchronous>, transform_indices = @transform_2, window_bounds = array<i64: 128, 128>}, {pipeline_mode = #tpu.pipeline_mode<synchronous>, transform_indices = @transform_3, window_bounds = array<i64: 1, 128>}, {transform_indices = @transform_4, window_bounds = array<i64: 16, 8, 128>}]} {
    %c0_i32 = arith.constant 0 : i32
    %0 = arith.cmpi eq, %arg1, %c0_i32 : i32
    %1 = arith.extui %0 : i1 to i32
    %c0_i32_0 = arith.constant 0 : i32
    %2 = arith.cmpi ne, %1, %c0_i32_0 : i32
    scf.if %2 {
      %cst_172 = arith.constant 0.000000e+00 : f32
      %187 = vector.broadcast %cst_172 : f32 to vector<8x128xf32>
      %c0_173 = arith.constant 0 : index
      %c0_174 = arith.constant 0 : index
      %188 = vector.load %arg7[%c0_173, %c0_174] : memref<8x128xf32, #tpu.memory_space<vmem>>, vector<8x128xf32>
      tpu.vector_store %arg7[%c0_173, %c0_174], %187 {strides = array<i32>} : memref<8x128xf32, #tpu.memory_space<vmem>>, vector<8x128xf32>,
    } else {
    }
    %c0 = arith.constant 0 : index
    %c0_1 = arith.constant 0 : index
    %c0_2 = arith.constant 0 : index
    %3 = vector.load %arg2[%c0, %c0_1, %c0_2] : memref<16x8x128xf32, #tpu.memory_space<vmem>>, vector<16x8x128xf32>
    %4 = vector.shape_cast %3 : vector<16x8x128xf32> to vector<128x128xf32>
    %c0_3 = arith.constant 0 : index
    %c0_4 = arith.constant 0 : index
    %5 = vector.load %arg3[%c0_3, %c0_4] : memref<128x128xf32, #tpu.memory_space<vmem>>, vector<128x128xf32>
    %cst = arith.constant dense<0.000000e+00> : vector<128x128xf32>
    %6 = tpu.matmul %4, %5, %cst {dimension_numbers = #tpu.dot_dimension_numbers<[1], [0], [0], [1], [0, 0, 1, 1], [], []>} : vector<128x128xf32>, vector<128x128xf32>, vector<128x128xf32> -> vector<128x128xf32>
    %c0_5 = arith.constant 0 : index
    %c0_6 = arith.constant 0 : index
    %7 = vector.load %arg5[%c0_5, %c0_6] : memref<1x128xf32, #tpu.memory_space<vmem>>, vector<1x128xf32>
    %8 = vector.broadcast %7 : vector<1x128xf32> to vector<128x128xf32>
    %9 = arith.addf %6, %8 : vector<128x128xf32>
    %c0_7 = arith.constant 0 : index
    %c0_8 = arith.constant 0 : index
    %10 = vector.load %arg8[%c0_7, %c0_8] : memref<128x128xf32, #tpu.memory_space<vmem>>, vector<128x128xf32>
    tpu.vector_store %arg8[%c0_7, %c0_8], %9 {strides = array<i32>} : memref<128x128xf32, #tpu.memory_space<vmem>>, vector<128x128xf32>,
    %c0_9 = arith.constant 0 : index
    %c0_10 = arith.constant 0 : index
    %11 = vector.load %arg8[%c0_9, %c0_10] : memref<128x128xf32, #tpu.memory_space<vmem>>, vector<8x128xf32>
    %c0_11 = arith.constant 0 : index
    %c0_12 = arith.constant 0 : index
    %12 = vector.load %arg7[%c0_11, %c0_12] : memref<8x128xf32, #tpu.memory_space<vmem>>, vector<8x128xf32>
    %c0_13 = arith.constant 0 : index
    %c0_14 = arith.constant 0 : index
    %13 = vector.load %arg4[%c0_13, %c0_14] : memref<128x128xf32, #tpu.memory_space<vmem>>, vector<128x128xf32>
    %cst_15 = arith.constant dense<0.000000e+00> : vector<8x128xf32>
    %14 = tpu.matmul %12, %13, %cst_15 {dimension_numbers = #tpu.dot_dimension_numbers<[1], [0], [0], [1], [0, 0, 1, 1], [], []>} : vector<8x128xf32>, vector<128x128xf32>, vector<8x128xf32> -> vector<8x128xf32>
    %15 = arith.addf %11, %14 : vector<8x128xf32>
    %16 = math.tanh %15 : vector<8x128xf32>
    %c0_16 = arith.constant 0 : index
    %c0_17 = arith.constant 0 : index
    %17 = vector.load %arg7[%c0_16, %c0_17] : memref<8x128xf32, #tpu.memory_space<vmem>>, vector<8x128xf32>
    tpu.vector_store %arg7[%c0_16, %c0_17], %16 {strides = array<i32>} : memref<8x128xf32, #tpu.memory_space<vmem>>, vector<8x128xf32>,
    %18 = arith.truncf %16 : vector<8x128xf32> to vector<8x128xbf16>
    %c0_18 = arith.constant 0 : index
    %c0_19 = arith.constant 0 : index
    %c0_20 = arith.constant 0 : index
    %19 = vector.load %arg6[%c0_18, %c0_19, %c0_20] : memref<16x8x128xbf16, #tpu.memory_space<vmem>>, vector<1x8x128xbf16>
    %20 = vector.shape_cast %19 : vector<1x8x128xbf16> to vector<8x128xbf16>
    %21 = vector.shape_cast %18 : vector<8x128xbf16> to vector<1x8x128xbf16>
    tpu.vector_store %arg6[%c0_18, %c0_19, %c0_20], %21 {strides = array<i32>} : memref<16x8x128xbf16, #tpu.memory_space<vmem>>, vector<1x8x128xbf16>,
    %c8 = arith.constant 8 : index
    %c0_21 = arith.constant 0 : index
    %22 = vector.load %arg8[%c8, %c0_21] : memref<128x128xf32, #tpu.memory_space<vmem>>, vector<8x128xf32>
    %c0_22 = arith.constant 0 : index
    %c0_23 = arith.constant 0 : index
    %23 = vector.load %arg7[%c0_22, %c0_23] : memref<8x128xf32, #tpu.memory_space<vmem>>, vector<8x128xf32>
    %c0_24 = arith.constant 0 : index
    %c0_25 = arith.constant 0 : index
    %24 = vector.load %arg4[%c0_24, %c0_25] : memref<128x128xf32, #tpu.memory_space<vmem>>, vector<128x128xf32>
    %cst_26 = arith.constant dense<0.000000e+00> : vector<8x128xf32>
    %25 = tpu.matmul %23, %24, %cst_26 {dimension_numbers = #tpu.dot_dimension_numbers<[1], [0], [0], [1], [0, 0, 1, 1], [], []>} : vector<8x128xf32>, vector<128x128xf32>, vector<8x128xf32> -> vector<8x128xf32>
    %26 = arith.addf %22, %25 : vector<8x128xf32>
    %27 = math.tanh %26 : vector<8x128xf32>
    %c0_27 = arith.constant 0 : index
    %c0_28 = arith.constant 0 : index
    %28 = vector.load %arg7[%c0_27, %c0_28] : memref<8x128xf32, #tpu.memory_space<vmem>>, vector<8x128xf32>
    tpu.vector_store %arg7[%c0_27, %c0_28], %27 {strides = array<i32>} : memref<8x128xf32, #tpu.memory_space<vmem>>, vector<8x128xf32>,
    %29 = arith.truncf %27 : vector<8x128xf32> to vector<8x128xbf16>
    %c1 = arith.constant 1 : index
    %c0_29 = arith.constant 0 : index
    %c0_30 = arith.constant 0 : index
    %30 = vector.load %arg6[%c1, %c0_29, %c0_30] : memref<16x8x128xbf16, #tpu.memory_space<vmem>>, vector<1x8x128xbf16>
    %31 = vector.shape_cast %30 : vector<1x8x128xbf16> to vector<8x128xbf16>
    %32 = vector.shape_cast %29 : vector<8x128xbf16> to vector<1x8x128xbf16>
    tpu.vector_store %arg6[%c1, %c0_29, %c0_30], %32 {strides = array<i32>} : memref<16x8x128xbf16, #tpu.memory_space<vmem>>, vector<1x8x128xbf16>,
    %c16 = arith.constant 16 : index
    %c0_31 = arith.constant 0 : index
    %33 = vector.load %arg8[%c16, %c0_31] : memref<128x128xf32, #tpu.memory_space<vmem>>, vector<8x128xf32>
    %c0_32 = arith.constant 0 : index
    %c0_33 = arith.constant 0 : index
    %34 = vector.load %arg7[%c0_32, %c0_33] : memref<8x128xf32, #tpu.memory_space<vmem>>, vector<8x128xf32>
    %c0_34 = arith.constant 0 : index
    %c0_35 = arith.constant 0 : index
    %35 = vector.load %arg4[%c0_34, %c0_35] : memref<128x128xf32, #tpu.memory_space<vmem>>, vector<128x128xf32>
    %cst_36 = arith.constant dense<0.000000e+00> : vector<8x128xf32>
    %36 = tpu.matmul %34, %35, %cst_36 {dimension_numbers = #tpu.dot_dimension_numbers<[1], [0], [0], [1], [0, 0, 1, 1], [], []>} : vector<8x128xf32>, vector<128x128xf32>, vector<8x128xf32> -> vector<8x128xf32>
    %37 = arith.addf %33, %36 : vector<8x128xf32>
    %38 = math.tanh %37 : vector<8x128xf32>
    %c0_37 = arith.constant 0 : index
    %c0_38 = arith.constant 0 : index
    %39 = vector.load %arg7[%c0_37, %c0_38] : memref<8x128xf32, #tpu.memory_space<vmem>>, vector<8x128xf32>
    tpu.vector_store %arg7[%c0_37, %c0_38], %38 {strides = array<i32>} : memref<8x128xf32, #tpu.memory_space<vmem>>, vector<8x128xf32>,
    %40 = arith.truncf %38 : vector<8x128xf32> to vector<8x128xbf16>
    %c2 = arith.constant 2 : index
    %c0_39 = arith.constant 0 : index
    %c0_40 = arith.constant 0 : index
    %41 = vector.load %arg6[%c2, %c0_39, %c0_40] : memref<16x8x128xbf16, #tpu.memory_space<vmem>>, vector<1x8x128xbf16>
    %42 = vector.shape_cast %41 : vector<1x8x128xbf16> to vector<8x128xbf16>
    %43 = vector.shape_cast %40 : vector<8x128xbf16> to vector<1x8x128xbf16>
    tpu.vector_store %arg6[%c2, %c0_39, %c0_40], %43 {strides = array<i32>} : memref<16x8x128xbf16, #tpu.memory_space<vmem>>, vector<1x8x128xbf16>,
    %c24 = arith.constant 24 : index
    %c0_41 = arith.constant 0 : index
    %44 = vector.load %arg8[%c24, %c0_41] : memref<128x128xf32, #tpu.memory_space<vmem>>, vector<8x128xf32>
    %c0_42 = arith.constant 0 : index
    %c0_43 = arith.constant 0 : index
    %45 = vector.load %arg7[%c0_42, %c0_43] : memref<8x128xf32, #tpu.memory_space<vmem>>, vector<8x128xf32>
    %c0_44 = arith.constant 0 : index
    %c0_45 = arith.constant 0 : index
    %46 = vector.load %arg4[%c0_44, %c0_45] : memref<128x128xf32, #tpu.memory_space<vmem>>, vector<128x128xf32>
    %cst_46 = arith.constant dense<0.000000e+00> : vector<8x128xf32>
    %47 = tpu.matmul %45, %46, %cst_46 {dimension_numbers = #tpu.dot_dimension_numbers<[1], [0], [0], [1], [0, 0, 1, 1], [], []>} : vector<8x128xf32>, vector<128x128xf32>, vector<8x128xf32> -> vector<8x128xf32>
    %48 = arith.addf %44, %47 : vector<8x128xf32>
    %49 = math.tanh %48 : vector<8x128xf32>
    %c0_47 = arith.constant 0 : index
    %c0_48 = arith.constant 0 : index
    %50 = vector.load %arg7[%c0_47, %c0_48] : memref<8x128xf32, #tpu.memory_space<vmem>>, vector<8x128xf32>
    tpu.vector_store %arg7[%c0_47, %c0_48], %49 {strides = array<i32>} : memref<8x128xf32, #tpu.memory_space<vmem>>, vector<8x128xf32>,
    %51 = arith.truncf %49 : vector<8x128xf32> to vector<8x128xbf16>
    %c3 = arith.constant 3 : index
    %c0_49 = arith.constant 0 : index
    %c0_50 = arith.constant 0 : index
    %52 = vector.load %arg6[%c3, %c0_49, %c0_50] : memref<16x8x128xbf16, #tpu.memory_space<vmem>>, vector<1x8x128xbf16>
    %53 = vector.shape_cast %52 : vector<1x8x128xbf16> to vector<8x128xbf16>
    %54 = vector.shape_cast %51 : vector<8x128xbf16> to vector<1x8x128xbf16>
    tpu.vector_store %arg6[%c3, %c0_49, %c0_50], %54 {strides = array<i32>} : memref<16x8x128xbf16, #tpu.memory_space<vmem>>, vector<1x8x128xbf16>,
    %c32 = arith.constant 32 : index
    %c0_51 = arith.constant 0 : index
    %55 = vector.load %arg8[%c32, %c0_51] : memref<128x128xf32, #tpu.memory_space<vmem>>, vector<8x128xf32>
    %c0_52 = arith.constant 0 : index
    %c0_53 = arith.constant 0 : index
    %56 = vector.load %arg7[%c0_52, %c0_53] : memref<8x128xf32, #tpu.memory_space<vmem>>, vector<8x128xf32>
    %c0_54 = arith.constant 0 : index
    %c0_55 = arith.constant 0 : index
    %57 = vector.load %arg4[%c0_54, %c0_55] : memref<128x128xf32, #tpu.memory_space<vmem>>, vector<128x128xf32>
    %cst_56 = arith.constant dense<0.000000e+00> : vector<8x128xf32>
    %58 = tpu.matmul %56, %57, %cst_56 {dimension_numbers = #tpu.dot_dimension_numbers<[1], [0], [0], [1], [0, 0, 1, 1], [], []>} : vector<8x128xf32>, vector<128x128xf32>, vector<8x128xf32> -> vector<8x128xf32>
    %59 = arith.addf %55, %58 : vector<8x128xf32>
    %60 = math.tanh %59 : vector<8x128xf32>
    %c0_57 = arith.constant 0 : index
    %c0_58 = arith.constant 0 : index
    %61 = vector.load %arg7[%c0_57, %c0_58] : memref<8x128xf32, #tpu.memory_space<vmem>>, vector<8x128xf32>
    tpu.vector_store %arg7[%c0_57, %c0_58], %60 {strides = array<i32>} : memref<8x128xf32, #tpu.memory_space<vmem>>, vector<8x128xf32>,
    %62 = arith.truncf %60 : vector<8x128xf32> to vector<8x128xbf16>
    %c4 = arith.constant 4 : index
    %c0_59 = arith.constant 0 : index
    %c0_60 = arith.constant 0 : index
    %63 = vector.load %arg6[%c4, %c0_59, %c0_60] : memref<16x8x128xbf16, #tpu.memory_space<vmem>>, vector<1x8x128xbf16>
    %64 = vector.shape_cast %63 : vector<1x8x128xbf16> to vector<8x128xbf16>
    %65 = vector.shape_cast %62 : vector<8x128xbf16> to vector<1x8x128xbf16>
    tpu.vector_store %arg6[%c4, %c0_59, %c0_60], %65 {strides = array<i32>} : memref<16x8x128xbf16, #tpu.memory_space<vmem>>, vector<1x8x128xbf16>,
    %c40 = arith.constant 40 : index
    %c0_61 = arith.constant 0 : index
    %66 = vector.load %arg8[%c40, %c0_61] : memref<128x128xf32, #tpu.memory_space<vmem>>, vector<8x128xf32>
    %c0_62 = arith.constant 0 : index
    %c0_63 = arith.constant 0 : index
    %67 = vector.load %arg7[%c0_62, %c0_63] : memref<8x128xf32, #tpu.memory_space<vmem>>, vector<8x128xf32>
    %c0_64 = arith.constant 0 : index
    %c0_65 = arith.constant 0 : index
    %68 = vector.load %arg4[%c0_64, %c0_65] : memref<128x128xf32, #tpu.memory_space<vmem>>, vector<128x128xf32>
    %cst_66 = arith.constant dense<0.000000e+00> : vector<8x128xf32>
    %69 = tpu.matmul %67, %68, %cst_66 {dimension_numbers = #tpu.dot_dimension_numbers<[1], [0], [0], [1], [0, 0, 1, 1], [], []>} : vector<8x128xf32>, vector<128x128xf32>, vector<8x128xf32> -> vector<8x128xf32>
    %70 = arith.addf %66, %69 : vector<8x128xf32>
    %71 = math.tanh %70 : vector<8x128xf32>
    %c0_67 = arith.constant 0 : index
    %c0_68 = arith.constant 0 : index
    %72 = vector.load %arg7[%c0_67, %c0_68] : memref<8x128xf32, #tpu.memory_space<vmem>>, vector<8x128xf32>
    tpu.vector_store %arg7[%c0_67, %c0_68], %71 {strides = array<i32>} : memref<8x128xf32, #tpu.memory_space<vmem>>, vector<8x128xf32>,
    %73 = arith.truncf %71 : vector<8x128xf32> to vector<8x128xbf16>
    %c5 = arith.constant 5 : index
    %c0_69 = arith.constant 0 : index
    %c0_70 = arith.constant 0 : index
    %74 = vector.load %arg6[%c5, %c0_69, %c0_70] : memref<16x8x128xbf16, #tpu.memory_space<vmem>>, vector<1x8x128xbf16>
    %75 = vector.shape_cast %74 : vector<1x8x128xbf16> to vector<8x128xbf16>
    %76 = vector.shape_cast %73 : vector<8x128xbf16> to vector<1x8x128xbf16>
    tpu.vector_store %arg6[%c5, %c0_69, %c0_70], %76 {strides = array<i32>} : memref<16x8x128xbf16, #tpu.memory_space<vmem>>, vector<1x8x128xbf16>,
    %c48 = arith.constant 48 : index
    %c0_71 = arith.constant 0 : index
    %77 = vector.load %arg8[%c48, %c0_71] : memref<128x128xf32, #tpu.memory_space<vmem>>, vector<8x128xf32>
    %c0_72 = arith.constant 0 : index
    %c0_73 = arith.constant 0 : index
    %78 = vector.load %arg7[%c0_72, %c0_73] : memref<8x128xf32, #tpu.memory_space<vmem>>, vector<8x128xf32>
    %c0_74 = arith.constant 0 : index
    %c0_75 = arith.constant 0 : index
    %79 = vector.load %arg4[%c0_74, %c0_75] : memref<128x128xf32, #tpu.memory_space<vmem>>, vector<128x128xf32>
    %cst_76 = arith.constant dense<0.000000e+00> : vector<8x128xf32>
    %80 = tpu.matmul %78, %79, %cst_76 {dimension_numbers = #tpu.dot_dimension_numbers<[1], [0], [0], [1], [0, 0, 1, 1], [], []>} : vector<8x128xf32>, vector<128x128xf32>, vector<8x128xf32> -> vector<8x128xf32>
    %81 = arith.addf %77, %80 : vector<8x128xf32>
    %82 = math.tanh %81 : vector<8x128xf32>
    %c0_77 = arith.constant 0 : index
    %c0_78 = arith.constant 0 : index
    %83 = vector.load %arg7[%c0_77, %c0_78] : memref<8x128xf32, #tpu.memory_space<vmem>>, vector<8x128xf32>
    tpu.vector_store %arg7[%c0_77, %c0_78], %82 {strides = array<i32>} : memref<8x128xf32, #tpu.memory_space<vmem>>, vector<8x128xf32>,
    %84 = arith.truncf %82 : vector<8x128xf32> to vector<8x128xbf16>
    %c6 = arith.constant 6 : index
    %c0_79 = arith.constant 0 : index
    %c0_80 = arith.constant 0 : index
    %85 = vector.load %arg6[%c6, %c0_79, %c0_80] : memref<16x8x128xbf16, #tpu.memory_space<vmem>>, vector<1x8x128xbf16>
    %86 = vector.shape_cast %85 : vector<1x8x128xbf16> to vector<8x128xbf16>
    %87 = vector.shape_cast %84 : vector<8x128xbf16> to vector<1x8x128xbf16>
    tpu.vector_store %arg6[%c6, %c0_79, %c0_80], %87 {strides = array<i32>} : memref<16x8x128xbf16, #tpu.memory_space<vmem>>, vector<1x8x128xbf16>,
    %c56 = arith.constant 56 : index
    %c0_81 = arith.constant 0 : index
    %88 = vector.load %arg8[%c56, %c0_81] : memref<128x128xf32, #tpu.memory_space<vmem>>, vector<8x128xf32>
    %c0_82 = arith.constant 0 : index
    %c0_83 = arith.constant 0 : index
    %89 = vector.load %arg7[%c0_82, %c0_83] : memref<8x128xf32, #tpu.memory_space<vmem>>, vector<8x128xf32>
    %c0_84 = arith.constant 0 : index
    %c0_85 = arith.constant 0 : index
    %90 = vector.load %arg4[%c0_84, %c0_85] : memref<128x128xf32, #tpu.memory_space<vmem>>, vector<128x128xf32>
    %cst_86 = arith.constant dense<0.000000e+00> : vector<8x128xf32>
    %91 = tpu.matmul %89, %90, %cst_86 {dimension_numbers = #tpu.dot_dimension_numbers<[1], [0], [0], [1], [0, 0, 1, 1], [], []>} : vector<8x128xf32>, vector<128x128xf32>, vector<8x128xf32> -> vector<8x128xf32>
    %92 = arith.addf %88, %91 : vector<8x128xf32>
    %93 = math.tanh %92 : vector<8x128xf32>
    %c0_87 = arith.constant 0 : index
    %c0_88 = arith.constant 0 : index
    %94 = vector.load %arg7[%c0_87, %c0_88] : memref<8x128xf32, #tpu.memory_space<vmem>>, vector<8x128xf32>
    tpu.vector_store %arg7[%c0_87, %c0_88], %93 {strides = array<i32>} : memref<8x128xf32, #tpu.memory_space<vmem>>, vector<8x128xf32>,
    %95 = arith.truncf %93 : vector<8x128xf32> to vector<8x128xbf16>
    %c7 = arith.constant 7 : index
    %c0_89 = arith.constant 0 : index
    %c0_90 = arith.constant 0 : index
    %96 = vector.load %arg6[%c7, %c0_89, %c0_90] : memref<16x8x128xbf16, #tpu.memory_space<vmem>>, vector<1x8x128xbf16>
    %97 = vector.shape_cast %96 : vector<1x8x128xbf16> to vector<8x128xbf16>
    %98 = vector.shape_cast %95 : vector<8x128xbf16> to vector<1x8x128xbf16>
    tpu.vector_store %arg6[%c7, %c0_89, %c0_90], %98 {strides = array<i32>} : memref<16x8x128xbf16, #tpu.memory_space<vmem>>, vector<1x8x128xbf16>,
    %c64 = arith.constant 64 : index
    %c0_91 = arith.constant 0 : index
    %99 = vector.load %arg8[%c64, %c0_91] : memref<128x128xf32, #tpu.memory_space<vmem>>, vector<8x128xf32>
    %c0_92 = arith.constant 0 : index
    %c0_93 = arith.constant 0 : index
    %100 = vector.load %arg7[%c0_92, %c0_93] : memref<8x128xf32, #tpu.memory_space<vmem>>, vector<8x128xf32>
    %c0_94 = arith.constant 0 : index
    %c0_95 = arith.constant 0 : index
    %101 = vector.load %arg4[%c0_94, %c0_95] : memref<128x128xf32, #tpu.memory_space<vmem>>, vector<128x128xf32>
    %cst_96 = arith.constant dense<0.000000e+00> : vector<8x128xf32>
    %102 = tpu.matmul %100, %101, %cst_96 {dimension_numbers = #tpu.dot_dimension_numbers<[1], [0], [0], [1], [0, 0, 1, 1], [], []>} : vector<8x128xf32>, vector<128x128xf32>, vector<8x128xf32> -> vector<8x128xf32>
    %103 = arith.addf %99, %102 : vector<8x128xf32>
    %104 = math.tanh %103 : vector<8x128xf32>
    %c0_97 = arith.constant 0 : index
    %c0_98 = arith.constant 0 : index
    %105 = vector.load %arg7[%c0_97, %c0_98] : memref<8x128xf32, #tpu.memory_space<vmem>>, vector<8x128xf32>
    tpu.vector_store %arg7[%c0_97, %c0_98], %104 {strides = array<i32>} : memref<8x128xf32, #tpu.memory_space<vmem>>, vector<8x128xf32>,
    %106 = arith.truncf %104 : vector<8x128xf32> to vector<8x128xbf16>
    %c8_99 = arith.constant 8 : index
    %c0_100 = arith.constant 0 : index
    %c0_101 = arith.constant 0 : index
    %107 = vector.load %arg6[%c8_99, %c0_100, %c0_101] : memref<16x8x128xbf16, #tpu.memory_space<vmem>>, vector<1x8x128xbf16>
    %108 = vector.shape_cast %107 : vector<1x8x128xbf16> to vector<8x128xbf16>
    %109 = vector.shape_cast %106 : vector<8x128xbf16> to vector<1x8x128xbf16>
    tpu.vector_store %arg6[%c8_99, %c0_100, %c0_101], %109 {strides = array<i32>} : memref<16x8x128xbf16, #tpu.memory_space<vmem>>, vector<1x8x128xbf16>,
    %c72 = arith.constant 72 : index
    %c0_102 = arith.constant 0 : index
    %110 = vector.load %arg8[%c72, %c0_102] : memref<128x128xf32, #tpu.memory_space<vmem>>, vector<8x128xf32>
    %c0_103 = arith.constant 0 : index
    %c0_104 = arith.constant 0 : index
    %111 = vector.load %arg7[%c0_103, %c0_104] : memref<8x128xf32, #tpu.memory_space<vmem>>, vector<8x128xf32>
    %c0_105 = arith.constant 0 : index
    %c0_106 = arith.constant 0 : index
    %112 = vector.load %arg4[%c0_105, %c0_106] : memref<128x128xf32, #tpu.memory_space<vmem>>, vector<128x128xf32>
    %cst_107 = arith.constant dense<0.000000e+00> : vector<8x128xf32>
    %113 = tpu.matmul %111, %112, %cst_107 {dimension_numbers = #tpu.dot_dimension_numbers<[1], [0], [0], [1], [0, 0, 1, 1], [], []>} : vector<8x128xf32>, vector<128x128xf32>, vector<8x128xf32> -> vector<8x128xf32>
    %114 = arith.addf %110, %113 : vector<8x128xf32>
    %115 = math.tanh %114 : vector<8x128xf32>
    %c0_108 = arith.constant 0 : index
    %c0_109 = arith.constant 0 : index
    %116 = vector.load %arg7[%c0_108, %c0_109] : memref<8x128xf32, #tpu.memory_space<vmem>>, vector<8x128xf32>
    tpu.vector_store %arg7[%c0_108, %c0_109], %115 {strides = array<i32>} : memref<8x128xf32, #tpu.memory_space<vmem>>, vector<8x128xf32>,
    %117 = arith.truncf %115 : vector<8x128xf32> to vector<8x128xbf16>
    %c9 = arith.constant 9 : index
    %c0_110 = arith.constant 0 : index
    %c0_111 = arith.constant 0 : index
    %118 = vector.load %arg6[%c9, %c0_110, %c0_111] : memref<16x8x128xbf16, #tpu.memory_space<vmem>>, vector<1x8x128xbf16>
    %119 = vector.shape_cast %118 : vector<1x8x128xbf16> to vector<8x128xbf16>
    %120 = vector.shape_cast %117 : vector<8x128xbf16> to vector<1x8x128xbf16>
    tpu.vector_store %arg6[%c9, %c0_110, %c0_111], %120 {strides = array<i32>} : memref<16x8x128xbf16, #tpu.memory_space<vmem>>, vector<1x8x128xbf16>,
    %c80 = arith.constant 80 : index
    %c0_112 = arith.constant 0 : index
    %121 = vector.load %arg8[%c80, %c0_112] : memref<128x128xf32, #tpu.memory_space<vmem>>, vector<8x128xf32>
    %c0_113 = arith.constant 0 : index
    %c0_114 = arith.constant 0 : index
    %122 = vector.load %arg7[%c0_113, %c0_114] : memref<8x128xf32, #tpu.memory_space<vmem>>, vector<8x128xf32>
    %c0_115 = arith.constant 0 : index
    %c0_116 = arith.constant 0 : index
    %123 = vector.load %arg4[%c0_115, %c0_116] : memref<128x128xf32, #tpu.memory_space<vmem>>, vector<128x128xf32>
    %cst_117 = arith.constant dense<0.000000e+00> : vector<8x128xf32>
    %124 = tpu.matmul %122, %123, %cst_117 {dimension_numbers = #tpu.dot_dimension_numbers<[1], [0], [0], [1], [0, 0, 1, 1], [], []>} : vector<8x128xf32>, vector<128x128xf32>, vector<8x128xf32> -> vector<8x128xf32>
    %125 = arith.addf %121, %124 : vector<8x128xf32>
    %126 = math.tanh %125 : vector<8x128xf32>
    %c0_118 = arith.constant 0 : index
    %c0_119 = arith.constant 0 : index
    %127 = vector.load %arg7[%c0_118, %c0_119] : memref<8x128xf32, #tpu.memory_space<vmem>>, vector<8x128xf32>
    tpu.vector_store %arg7[%c0_118, %c0_119], %126 {strides = array<i32>} : memref<8x128xf32, #tpu.memory_space<vmem>>, vector<8x128xf32>,
    %128 = arith.truncf %126 : vector<8x128xf32> to vector<8x128xbf16>
    %c10 = arith.constant 10 : index
    %c0_120 = arith.constant 0 : index
    %c0_121 = arith.constant 0 : index
    %129 = vector.load %arg6[%c10, %c0_120, %c0_121] : memref<16x8x128xbf16, #tpu.memory_space<vmem>>, vector<1x8x128xbf16>
    %130 = vector.shape_cast %129 : vector<1x8x128xbf16> to vector<8x128xbf16>
    %131 = vector.shape_cast %128 : vector<8x128xbf16> to vector<1x8x128xbf16>
    tpu.vector_store %arg6[%c10, %c0_120, %c0_121], %131 {strides = array<i32>} : memref<16x8x128xbf16, #tpu.memory_space<vmem>>, vector<1x8x128xbf16>,
    %c88 = arith.constant 88 : index
    %c0_122 = arith.constant 0 : index
    %132 = vector.load %arg8[%c88, %c0_122] : memref<128x128xf32, #tpu.memory_space<vmem>>, vector<8x128xf32>
    %c0_123 = arith.constant 0 : index
    %c0_124 = arith.constant 0 : index
    %133 = vector.load %arg7[%c0_123, %c0_124] : memref<8x128xf32, #tpu.memory_space<vmem>>, vector<8x128xf32>
    %c0_125 = arith.constant 0 : index
    %c0_126 = arith.constant 0 : index
    %134 = vector.load %arg4[%c0_125, %c0_126] : memref<128x128xf32, #tpu.memory_space<vmem>>, vector<128x128xf32>
    %cst_127 = arith.constant dense<0.000000e+00> : vector<8x128xf32>
    %135 = tpu.matmul %133, %134, %cst_127 {dimension_numbers = #tpu.dot_dimension_numbers<[1], [0], [0], [1], [0, 0, 1, 1], [], []>} : vector<8x128xf32>, vector<128x128xf32>, vector<8x128xf32> -> vector<8x128xf32>
    %136 = arith.addf %132, %135 : vector<8x128xf32>
    %137 = math.tanh %136 : vector<8x128xf32>
    %c0_128 = arith.constant 0 : index
    %c0_129 = arith.constant 0 : index
    %138 = vector.load %arg7[%c0_128, %c0_129] : memref<8x128xf32, #tpu.memory_space<vmem>>, vector<8x128xf32>
    tpu.vector_store %arg7[%c0_128, %c0_129], %137 {strides = array<i32>} : memref<8x128xf32, #tpu.memory_space<vmem>>, vector<8x128xf32>,
    %139 = arith.truncf %137 : vector<8x128xf32> to vector<8x128xbf16>
    %c11 = arith.constant 11 : index
    %c0_130 = arith.constant 0 : index
    %c0_131 = arith.constant 0 : index
    %140 = vector.load %arg6[%c11, %c0_130, %c0_131] : memref<16x8x128xbf16, #tpu.memory_space<vmem>>, vector<1x8x128xbf16>
    %141 = vector.shape_cast %140 : vector<1x8x128xbf16> to vector<8x128xbf16>
    %142 = vector.shape_cast %139 : vector<8x128xbf16> to vector<1x8x128xbf16>
    tpu.vector_store %arg6[%c11, %c0_130, %c0_131], %142 {strides = array<i32>} : memref<16x8x128xbf16, #tpu.memory_space<vmem>>, vector<1x8x128xbf16>,
    %c96 = arith.constant 96 : index
    %c0_132 = arith.constant 0 : index
    %143 = vector.load %arg8[%c96, %c0_132] : memref<128x128xf32, #tpu.memory_space<vmem>>, vector<8x128xf32>
    %c0_133 = arith.constant 0 : index
    %c0_134 = arith.constant 0 : index
    %144 = vector.load %arg7[%c0_133, %c0_134] : memref<8x128xf32, #tpu.memory_space<vmem>>, vector<8x128xf32>
    %c0_135 = arith.constant 0 : index
    %c0_136 = arith.constant 0 : index
    %145 = vector.load %arg4[%c0_135, %c0_136] : memref<128x128xf32, #tpu.memory_space<vmem>>, vector<128x128xf32>
    %cst_137 = arith.constant dense<0.000000e+00> : vector<8x128xf32>
    %146 = tpu.matmul %144, %145, %cst_137 {dimension_numbers = #tpu.dot_dimension_numbers<[1], [0], [0], [1], [0, 0, 1, 1], [], []>} : vector<8x128xf32>, vector<128x128xf32>, vector<8x128xf32> -> vector<8x128xf32>
    %147 = arith.addf %143, %146 : vector<8x128xf32>
    %148 = math.tanh %147 : vector<8x128xf32>
    %c0_138 = arith.constant 0 : index
    %c0_139 = arith.constant 0 : index
    %149 = vector.load %arg7[%c0_138, %c0_139] : memref<8x128xf32, #tpu.memory_space<vmem>>, vector<8x128xf32>
    tpu.vector_store %arg7[%c0_138, %c0_139], %148 {strides = array<i32>} : memref<8x128xf32, #tpu.memory_space<vmem>>, vector<8x128xf32>,
    %150 = arith.truncf %148 : vector<8x128xf32> to vector<8x128xbf16>
    %c12 = arith.constant 12 : index
    %c0_140 = arith.constant 0 : index
    %c0_141 = arith.constant 0 : index
    %151 = vector.load %arg6[%c12, %c0_140, %c0_141] : memref<16x8x128xbf16, #tpu.memory_space<vmem>>, vector<1x8x128xbf16>
    %152 = vector.shape_cast %151 : vector<1x8x128xbf16> to vector<8x128xbf16>
    %153 = vector.shape_cast %150 : vector<8x128xbf16> to vector<1x8x128xbf16>
    tpu.vector_store %arg6[%c12, %c0_140, %c0_141], %153 {strides = array<i32>} : memref<16x8x128xbf16, #tpu.memory_space<vmem>>, vector<1x8x128xbf16>,
    %c104 = arith.constant 104 : index
    %c0_142 = arith.constant 0 : index
    %154 = vector.load %arg8[%c104, %c0_142] : memref<128x128xf32, #tpu.memory_space<vmem>>, vector<8x128xf32>
    %c0_143 = arith.constant 0 : index
    %c0_144 = arith.constant 0 : index
    %155 = vector.load %arg7[%c0_143, %c0_144] : memref<8x128xf32, #tpu.memory_space<vmem>>, vector<8x128xf32>
    %c0_145 = arith.constant 0 : index
    %c0_146 = arith.constant 0 : index
    %156 = vector.load %arg4[%c0_145, %c0_146] : memref<128x128xf32, #tpu.memory_space<vmem>>, vector<128x128xf32>
    %cst_147 = arith.constant dense<0.000000e+00> : vector<8x128xf32>
    %157 = tpu.matmul %155, %156, %cst_147 {dimension_numbers = #tpu.dot_dimension_numbers<[1], [0], [0], [1], [0, 0, 1, 1], [], []>} : vector<8x128xf32>, vector<128x128xf32>, vector<8x128xf32> -> vector<8x128xf32>
    %158 = arith.addf %154, %157 : vector<8x128xf32>
    %159 = math.tanh %158 : vector<8x128xf32>
    %c0_148 = arith.constant 0 : index
    %c0_149 = arith.constant 0 : index
    %160 = vector.load %arg7[%c0_148, %c0_149] : memref<8x128xf32, #tpu.memory_space<vmem>>, vector<8x128xf32>
    tpu.vector_store %arg7[%c0_148, %c0_149], %159 {strides = array<i32>} : memref<8x128xf32, #tpu.memory_space<vmem>>, vector<8x128xf32>,
    %161 = arith.truncf %159 : vector<8x128xf32> to vector<8x128xbf16>
    %c13 = arith.constant 13 : index
    %c0_150 = arith.constant 0 : index
    %c0_151 = arith.constant 0 : index
    %162 = vector.load %arg6[%c13, %c0_150, %c0_151] : memref<16x8x128xbf16, #tpu.memory_space<vmem>>, vector<1x8x128xbf16>
    %163 = vector.shape_cast %162 : vector<1x8x128xbf16> to vector<8x128xbf16>
    %164 = vector.shape_cast %161 : vector<8x128xbf16> to vector<1x8x128xbf16>
    tpu.vector_store %arg6[%c13, %c0_150, %c0_151], %164 {strides = array<i32>} : memref<16x8x128xbf16, #tpu.memory_space<vmem>>, vector<1x8x128xbf16>,
    %c112 = arith.constant 112 : index
    %c0_152 = arith.constant 0 : index
    %165 = vector.load %arg8[%c112, %c0_152] : memref<128x128xf32, #tpu.memory_space<vmem>>, vector<8x128xf32>
    %c0_153 = arith.constant 0 : index
    %c0_154 = arith.constant 0 : index
    %166 = vector.load %arg7[%c0_153, %c0_154] : memref<8x128xf32, #tpu.memory_space<vmem>>, vector<8x128xf32>
    %c0_155 = arith.constant 0 : index
    %c0_156 = arith.constant 0 : index
    %167 = vector.load %arg4[%c0_155, %c0_156] : memref<128x128xf32, #tpu.memory_space<vmem>>, vector<128x128xf32>
    %cst_157 = arith.constant dense<0.000000e+00> : vector<8x128xf32>
    %168 = tpu.matmul %166, %167, %cst_157 {dimension_numbers = #tpu.dot_dimension_numbers<[1], [0], [0], [1], [0, 0, 1, 1], [], []>} : vector<8x128xf32>, vector<128x128xf32>, vector<8x128xf32> -> vector<8x128xf32>
    %169 = arith.addf %165, %168 : vector<8x128xf32>
    %170 = math.tanh %169 : vector<8x128xf32>
    %c0_158 = arith.constant 0 : index
    %c0_159 = arith.constant 0 : index
    %171 = vector.load %arg7[%c0_158, %c0_159] : memref<8x128xf32, #tpu.memory_space<vmem>>, vector<8x128xf32>
    tpu.vector_store %arg7[%c0_158, %c0_159], %170 {strides = array<i32>} : memref<8x128xf32, #tpu.memory_space<vmem>>, vector<8x128xf32>,
    %172 = arith.truncf %170 : vector<8x128xf32> to vector<8x128xbf16>
    %c14 = arith.constant 14 : index
    %c0_160 = arith.constant 0 : index
    %c0_161 = arith.constant 0 : index
    %173 = vector.load %arg6[%c14, %c0_160, %c0_161] : memref<16x8x128xbf16, #tpu.memory_space<vmem>>, vector<1x8x128xbf16>
    %174 = vector.shape_cast %173 : vector<1x8x128xbf16> to vector<8x128xbf16>
    %175 = vector.shape_cast %172 : vector<8x128xbf16> to vector<1x8x128xbf16>
    tpu.vector_store %arg6[%c14, %c0_160, %c0_161], %175 {strides = array<i32>} : memref<16x8x128xbf16, #tpu.memory_space<vmem>>, vector<1x8x128xbf16>,
    %c120 = arith.constant 120 : index
    %c0_162 = arith.constant 0 : index
    %176 = vector.load %arg8[%c120, %c0_162] : memref<128x128xf32, #tpu.memory_space<vmem>>, vector<8x128xf32>
    %c0_163 = arith.constant 0 : index
    %c0_164 = arith.constant 0 : index
    %177 = vector.load %arg7[%c0_163, %c0_164] : memref<8x128xf32, #tpu.memory_space<vmem>>, vector<8x128xf32>
    %c0_165 = arith.constant 0 : index
    %c0_166 = arith.constant 0 : index
    %178 = vector.load %arg4[%c0_165, %c0_166] : memref<128x128xf32, #tpu.memory_space<vmem>>, vector<128x128xf32>
    %cst_167 = arith.constant dense<0.000000e+00> : vector<8x128xf32>
    %179 = tpu.matmul %177, %178, %cst_167 {dimension_numbers = #tpu.dot_dimension_numbers<[1], [0], [0], [1], [0, 0, 1, 1], [], []>} : vector<8x128xf32>, vector<128x128xf32>, vector<8x128xf32> -> vector<8x128xf32>
    %180 = arith.addf %176, %179 : vector<8x128xf32>
    %181 = math.tanh %180 : vector<8x128xf32>
    %c0_168 = arith.constant 0 : index
    %c0_169 = arith.constant 0 : index
    %182 = vector.load %arg7[%c0_168, %c0_169] : memref<8x128xf32, #tpu.memory_space<vmem>>, vector<8x128xf32>
    tpu.vector_store %arg7[%c0_168, %c0_169], %181 {strides = array<i32>} : memref<8x128xf32, #tpu.memory_space<vmem>>, vector<8x128xf32>,
    %183 = arith.truncf %181 : vector<8x128xf32> to vector<8x128xbf16>
    %c15 = arith.constant 15 : index
    %c0_170 = arith.constant 0 : index
    %c0_171 = arith.constant 0 : index
    %184 = vector.load %arg6[%c15, %c0_170, %c0_171] : memref<16x8x128xbf16, #tpu.memory_space<vmem>>, vector<1x8x128xbf16>
    %185 = vector.shape_cast %184 : vector<1x8x128xbf16> to vector<8x128xbf16>
    %186 = vector.shape_cast %183 : vector<8x128xbf16> to vector<1x8x128xbf16>
    tpu.vector_store %arg6[%c15, %c0_170, %c0_171], %186 {strides = array<i32>} : memref<16x8x128xbf16, #tpu.memory_space<vmem>>, vector<1x8x128xbf16>,
    return
  }
  func.func @transform_0(%arg0: i32, %arg1: i32) -> (i32, i32, i32) {
    %c0_i32 = arith.constant 0 : i32
    %c0_i32_0 = arith.constant 0 : i32
    return %arg1, %arg0, %c0_i32 : i32, i32, i32
  }
  func.func @transform_1(%arg0: i32, %arg1: i32) -> (i32, i32) {
    %c0_i32 = arith.constant 0 : i32
    %c0_i32_0 = arith.constant 0 : i32
    %c0_i32_1 = arith.constant 0 : i32
    return %c0_i32, %c0_i32_0 : i32, i32
  }
  func.func @transform_2(%arg0: i32, %arg1: i32) -> (i32, i32) {
    %c0_i32 = arith.constant 0 : i32
    %c0_i32_0 = arith.constant 0 : i32
    %c0_i32_1 = arith.constant 0 : i32
    return %c0_i32, %c0_i32_0 : i32, i32
  }
  func.func @transform_3(%arg0: i32, %arg1: i32) -> (i32, i32) {
    %c0_i32 = arith.constant 0 : i32
    %c0_i32_0 = arith.constant 0 : i32
    %c0_i32_1 = arith.constant 0 : i32
    return %c0_i32, %c0_i32_0 : i32, i32
  }
  func.func @transform_4(%arg0: i32, %arg1: i32) -> (i32, i32, i32) {
    %c0_i32 = arith.constant 0 : i32
    %c0_i32_0 = arith.constant 0 : i32
    return %arg1, %arg0, %c0_i32 : i32, i32, i32
  }
}

</mosaic_0001>

<bundles_post_ra>
// kernel: tpu_custom_call.1
= control target key start
LH: loop header
LB: loop body
LE: loop exit
PB: predicated region body
PF: predicated region fallthrough
CT: control target
= control target key end

     0   :  { %9 = vsyncpa [#allocation5], 0  ;;  %s3550_s0 = inlined_call_operand.hbm [shape: f32[16,8,128], index: 0, kind: input, shape index: {}]   ;;  %s3551_s1 = inlined_call_operand.hbm [shape: f32[128,128], index: 1, kind: input, shape index: {}]   ;;  %s3552_s2 = inlined_call_operand.hbm [shape: f32[128,128], index: 2, kind: input, shape index: {}]   ;;  %s3553_s3 = inlined_call_operand.vmem [shape: f32[1,128], index: 3, kind: input, shape index: {}]   ;;  %s3554_s4 = inlined_call_operand.hbm [shape: bf16[16,8,128], index: 4, kind: output, shape index: {}]  }
   0x1   :  { %10 = vsyncpa [#allocation8], 0 }
   0x2   :  { %11 = vsyncpa [#allocation6], 0  ;;  %s2835_s15 = smov [#allocation7]   ;;  %s2836_s17 = smov [#allocation4]  }
   0x3   :  { %s29_s16 = sshll.u32 %s2835_s15, 4  ;;  %s17_s18 = sshll.u32 %s2836_s17, 4  ;;  %s30_s16 = int_to_ptr.vmem [resolvable:$true] %s29_s16  ;;  %s18_s18 = int_to_ptr.vmem [resolvable:$true] %s17_s18 }
   0x4   :  { %s2757_s19 = scalar_lea.vmem %s30_s16, 2048  ;;  %p2762_p1 = scmp.lt.s32.totalorder %s30_s16, %s30_s16 }
   0x5   :  { %p2758_p0 = scmp.ne.s32.totalorder %s30_s16, %s2757_s19  ;;  %p2763_p2 = scmp.lt.s32.totalorder %s2757_s19, %s2757_s19 }
   0x7   :  { %p2764_p3 = por %p2763_p2, %p2762_p1 }
   0x9   :  { %p2765_p4 = pnand %p2764_p3, %p2758_p0 }
   0xb   :  { %2768 = shalt.err (!%p2765_p4)
}
   0xc   :  { %s2837_s20 = smov 128   ;;  %s2838_s21 = smov 8  }
   0xd   :  { %35 = dma.hbm_to_vmem [thread:$0]  %s3551_s1, 2048, %s30_s16, [#allocation8], %s2837_s20, %s2837_s20, %s2838_s21  }
   0xe   :  { %s2777_s24 = scalar_lea.vmem %s18_s18, 2048  ;;  %p2782_p6 = scmp.lt.s32.totalorder %s18_s18, %s18_s18 }
   0xf   :  { %p2778_p5 = scmp.ne.s32.totalorder %s18_s18, %s2777_s24  ;;  %p2783_p7 = scmp.lt.s32.totalorder %s2777_s24, %s2777_s24 }
  0x11   :  { %p2784_p8 = por %p2783_p7, %p2782_p6 }
  0x13   :  { %p2785_p9 = pnand %p2784_p8, %p2778_p5 }
  0x15   :  { %2788 = shalt.err (!%p2785_p9)
}
  0x16   :  { %23 = dma.hbm_to_vmem [thread:$0]  %s3550_s0, 2048, %s18_s18, [#allocation5], %s2837_s20, %s2837_s20, %s2838_s21  }
  0x17   :  { %s2839_s27 = smov [#allocation9]  }
  0x18   :  { %s41_s28 = sshll.u32 %s2839_s27, 4  ;;  %s42_s28 = int_to_ptr.vmem [resolvable:$true] %s41_s28 }
  0x19   :  { %s2797_s29 = scalar_lea.vmem %s42_s28, 2048  ;;  %p2802_p11 = scmp.lt.s32.totalorder %s42_s28, %s42_s28 }
  0x1a   :  { %p2798_p10 = scmp.ne.s32.totalorder %s42_s28, %s2797_s29  ;;  %p2803_p12 = scmp.lt.s32.totalorder %s2797_s29, %s2797_s29 }
  0x1c   :  { %p2804_p13 = por %p2803_p12, %p2802_p11 }
  0x1e   :  { %p2805_p0 = pnand %p2804_p13, %p2798_p10 }
  0x20   :  { %2808 = shalt.err (!%p2805_p0)
}
  0x21   :  { %47 = dma.hbm_to_vmem [thread:$0]  %s3552_s2, 2048, %s42_s28, [#allocation8], %s2837_s20, %s2837_s20, %s2838_s21  }
  0x22   :  { %2829 = dma.done.wait [#allocation5], 2048  }
  0x23   :  { %2830 = vsyncadd [#allocation5], 4294965248 }
  0x24   :  { %2831 = dma.done.wait [#allocation8], 4096  }
  0x25   :  { %2832 = vsyncadd [#allocation8], 4294963200  ;;  %v2840_v0 = vmov 0.0   ;;  %vm2841_vm0 = vmmov 0   ;;  %v95_v1 = vld [vmem:[#allocation7 + $0x78] sm:$0xff]  ;;  %v94_v2 = vld [vmem:[#allocation7 + $0x70] sm:$0xff] }
  0x26   :  { %2146 = vmatprep.subr.mxu1 %v2840_v0  ;;  %2178 = vmatprep.mubr.msk.f32.mxu1 %vm2841_vm0, %v2840_v0  ;;  %v2882_v3 = vld [vmem:[#allocation9 + $0x78] sm:$0xff]  ;;  %v2885_v4 = vld [vmem:[#allocation9 + $0x70] sm:$0xff]  ;;  %v93_v5 = vld [vmem:[#allocation7 + $0x68] sm:$0xff] }
  0x27   :  { %2090 = vmatprep.subr.mxu0 %v95_v1  ;;  %2147 = vmatpush3.msra.mxu1 %v2882_v3  ;;  %v2888_v6 = vld [vmem:[#allocation9 + $0x68] sm:$0xff]  ;;  %v92_v7 = vld [vmem:[#allocation7 + $0x60] sm:$0xff]  ;;  %v91_v9 = vld [vmem:[#allocation7 + $0x58] sm:$0xff] }
  0x28   :  { %2091 = vmatpush3.msra.mxu0 %v95_v1  ;;  %2148 = vmatprep.subr.mxu1 %v2840_v0  ;;  %v2892_v8 = vld [vmem:[#allocation9 + $0x60] sm:$0xff]  ;;  %v2896_v10 = vld [vmem:[#allocation9 + $0x58] sm:$0xff]  ;;  %v90_v11 = vld [vmem:[#allocation7 + $0x50] sm:$0xff] }
  0x29   :  { %2092 = vmatprep.subr.mxu0 %v94_v2  ;;  %2149 = vmatpush3.msra.mxu1 %v2885_v4  ;;  %v2900_v12 = vld [vmem:[#allocation9 + $0x50] sm:$0xff]  ;;  %v89_v13 = vld [vmem:[#allocation7 + $0x48] sm:$0xff]  ;;  %v88_v15 = vld [vmem:[#allocation7 + $0x40] sm:$0xff] }
  0x2a   :  { %2093 = vmatpush3.msra.mxu0 %v94_v2  ;;  %2150 = vmatprep.subr.mxu1 %v2840_v0  ;;  %v2904_v14 = vld [vmem:[#allocation9 + $0x48] sm:$0xff]  ;;  %v2908_v16 = vld [vmem:[#allocation9 + $0x40] sm:$0xff]  ;;  %v87_v17 = vld [vmem:[#allocation7 + $0x38] sm:$0xff] }
  0x2b   :  { %2094 = vmatprep.subr.mxu0 %v93_v5  ;;  %2151 = vmatpush3.msra.mxu1 %v2888_v6  ;;  %v2912_v18 = vld [vmem:[#allocation9 + $0x38] sm:$0xff]  ;;  %v86_v19 = vld [vmem:[#allocation7 + $0x30] sm:$0xff]  ;;  %v85_v21 = vld [vmem:[#allocation7 + $0x28] sm:$0xff] }
  0x2c   :  { %2095 = vmatpush3.msra.mxu0 %v93_v5  ;;  %2152 = vmatprep.subr.mxu1 %v2840_v0  ;;  %v2916_v20 = vld [vmem:[#allocation9 + $0x30] sm:$0xff]  ;;  %v2920_v22 = vld [vmem:[#allocation9 + $0x28] sm:$0xff]  ;;  %v84_v23 = vld [vmem:[#allocation7 + $0x20] sm:$0xff] }
  0x2d   :  { %2096 = vmatprep.subr.mxu0 %v92_v7  ;;  %2153 = vmatpush3.msra.mxu1 %v2892_v8  ;;  %v2924_v24 = vld [vmem:[#allocation9 + $0x20] sm:$0xff]  ;;  %v83_v25 = vld [vmem:[#allocation7 + $0x18] sm:$0xff]  ;;  %v82_v27 = vld [vmem:[#allocation7 + $0x10] sm:$0xff] }
  0x2e   :  { %2097 = vmatpush3.msra.mxu0 %v92_v7  ;;  %2154 = vmatprep.subr.mxu1 %v2840_v0  ;;  %v2928_v26 = vld [vmem:[#allocation9 + $0x18] sm:$0xff]  ;;  %v2932_v28 = vld [vmem:[#allocation9 + $0x10] sm:$0xff]  ;;  %v81_v29 = vld [vmem:[#allocation7 + $0x8] sm:$0xff] }
  0x2f   :  { %2098 = vmatprep.subr.mxu0 %v91_v9  ;;  %2155 = vmatpush3.msra.mxu1 %v2896_v10  ;;  %v64_v30 = vld [vmem:[#allocation4] sm:$0xff]  ;;  %v2937_v31 = vld [vmem:[#allocation9 + $0x8] sm:$0xff]  ;;  %v66_v35 = vld [vmem:[#allocation4 + $0x10] sm:$0xff] }
  0x30   :  { %2099 = vmatpush3.msra.mxu0 %v91_v9  ;;  %2156 = vmatprep.subr.mxu1 %v2840_v0  ;;  %v80_v32 = vld [vmem:[#allocation7] sm:$0xff]  ;;  %v65_v34 = vld [vmem:[#allocation4 + $0x8] sm:$0xff]  ;;  %v67_v36 = vld [vmem:[#allocation4 + $0x18] sm:$0xff] }
  0x31   :  { %2100 = vmatprep.subr.mxu0 %v90_v11  ;;  %2157 = vmatpush3.msra.mxu1 %v2900_v12  ;;  %v2940_v33 = vld [vmem:[#allocation9] sm:$0xff]  ;;  %v69_v38 = vld [vmem:[#allocation4 + $0x28] sm:$0xff]  ;;  %v70_v39 = vld [vmem:[#allocation4 + $0x30] sm:$0xff] }
  0x32   :  { %2101 = vmatpush3.msra.mxu0 %v90_v11  ;;  %2158 = vmatprep.subr.mxu1 %v2840_v0  ;;  %v68_v37 = vld [vmem:[#allocation4 + $0x20] sm:$0xff]  ;;  %v71_v40 = vld [vmem:[#allocation4 + $0x38] sm:$0xff]  ;;  %v73_v42 = vld [vmem:[#allocation4 + $0x48] sm:$0xff] }
  0x33   :  { %2102 = vmatprep.subr.mxu0 %v89_v13  ;;  %2159 = vmatpush3.msra.mxu1 %v2904_v14  ;;  %v72_v41 = vld [vmem:[#allocation4 + $0x40] sm:$0xff]  ;;  %v74_v43 = vld [vmem:[#allocation4 + $0x50] sm:$0xff]  ;;  %v75_v44 = vld [vmem:[#allocation4 + $0x58] sm:$0xff] }
  0x34   :  { %2103 = vmatpush3.msra.mxu0 %v89_v13  ;;  %2160 = vmatprep.subr.mxu1 %v2840_v0  ;;  %v76_v45 = vld [vmem:[#allocation4 + $0x60] sm:$0xff]  ;;  %v77_v46 = vld [vmem:[#allocation4 + $0x68] sm:$0xff]  ;;  %v78_v47 = vld [vmem:[#allocation4 + $0x70] sm:$0xff] }
  0x35   :  { %2104 = vmatprep.subr.mxu0 %v88_v15  ;;  %2161 = vmatpush3.msra.mxu1 %v2908_v16  ;;  %v79_v48 = vld [vmem:[#allocation4 + $0x78] sm:$0xff]  ;;  %v3019_v51 = vld [vmem:[%s3553_s3] ss:$0 sm:$0xff] }
  0x36   :  { %2105 = vmatpush3.msra.mxu0 %v88_v15  ;;  %2162 = vmatprep.subr.mxu1 %v2840_v0 }
  0x37   :  { %2106 = vmatprep.subr.mxu0 %v87_v17  ;;  %2163 = vmatpush3.msra.mxu1 %v2912_v18 }
  0x38   :  { %2107 = vmatpush3.msra.mxu0 %v87_v17  ;;  %2164 = vmatprep.subr.mxu1 %v2840_v0 }
  0x39   :  { %2108 = vmatprep.subr.mxu0 %v86_v19  ;;  %2165 = vmatpush3.msra.mxu1 %v2916_v20 }
  0x3a   :  { %2109 = vmatpush3.msra.mxu0 %v86_v19  ;;  %2166 = vmatprep.subr.mxu1 %v2840_v0 }
  0x3b   :  { %2110 = vmatprep.subr.mxu0 %v85_v21  ;;  %2167 = vmatpush3.msra.mxu1 %v2920_v22 }
  0x3c   :  { %2111 = vmatpush3.msra.mxu0 %v85_v21  ;;  %2168 = vmatprep.subr.mxu1 %v2840_v0 }
  0x3d   :  { %2112 = vmatprep.subr.mxu0 %v84_v23  ;;  %2169 = vmatpush3.msra.mxu1 %v2924_v24 }
  0x3e   :  { %2113 = vmatpush3.msra.mxu0 %v84_v23  ;;  %2170 = vmatprep.subr.mxu1 %v2840_v0 }
  0x3f   :  { %2114 = vmatprep.subr.mxu0 %v83_v25  ;;  %2171 = vmatpush3.msra.mxu1 %v2928_v26 }
  0x40   :  { %2115 = vmatpush3.msra.mxu0 %v83_v25  ;;  %2172 = vmatprep.subr.mxu1 %v2840_v0 }
  0x41   :  { %2116 = vmatprep.subr.mxu0 %v82_v27  ;;  %2173 = vmatpush3.msra.mxu1 %v2932_v28 }
  0x42   :  { %2117 = vmatpush3.msra.mxu0 %v82_v27  ;;  %2174 = vmatprep.subr.mxu1 %v2840_v0 }
  0x43   :  { %2118 = vmatprep.subr.mxu0 %v81_v29  ;;  %2122 = vmatprep.mubr.f32.mxu0 %v64_v30 }
  0x44   :  { %2119 = vmatpush3.msra.mxu0 %v81_v29  ;;  %2175 = vmatpush3.msra.mxu1 %v2937_v31 }
  0x45   :  { %2120 = vmatprep.subr.mxu0 %v80_v32  ;;  %2176 = vmatprep.subr.mxu1 %v2840_v0 }
  0x46   :  { %2121 = vmatpush3.msra.mxu0 %v80_v32  ;;  %2177 = vmatpush3.msra.mxu1 %v2940_v33 }
  0x47   :  { %2123 = vmatmul.mubr.f32.vlgmr.msra.gmra.mxu0 %v65_v34  ;;  %2179 = vmatmul.mubr.f32.vlgmr.msra.gmra.mxu1 %v2840_v0 }
  0x48   :  { %2181 = vmatprep.subr.mxu0 %v2840_v0  ;;  %2125 = vmatprep.mubr.f32.mxu0 %v66_v35 }
  0x49   :  { %2182 = vmatpush3.msra.mxu0 %v2882_v3  ;;  %2216 = vmatprep.subr.mxu1 %v2840_v0 }
  0x4a   :  { %2183 = vmatprep.subr.mxu0 %v2840_v0  ;;  %2217 = vmatpush3.msra.mxu1 %v2882_v3 }
  0x4b   :  { %2126 = vmatmul.mubr.f32.gmra.mxu0 %v67_v36  ;;  %2218 = vmatprep.subr.mxu1 %v2840_v0 }
  0x4c   :  { %2184 = vmatpush3.msra.mxu0 %v2885_v4  ;;  %2128 = vmatprep.mubr.f32.mxu0 %v68_v37 }
  0x4d   :  { %2185 = vmatprep.subr.mxu0 %v2840_v0  ;;  %2219 = vmatpush3.msra.mxu1 %v2885_v4 }
  0x4e   :  { %2186 = vmatpush3.msra.mxu0 %v2888_v6  ;;  %2220 = vmatprep.subr.mxu1 %v2840_v0 }
  0x4f   :  { %2187 = vmatprep.subr.mxu0 %v2840_v0  ;;  %2129 = vmatmul.mubr.f32.gmra.mxu0 %v69_v38 }
  0x50   :  { %2188 = vmatpush3.msra.mxu0 %v2892_v8  ;;  %2131 = vmatprep.mubr.f32.mxu0 %v70_v39 }
  0x51   :  { %2189 = vmatprep.subr.mxu0 %v2840_v0  ;;  %2221 = vmatpush3.msra.mxu1 %v2888_v6 }
  0x52   :  { %2190 = vmatpush3.msra.mxu0 %v2896_v10  ;;  %2222 = vmatprep.subr.mxu1 %v2840_v0 }
  0x53   :  { %2191 = vmatprep.subr.mxu0 %v2840_v0  ;;  %2132 = vmatmul.mubr.f32.gmra.mxu0 %v71_v40 }
  0x54   :  { %2192 = vmatpush3.msra.mxu0 %v2900_v12  ;;  %2223 = vmatpush3.msra.mxu1 %v2892_v8 }
  0x55   :  { %2193 = vmatprep.subr.mxu0 %v2840_v0  ;;  %2224 = vmatprep.subr.mxu1 %v2840_v0 }
  0x56   :  { %2194 = vmatpush3.msra.mxu0 %v2904_v14  ;;  %2225 = vmatpush3.msra.mxu1 %v2896_v10 }
  0x57   :  { %2195 = vmatprep.subr.mxu0 %v2840_v0  ;;  %2226 = vmatprep.subr.mxu1 %v2840_v0 }
  0x58   :  { %2196 = vmatpush3.msra.mxu0 %v2908_v16  ;;  %2227 = vmatpush3.msra.mxu1 %v2900_v12 }
  0x59   :  { %2197 = vmatprep.subr.mxu0 %v2840_v0  ;;  %2228 = vmatprep.subr.mxu1 %v2840_v0 }
  0x5a   :  { %2198 = vmatpush3.msra.mxu0 %v2912_v18  ;;  %2229 = vmatpush3.msra.mxu1 %v2904_v14 }
  0x5b   :  { %2199 = vmatprep.subr.mxu0 %v2840_v0  ;;  %2230 = vmatprep.subr.mxu1 %v2840_v0 }
  0x5c   :  { %2200 = vmatpush3.msra.mxu0 %v2916_v20  ;;  %2231 = vmatpush3.msra.mxu1 %v2908_v16 }
  0x5d   :  { %2201 = vmatprep.subr.mxu0 %v2840_v0  ;;  %2232 = vmatprep.subr.mxu1 %v2840_v0 }
  0x5e   :  { %2202 = vmatpush3.msra.mxu0 %v2920_v22  ;;  %2233 = vmatpush3.msra.mxu1 %v2912_v18 }
  0x5f   :  { %2203 = vmatprep.subr.mxu0 %v2840_v0  ;;  %2234 = vmatprep.subr.mxu1 %v2840_v0 }
  0x60   :  { %2204 = vmatpush3.msra.mxu0 %v2924_v24  ;;  %2235 = vmatpush3.msra.mxu1 %v2916_v20 }
  0x61   :  { %2205 = vmatprep.subr.mxu0 %v2840_v0  ;;  %2236 = vmatprep.subr.mxu1 %v2840_v0 }
  0x62   :  { %2206 = vmatpush3.msra.mxu0 %v2928_v26  ;;  %2237 = vmatpush3.msra.mxu1 %v2920_v22 }
  0x63   :  { %2207 = vmatprep.subr.mxu0 %v2840_v0  ;;  %2238 = vmatprep.subr.mxu1 %v2840_v0 }
  0x64   :  { %2208 = vmatpush3.msra.mxu0 %v2932_v28  ;;  %2239 = vmatpush3.msra.mxu1 %v2924_v24 }
  0x65   :  { %2209 = vmatprep.subr.mxu0 %v2840_v0  ;;  %2240 = vmatprep.subr.mxu1 %v2840_v0 }
  0x66   :  { %2210 = vmatpush3.msra.mxu0 %v2937_v31  ;;  %2241 = vmatpush3.msra.mxu1 %v2928_v26 }
  0x67   :  { %2211 = vmatprep.subr.mxu0 %v2840_v0  ;;  %2242 = vmatprep.subr.mxu1 %v2840_v0 }
  0x68   :  { %2212 = vmatpush3.msra.mxu0 %v2940_v33  ;;  %2243 = vmatpush3.msra.mxu1 %v2932_v28 }
  0x69   :  { %2244 = vmatprep.subr.mxu1 %v2840_v0  ;;  %2248 = vmatprep.mubr.msk.f32.mxu1 %vm2841_vm0, %v2840_v0 }
  0x6a   :  { %2245 = vmatpush3.msra.mxu1 %v2937_v31  ;;  %2251 = vmatprep.subr.mxu0 %v2840_v0 }
  0x6b   :  { %2246 = vmatprep.subr.mxu1 %v2840_v0  ;;  %2134 = vmatprep.mubr.f32.mxu0 %v72_v41 }
  0x6c   :  { %2247 = vmatpush3.msra.mxu1 %v2940_v33  ;;  %2135 = vmatmul.mubr.f32.gmra.mxu0 %v73_v42 }
  0x6d   :  { %2286 = vmatprep.subr.mxu1 %v2840_v0  ;;  %2137 = vmatprep.mubr.f32.mxu0 %v74_v43 }
  0x70   :  { %2138 = vmatmul.mubr.f32.gmra.mxu0 %v75_v44 }
  0x71   :  { %2140 = vmatprep.mubr.f32.mxu0 %v76_v45 }
  0x74   :  { %2141 = vmatmul.mubr.f32.gmra.mxu0 %v77_v46 }
  0x75   :  { %2143 = vmatprep.mubr.f32.mxu0 %v78_v47 }
  0x78   :  { %2144 = vmatmul.mubr.f32.gmra.mxu0 %v79_v48 }
  0x79   :  { %2213 = vmatprep.mubr.msk.f32.mxu0 %vm2841_vm0, %v2840_v0 }
 0x107   :  { %v2124_v49 = vpop.f32.mrf.mxu0  ;;  %v348_v50 = vpop.f32.mrf.mxu1 }
 0x108   :  { %v175_v17 = vadd.f32 %v2124_v49, %v3019_v51 }
 0x109   :  { %v169_v52 = vpop.f32.mrf.mxu0  ;;  %v2180_v53 = vpop.f32.mrf.mxu1 }
 0x10a   :  { %v170_v54 = vadd.f32 %v3019_v51, %v169_v52 }
 0x10b   :  { %v3056_v58 = vpop.f32.mrf.mxu0 }
 0x10c   :  { %v352_v55 = vadd.f32 %v348_v50, %v170_v54  ;;  %v185_v37 = vadd.f32 %v3056_v58, %v3019_v51  ;;  %v3291_v58 = vld [vmem:[#allocation9 + $0x28] sm:$0xff] }
 0x10d   :  { %v179_v59 = vpop.f32.mrf.mxu0 }
 0x10e   :  { %2716 = vtanh.f32 %v352_v55  ;;  %v180_v29 = vadd.f32 %v3019_v51, %v179_v59  ;;  %v3274_v55 = vld [vmem:[#allocation9 + $0x40] sm:$0xff] }
 0x10f   :  { %v3058_v60 = vpop.f32.mrf.mxu0  ;;  %v3297_v59 = vld [vmem:[#allocation9 + $0x20] sm:$0xff] }
 0x111   :  { %v3060_v61 = vpop.f32.mrf.mxu0 }
 0x112   :  { %v190_v43 = vadd.f32 %v3019_v51, %v3060_v61  ;;  %v3309_v61 = vld [vmem:[#allocation9 + $0x10] sm:$0xff] }
 0x113   :  { %v3062_v62 = vpop.f32.mrf.mxu0 }
 0x115   :  { %v3064_v63 = vpop.f32.mrf.mxu0 }
 0x11b   :  { %v2717_v56 = vpop.eup %2716 }
 0x11c   :  { %v355_v57 = vpack.c.bf16 %v2717_v56, %v2717_v56  ;;  %2214 = vmatmul.mubr.f32.vlgmr.msra.gmra.mxu0 %v2717_v56  ;;  %v3279_v56 = vld [vmem:[#allocation9 + $0x38] sm:$0xff] }
 0x11d   :  { %2252 = vmatpush3.msra.mxu0 %v2882_v3  ;;  %2283 = vmatprep.mubr.msk.f32.mxu0 %vm2841_vm0, %v2840_v0 }
 0x11e   :  { %356 = vst [vmem:[#allocation10] sm:$0xf] %v355_v57  ;;  %2253 = vmatprep.subr.mxu0 %v2840_v0  ;;  %v3285_v57 = vld [vmem:[#allocation9 + $0x30] sm:$0xff] }
 0x11f   :  { %2254 = vmatpush3.msra.mxu0 %v2885_v4 }
 0x120   :  { %2255 = vmatprep.subr.mxu0 %v2840_v0 }
 0x121   :  { %2256 = vmatpush3.msra.mxu0 %v2888_v6 }
 0x122   :  { %2257 = vmatprep.subr.mxu0 %v2840_v0 }
 0x123   :  { %2258 = vmatpush3.msra.mxu0 %v2892_v8 }
 0x124   :  { %2259 = vmatprep.subr.mxu0 %v2840_v0 }
 0x125   :  { %2260 = vmatpush3.msra.mxu0 %v2896_v10 }
 0x126   :  { %2261 = vmatprep.subr.mxu0 %v2840_v0 }
 0x127   :  { %2262 = vmatpush3.msra.mxu0 %v2900_v12 }
 0x128   :  { %2263 = vmatprep.subr.mxu0 %v2840_v0 }
 0x129   :  { %2264 = vmatpush3.msra.mxu0 %v2904_v14 }
 0x12a   :  { %2265 = vmatprep.subr.mxu0 %v2840_v0 }
 0x12b   :  { %2266 = vmatpush3.msra.mxu0 %v2908_v16 }
 0x12c   :  { %2267 = vmatprep.subr.mxu0 %v2840_v0  ;;  %v3066_v1 = vpop.f32.mrf.mxu0 }
 0x12d   :  { %2268 = vmatpush3.msra.mxu0 %v2912_v18 }
 0x12e   :  { %2269 = vmatprep.subr.mxu0 %v2840_v0  ;;  %v3068_v2 = vpop.f32.mrf.mxu0 }
 0x12f   :  { %2270 = vmatpush3.msra.mxu0 %v2916_v20 }
 0x130   :  { %2271 = vmatprep.subr.mxu0 %v2840_v0  ;;  %v3070_v5 = vpop.f32.mrf.mxu0 }
 0x131   :  { %2272 = vmatpush3.msra.mxu0 %v2920_v22 }
 0x132   :  { %2273 = vmatprep.subr.mxu0 %v2840_v0  ;;  %v3072_v7 = vpop.f32.mrf.mxu0 }
 0x133   :  { %2274 = vmatpush3.msra.mxu0 %v2924_v24 }
 0x134   :  { %2275 = vmatprep.subr.mxu0 %v2840_v0  ;;  %v3074_v9 = vpop.f32.mrf.mxu0 }
 0x135   :  { %2276 = vmatpush3.msra.mxu0 %v2928_v26 }
 0x136   :  { %2277 = vmatprep.subr.mxu0 %v2840_v0  ;;  %v3076_v11 = vpop.f32.mrf.mxu0 }
 0x137   :  { %2278 = vmatpush3.msra.mxu0 %v2932_v28 }
 0x138   :  { %2279 = vmatprep.subr.mxu0 %v2840_v0  ;;  %v3078_v13 = vpop.f32.mrf.mxu0 }
 0x139   :  { %2280 = vmatpush3.msra.mxu0 %v2937_v31 }
 0x13a   :  { %2281 = vmatprep.subr.mxu0 %v2840_v0  ;;  %v3080_v15 = vpop.f32.mrf.mxu0 }
 0x13b   :  { %2282 = vmatpush3.msra.mxu0 %v2940_v33 }
 0x13c   :  { %2321 = vmatprep.subr.mxu0 %v2840_v0 }
 0x1dc   :  { %v441_v19 = vpop.f32.mrf.mxu0 }
 0x1dd   :  { %v445_v21 = vadd.f32 %v441_v19, %v175_v17 }
 0x1de   :  { %v2215_v23 = vpop.f32.mrf.mxu0 }
 0x1df   :  { %2718 = vtanh.f32 %v445_v21 }
 0x1ec   :  { %v2719_v25 = vpop.eup %2718 }
 0x1ed   :  { %v448_v27 = vpack.c.bf16 %v2719_v25, %v2719_v25  ;;  %2249 = vmatmul.mubr.f32.vlgmr.msra.gmra.mxu1 %v2719_v25 }
 0x1ee   :  { %2287 = vmatpush3.msra.mxu1 %v2882_v3  ;;  %2318 = vmatprep.mubr.msk.f32.mxu1 %vm2841_vm0, %v2840_v0 }
 0x1ef   :  { %450 = vst [vmem:[#allocation10 + $0x4] sm:$0xf] %v448_v27  ;;  %2288 = vmatprep.subr.mxu1 %v2840_v0 }
 0x1f0   :  { %2289 = vmatpush3.msra.mxu1 %v2885_v4 }
 0x1f1   :  { %2290 = vmatprep.subr.mxu1 %v2840_v0 }
 0x1f2   :  { %2291 = vmatpush3.msra.mxu1 %v2888_v6 }
 0x1f3   :  { %2292 = vmatprep.subr.mxu1 %v2840_v0 }
 0x1f4   :  { %2293 = vmatpush3.msra.mxu1 %v2892_v8 }
 0x1f5   :  { %2294 = vmatprep.subr.mxu1 %v2840_v0 }
 0x1f6   :  { %2295 = vmatpush3.msra.mxu1 %v2896_v10 }
 0x1f7   :  { %2296 = vmatprep.subr.mxu1 %v2840_v0 }
 0x1f8   :  { %2297 = vmatpush3.msra.mxu1 %v2900_v12 }
 0x1f9   :  { %2298 = vmatprep.subr.mxu1 %v2840_v0 }
 0x1fa   :  { %2299 = vmatpush3.msra.mxu1 %v2904_v14 }
 0x1fb   :  { %2300 = vmatprep.subr.mxu1 %v2840_v0 }
 0x1fc   :  { %2301 = vmatpush3.msra.mxu1 %v2908_v16 }
 0x1fd   :  { %2302 = vmatprep.subr.mxu1 %v2840_v0 }
 0x1fe   :  { %2303 = vmatpush3.msra.mxu1 %v2912_v18 }
 0x1ff   :  { %2304 = vmatprep.subr.mxu1 %v2840_v0 }
 0x200   :  { %2305 = vmatpush3.msra.mxu1 %v2916_v20 }
 0x201   :  { %2306 = vmatprep.subr.mxu1 %v2840_v0 }
 0x202   :  { %2307 = vmatpush3.msra.mxu1 %v2920_v22 }
 0x203   :  { %2308 = vmatprep.subr.mxu1 %v2840_v0 }
 0x204   :  { %2309 = vmatpush3.msra.mxu1 %v2924_v24 }
 0x205   :  { %2310 = vmatprep.subr.mxu1 %v2840_v0 }
 0x206   :  { %2311 = vmatpush3.msra.mxu1 %v2928_v26 }
 0x207   :  { %2312 = vmatprep.subr.mxu1 %v2840_v0 }
 0x208   :  { %2313 = vmatpush3.msra.mxu1 %v2932_v28 }
 0x209   :  { %2314 = vmatprep.subr.mxu1 %v2840_v0 }
 0x20a   :  { %2315 = vmatpush3.msra.mxu1 %v2937_v31 }
 0x20b   :  { %2316 = vmatprep.subr.mxu1 %v2840_v0 }
 0x20c   :  { %2317 = vmatpush3.msra.mxu1 %v2940_v33 }
 0x20d   :  { %2356 = vmatprep.subr.mxu1 %v2840_v0 }
 0x2ad   :  { %v535_v30 = vpop.f32.mrf.mxu1 }
 0x2ae   :  { %v539_v32 = vadd.f32 %v535_v30, %v180_v29 }
 0x2af   :  { %v2250_v34 = vpop.f32.mrf.mxu1 }
 0x2b0   :  { %2720 = vtanh.f32 %v539_v32 }
 0x2bd   :  { %v2721_v35 = vpop.eup %2720 }
 0x2be   :  { %v542_v36 = vpack.c.bf16 %v2721_v35, %v2721_v35  ;;  %2284 = vmatmul.mubr.f32.vlgmr.msra.gmra.mxu0 %v2721_v35 }
 0x2bf   :  { %2322 = vmatpush3.msra.mxu0 %v2882_v3  ;;  %2353 = vmatprep.mubr.msk.f32.mxu0 %vm2841_vm0, %v2840_v0 }
 0x2c0   :  { %544 = vst [vmem:[#allocation10 + $0x8] sm:$0xf] %v542_v36  ;;  %2323 = vmatprep.subr.mxu0 %v2840_v0 }
 0x2c1   :  { %2324 = vmatpush3.msra.mxu0 %v2885_v4 }
 0x2c2   :  { %2325 = vmatprep.subr.mxu0 %v2840_v0 }
 0x2c3   :  { %2326 = vmatpush3.msra.mxu0 %v2888_v6 }
 0x2c4   :  { %2327 = vmatprep.subr.mxu0 %v2840_v0 }
 0x2c5   :  { %2328 = vmatpush3.msra.mxu0 %v2892_v8 }
 0x2c6   :  { %2329 = vmatprep.subr.mxu0 %v2840_v0 }
 0x2c7   :  { %2330 = vmatpush3.msra.mxu0 %v2896_v10 }
 0x2c8   :  { %2331 = vmatprep.subr.mxu0 %v2840_v0 }
 0x2c9   :  { %2332 = vmatpush3.msra.mxu0 %v2900_v12 }
 0x2ca   :  { %2333 = vmatprep.subr.mxu0 %v2840_v0 }
 0x2cb   :  { %2334 = vmatpush3.msra.mxu0 %v2904_v14 }
 0x2cc   :  { %2335 = vmatprep.subr.mxu0 %v2840_v0 }
 0x2cd   :  { %2336 = vmatpush3.msra.mxu0 %v2908_v16 }
 0x2ce   :  { %2337 = vmatprep.subr.mxu0 %v2840_v0 }
 0x2cf   :  { %2338 = vmatpush3.msra.mxu0 %v2912_v18 }
 0x2d0   :  { %2339 = vmatprep.subr.mxu0 %v2840_v0 }
 0x2d1   :  { %2340 = vmatpush3.msra.mxu0 %v2916_v20 }
 0x2d2   :  { %2341 = vmatprep.subr.mxu0 %v2840_v0 }
 0x2d3   :  { %2342 = vmatpush3.msra.mxu0 %v2920_v22 }
 0x2d4   :  { %2343 = vmatprep.subr.mxu0 %v2840_v0 }
 0x2d5   :  { %2344 = vmatpush3.msra.mxu0 %v2924_v24 }
 0x2d6   :  { %2345 = vmatprep.subr.mxu0 %v2840_v0 }
 0x2d7   :  { %2346 = vmatpush3.msra.mxu0 %v2928_v26 }
 0x2d8   :  { %2347 = vmatprep.subr.mxu0 %v2840_v0 }
 0x2d9   :  { %2348 = vmatpush3.msra.mxu0 %v2932_v28 }
 0x2da   :  { %2349 = vmatprep.subr.mxu0 %v2840_v0 }
 0x2db   :  { %2350 = vmatpush3.msra.mxu0 %v2937_v31 }
 0x2dc   :  { %2351 = vmatprep.subr.mxu0 %v2840_v0 }
 0x2dd   :  { %2352 = vmatpush3.msra.mxu0 %v2940_v33 }
 0x2de   :  { %2391 = vmatprep.subr.mxu0 %v2840_v0 }
 0x37e   :  { %v629_v38 = vpop.f32.mrf.mxu0 }
 0x37f   :  { %v633_v39 = vadd.f32 %v629_v38, %v185_v37 }
 0x380   :  { %v2285_v40 = vpop.f32.mrf.mxu0 }
 0x381   :  { %2722 = vtanh.f32 %v633_v39 }
 0x38e   :  { %v2723_v41 = vpop.eup %2722 }
 0x38f   :  { %v636_v42 = vpack.c.bf16 %v2723_v41, %v2723_v41  ;;  %2319 = vmatmul.mubr.f32.vlgmr.msra.gmra.mxu1 %v2723_v41 }
 0x390   :  { %2357 = vmatpush3.msra.mxu1 %v2882_v3  ;;  %2388 = vmatprep.mubr.msk.f32.mxu1 %vm2841_vm0, %v2840_v0 }
 0x391   :  { %638 = vst [vmem:[#allocation10 + $0xc] sm:$0xf] %v636_v42  ;;  %2358 = vmatprep.subr.mxu1 %v2840_v0 }
 0x392   :  { %2359 = vmatpush3.msra.mxu1 %v2885_v4 }
 0x393   :  { %2360 = vmatprep.subr.mxu1 %v2840_v0 }
 0x394   :  { %2361 = vmatpush3.msra.mxu1 %v2888_v6 }
 0x395   :  { %2362 = vmatprep.subr.mxu1 %v2840_v0 }
 0x396   :  { %2363 = vmatpush3.msra.mxu1 %v2892_v8 }
 0x397   :  { %2364 = vmatprep.subr.mxu1 %v2840_v0 }
 0x398   :  { %2365 = vmatpush3.msra.mxu1 %v2896_v10 }
 0x399   :  { %2366 = vmatprep.subr.mxu1 %v2840_v0 }
 0x39a   :  { %2367 = vmatpush3.msra.mxu1 %v2900_v12 }
 0x39b   :  { %2368 = vmatprep.subr.mxu1 %v2840_v0 }
 0x39c   :  { %2369 = vmatpush3.msra.mxu1 %v2904_v14 }
 0x39d   :  { %2370 = vmatprep.subr.mxu1 %v2840_v0 }
 0x39e   :  { %2371 = vmatpush3.msra.mxu1 %v2908_v16 }
 0x39f   :  { %2372 = vmatprep.subr.mxu1 %v2840_v0 }
 0x3a0   :  { %2373 = vmatpush3.msra.mxu1 %v2912_v18 }
 0x3a1   :  { %2374 = vmatprep.subr.mxu1 %v2840_v0 }
 0x3a2   :  { %2375 = vmatpush3.msra.mxu1 %v2916_v20 }
 0x3a3   :  { %2376 = vmatprep.subr.mxu1 %v2840_v0 }
 0x3a4   :  { %2377 = vmatpush3.msra.mxu1 %v2920_v22 }
 0x3a5   :  { %2378 = vmatprep.subr.mxu1 %v2840_v0 }
 0x3a6   :  { %2379 = vmatpush3.msra.mxu1 %v2924_v24 }
 0x3a7   :  { %2380 = vmatprep.subr.mxu1 %v2840_v0 }
 0x3a8   :  { %2381 = vmatpush3.msra.mxu1 %v2928_v26 }
 0x3a9   :  { %2382 = vmatprep.subr.mxu1 %v2840_v0 }
 0x3aa   :  { %2383 = vmatpush3.msra.mxu1 %v2932_v28 }
 0x3ab   :  { %2384 = vmatprep.subr.mxu1 %v2840_v0 }
 0x3ac   :  { %2385 = vmatpush3.msra.mxu1 %v2937_v31 }
 0x3ad   :  { %2386 = vmatprep.subr.mxu1 %v2840_v0 }
 0x3ae   :  { %2387 = vmatpush3.msra.mxu1 %v2940_v33 }
 0x3af   :  { %2426 = vmatprep.subr.mxu1 %v2840_v0 }
 0x44f   :  { %v723_v44 = vpop.f32.mrf.mxu1 }
 0x450   :  { %v727_v45 = vadd.f32 %v723_v44, %v190_v43 }
 0x451   :  { %v2320_v46 = vpop.f32.mrf.mxu1 }
 0x452   :  { %2724 = vtanh.f32 %v727_v45 }
 0x45f   :  { %v2725_v47 = vpop.eup %2724 }
 0x460   :  { %v730_v48 = vpack.c.bf16 %v2725_v47, %v2725_v47  ;;  %2354 = vmatmul.mubr.f32.vlgmr.msra.gmra.mxu0 %v2725_v47 }
 0x461   :  { %2392 = vmatpush3.msra.mxu0 %v2882_v3  ;;  %2423 = vmatprep.mubr.msk.f32.mxu0 %vm2841_vm0, %v2840_v0  ;;  %v195_v3 = vadd.f32 %v3058_v60, %v3019_v51  ;;  %v3303_v60 = vld [vmem:[#allocation9 + $0x18] sm:$0xff] }
 0x462   :  { %732 = vst [vmem:[#allocation10 + $0x10] sm:$0xf] %v730_v48  ;;  %2393 = vmatprep.subr.mxu0 %v2840_v0 }
 0x463   :  { %2394 = vmatpush3.msra.mxu0 %v2885_v4 }
 0x464   :  { %2395 = vmatprep.subr.mxu0 %v2840_v0 }
 0x465   :  { %2396 = vmatpush3.msra.mxu0 %v2888_v6 }
 0x466   :  { %2397 = vmatprep.subr.mxu0 %v2840_v0 }
 0x467   :  { %2398 = vmatpush3.msra.mxu0 %v2892_v8 }
 0x468   :  { %2399 = vmatprep.subr.mxu0 %v2840_v0 }
 0x469   :  { %2400 = vmatpush3.msra.mxu0 %v2896_v10 }
 0x46a   :  { %2401 = vmatprep.subr.mxu0 %v2840_v0 }
 0x46b   :  { %2402 = vmatpush3.msra.mxu0 %v2900_v12 }
 0x46c   :  { %2403 = vmatprep.subr.mxu0 %v2840_v0 }
 0x46d   :  { %2404 = vmatpush3.msra.mxu0 %v2904_v14  ;;  %v3228_v14 = vld [vmem:[#allocation9 + $0x78] sm:$0xff] }
 0x46e   :  { %2405 = vmatprep.subr.mxu0 %v2840_v0 }
 0x46f   :  { %2406 = vmatpush3.msra.mxu0 %v2908_v16  ;;  %v3230_v16 = vld [vmem:[#allocation9 + $0x70] sm:$0xff] }
 0x470   :  { %2407 = vmatprep.subr.mxu0 %v2840_v0 }
 0x471   :  { %2408 = vmatpush3.msra.mxu0 %v2912_v18  ;;  %v3234_v18 = vld [vmem:[#allocation9 + $0x68] sm:$0xff] }
 0x472   :  { %2409 = vmatprep.subr.mxu0 %v2840_v0 }
 0x473   :  { %2410 = vmatpush3.msra.mxu0 %v2916_v20  ;;  %v3238_v20 = vld [vmem:[#allocation9 + $0x60] sm:$0xff] }
 0x474   :  { %2411 = vmatprep.subr.mxu0 %v2840_v0 }
 0x475   :  { %2412 = vmatpush3.msra.mxu0 %v2920_v22  ;;  %v3242_v22 = vld [vmem:[#allocation9 + $0x58] sm:$0xff] }
 0x476   :  { %2413 = vmatprep.subr.mxu0 %v2840_v0 }
 0x477   :  { %2414 = vmatpush3.msra.mxu0 %v2924_v24  ;;  %v3246_v24 = vld [vmem:[#allocation9 + $0x50] sm:$0xff] }
 0x478   :  { %2415 = vmatprep.subr.mxu0 %v2840_v0 }
 0x479   :  { %2416 = vmatpush3.msra.mxu0 %v2928_v26  ;;  %v3250_v26 = vld [vmem:[#allocation9 + $0x48] sm:$0xff] }
 0x47a   :  { %2417 = vmatprep.subr.mxu0 %v2840_v0 }
 0x47b   :  { %2418 = vmatpush3.msra.mxu0 %v2932_v28  ;;  %v200_v28 = vadd.f32 %v3019_v51, %v3064_v63  ;;  %v205_v63 = vadd.f32 %v3062_v62, %v3019_v51  ;;  %v210_v62 = vadd.f32 %v3019_v51, %v3068_v2  ;;  %v215_v2 = vadd.f32 %v3066_v1, %v3019_v51 }
 0x47c   :  { %2419 = vmatprep.subr.mxu0 %v2840_v0  ;;  %v220_v1 = vadd.f32 %v3019_v51, %v3072_v7  ;;  %v225_v7 = vadd.f32 %v3070_v5, %v3019_v51  ;;  %v2748_v51 = vld [vmem:[%s3553_s3] ss:$0 sm:$0xff]  ;;  %s2842_s3 = smov [#allocation10]  }
 0x47d   :  { %2420 = vmatpush3.msra.mxu0 %v2937_v31  ;;  %v230_v5 = vadd.f32 %v2748_v51, %v3076_v11  ;;  %v235_v11 = vadd.f32 %v2748_v51, %v3074_v9  ;;  %v245_v9 = vadd.f32 %v2748_v51, %v3078_v13  ;;  %s1772_s7 = sshll.u32 %s2842_s3, 4  ;;  %s1773_s7 = int_to_ptr.vmem [resolvable:$true] %s1772_s7 }
 0x47e   :  { %2421 = vmatprep.subr.mxu0 %v2840_v0  ;;  %s2809_s8 = scalar_lea.vmem %s1773_s7, 1024  ;;  %p2814_p2 = scmp.lt.s32.totalorder %s1773_s7, %s1773_s7 }
 0x47f   :  { %2422 = vmatpush3.msra.mxu0 %v2940_v33  ;;  %p2810_p1 = scmp.ne.s32.totalorder %s1773_s7, %s2809_s8  ;;  %p2815_p3 = scmp.lt.s32.totalorder %s2809_s8, %s2809_s8 }
 0x480   :  { %2461 = vmatprep.subr.mxu0 %v2840_v0 }
 0x481   :  { %p2816_p4 = por %p2815_p3, %p2814_p2 }
 0x483   :  { %p2817_p5 = pnand %p2816_p4, %p2810_p1 }
 0x520   :  { %v817_v4 = vpop.f32.mrf.mxu0 }
 0x521   :  { %v821_v6 = vadd.f32 %v817_v4, %v195_v3 }
 0x522   :  { %v2355_v8 = vpop.f32.mrf.mxu0 }
 0x523   :  { %2726 = vtanh.f32 %v821_v6 }
 0x530   :  { %v2727_v10 = vpop.eup %2726 }
 0x531   :  { %v824_v12 = vpack.c.bf16 %v2727_v10, %v2727_v10  ;;  %2389 = vmatmul.mubr.f32.vlgmr.msra.gmra.mxu1 %v2727_v10 }
 0x532   :  { %2458 = vmatprep.mubr.msk.f32.mxu1 %vm2841_vm0, %v2840_v0  ;;  %2427 = vmatpush3.msra.mxu1 %v3228_v14 }
 0x533   :  { %826 = vst [vmem:[#allocation10 + $0x14] sm:$0xf] %v824_v12  ;;  %2428 = vmatprep.subr.mxu1 %v2840_v0 }
 0x534   :  { %2429 = vmatpush3.msra.mxu1 %v3230_v16 }
 0x535   :  { %2430 = vmatprep.subr.mxu1 %v2840_v0 }
 0x536   :  { %2431 = vmatpush3.msra.mxu1 %v3234_v18 }
 0x537   :  { %2432 = vmatprep.subr.mxu1 %v2840_v0 }
 0x538   :  { %2433 = vmatpush3.msra.mxu1 %v3238_v20 }
 0x539   :  { %2434 = vmatprep.subr.mxu1 %v2840_v0 }
 0x53a   :  { %2435 = vmatpush3.msra.mxu1 %v3242_v22 }
 0x53b   :  { %2436 = vmatprep.subr.mxu1 %v2840_v0 }
 0x53c   :  { %2437 = vmatpush3.msra.mxu1 %v3246_v24 }
 0x53d   :  { %2438 = vmatprep.subr.mxu1 %v2840_v0 }
 0x53e   :  { %2439 = vmatpush3.msra.mxu1 %v3250_v26 }
 0x53f   :  { %2440 = vmatprep.subr.mxu1 %v2840_v0 }
 0x540   :  { %2441 = vmatpush3.msra.mxu1 %v3274_v55 }
 0x541   :  { %2442 = vmatprep.subr.mxu1 %v2840_v0 }
 0x542   :  { %2443 = vmatpush3.msra.mxu1 %v3279_v56 }
 0x543   :  { %2444 = vmatprep.subr.mxu1 %v2840_v0 }
 0x544   :  { %2445 = vmatpush3.msra.mxu1 %v3285_v57 }
 0x545   :  { %2446 = vmatprep.subr.mxu1 %v2840_v0 }
 0x546   :  { %2447 = vmatpush3.msra.mxu1 %v3291_v58 }
 0x547   :  { %2448 = vmatprep.subr.mxu1 %v2840_v0 }
 0x548   :  { %2449 = vmatpush3.msra.mxu1 %v3297_v59 }
 0x549   :  { %2450 = vmatprep.subr.mxu1 %v2840_v0 }
 0x54a   :  { %2451 = vmatpush3.msra.mxu1 %v3303_v60 }
 0x54b   :  { %2452 = vmatprep.subr.mxu1 %v2840_v0 }
 0x54c   :  { %2453 = vmatpush3.msra.mxu1 %v3309_v61 }
 0x54d   :  { %2454 = vmatprep.subr.mxu1 %v2840_v0 }
 0x54e   :  { %2455 = vmatpush3.msra.mxu1 %v2937_v31  ;;  %v3352_v31 = vld [vmem:[#allocation9 + $0x8] sm:$0xff] }
 0x54f   :  { %2456 = vmatprep.subr.mxu1 %v2840_v0 }
 0x550   :  { %2457 = vmatpush3.msra.mxu1 %v2940_v33  ;;  %v3357_v33 = vld [vmem:[#allocation9] sm:$0xff] }
 0x551   :  { %2496 = vmatprep.subr.mxu1 %v2840_v0 }
 0x5f1   :  { %v911_v49 = vpop.f32.mrf.mxu1 }
 0x5f2   :  { %v915_v50 = vadd.f32 %v911_v49, %v200_v28 }
 0x5f3   :  { %v2390_v52 = vpop.f32.mrf.mxu1 }
 0x5f4   :  { %2728 = vtanh.f32 %v915_v50 }
 0x601   :  { %v2729_v53 = vpop.eup %2728 }
 0x602   :  { %v918_v54 = vpack.c.bf16 %v2729_v53, %v2729_v53  ;;  %2424 = vmatmul.mubr.f32.vlgmr.msra.gmra.mxu0 %v2729_v53 }
 0x603   :  { %2462 = vmatpush3.msra.mxu0 %v3228_v14  ;;  %2493 = vmatprep.mubr.msk.f32.mxu0 %vm2841_vm0, %v2840_v0 }
 0x604   :  { %920 = vst [vmem:[#allocation10 + $0x18] sm:$0xf] %v918_v54  ;;  %2463 = vmatprep.subr.mxu0 %v2840_v0 }
 0x605   :  { %2464 = vmatpush3.msra.mxu0 %v3230_v16 }
 0x606   :  { %2465 = vmatprep.subr.mxu0 %v2840_v0 }
 0x607   :  { %2466 = vmatpush3.msra.mxu0 %v3234_v18 }
 0x608   :  { %2467 = vmatprep.subr.mxu0 %v2840_v0 }
 0x609   :  { %2468 = vmatpush3.msra.mxu0 %v3238_v20 }
 0x60a   :  { %2469 = vmatprep.subr.mxu0 %v2840_v0 }
 0x60b   :  { %2470 = vmatpush3.msra.mxu0 %v3242_v22 }
 0x60c   :  { %2471 = vmatprep.subr.mxu0 %v2840_v0 }
 0x60d   :  { %2472 = vmatpush3.msra.mxu0 %v3246_v24 }
 0x60e   :  { %2473 = vmatprep.subr.mxu0 %v2840_v0 }
 0x60f   :  { %2474 = vmatpush3.msra.mxu0 %v3250_v26 }
 0x610   :  { %2475 = vmatprep.subr.mxu0 %v2840_v0 }
 0x611   :  { %2476 = vmatpush3.msra.mxu0 %v3274_v55 }
 0x612   :  { %2477 = vmatprep.subr.mxu0 %v2840_v0 }
 0x613   :  { %2478 = vmatpush3.msra.mxu0 %v3279_v56 }
 0x614   :  { %2479 = vmatprep.subr.mxu0 %v2840_v0 }
 0x615   :  { %2480 = vmatpush3.msra.mxu0 %v3285_v57 }
 0x616   :  { %2481 = vmatprep.subr.mxu0 %v2840_v0 }
 0x617   :  { %2482 = vmatpush3.msra.mxu0 %v3291_v58 }
 0x618   :  { %2483 = vmatprep.subr.mxu0 %v2840_v0 }
 0x619   :  { %2484 = vmatpush3.msra.mxu0 %v3297_v59 }
 0x61a   :  { %2485 = vmatprep.subr.mxu0 %v2840_v0 }
 0x61b   :  { %2486 = vmatpush3.msra.mxu0 %v3303_v60 }
 0x61c   :  { %2487 = vmatprep.subr.mxu0 %v2840_v0 }
 0x61d   :  { %2488 = vmatpush3.msra.mxu0 %v3309_v61 }
 0x61e   :  { %2489 = vmatprep.subr.mxu0 %v2840_v0 }
 0x61f   :  { %2490 = vmatpush3.msra.mxu0 %v3352_v31 }
 0x620   :  { %2491 = vmatprep.subr.mxu0 %v2840_v0 }
 0x621   :  { %2492 = vmatpush3.msra.mxu0 %v3357_v33 }
 0x622   :  { %2531 = vmatprep.subr.mxu0 %v2840_v0 }
 0x6c2   :  { %v1005_v17 = vpop.f32.mrf.mxu0 }
 0x6c3   :  { %v1009_v19 = vadd.f32 %v1005_v17, %v205_v63 }
 0x6c4   :  { %v2425_v21 = vpop.f32.mrf.mxu0 }
 0x6c5   :  { %2730 = vtanh.f32 %v1009_v19 }
 0x6d2   :  { %v2731_v23 = vpop.eup %2730 }
 0x6d3   :  { %v1012_v25 = vpack.c.bf16 %v2731_v23, %v2731_v23  ;;  %2459 = vmatmul.mubr.f32.vlgmr.msra.gmra.mxu1 %v2731_v23 }
 0x6d4   :  { %2497 = vmatpush3.msra.mxu1 %v3228_v14  ;;  %2528 = vmatprep.mubr.msk.f32.mxu1 %vm2841_vm0, %v2840_v0 }
 0x6d5   :  { %1014 = vst [vmem:[#allocation10 + $0x1c] sm:$0xf] %v1012_v25  ;;  %2498 = vmatprep.subr.mxu1 %v2840_v0 }
 0x6d6   :  { %2499 = vmatpush3.msra.mxu1 %v3230_v16 }
 0x6d7   :  { %2500 = vmatprep.subr.mxu1 %v2840_v0 }
 0x6d8   :  { %2501 = vmatpush3.msra.mxu1 %v3234_v18 }
 0x6d9   :  { %2502 = vmatprep.subr.mxu1 %v2840_v0 }
 0x6da   :  { %2503 = vmatpush3.msra.mxu1 %v3238_v20 }
 0x6db   :  { %2504 = vmatprep.subr.mxu1 %v2840_v0 }
 0x6dc   :  { %2505 = vmatpush3.msra.mxu1 %v3242_v22 }
 0x6dd   :  { %2506 = vmatprep.subr.mxu1 %v2840_v0 }
 0x6de   :  { %2507 = vmatpush3.msra.mxu1 %v3246_v24 }
 0x6df   :  { %2508 = vmatprep.subr.mxu1 %v2840_v0 }
 0x6e0   :  { %2509 = vmatpush3.msra.mxu1 %v3250_v26 }
 0x6e1   :  { %2510 = vmatprep.subr.mxu1 %v2840_v0 }
 0x6e2   :  { %2511 = vmatpush3.msra.mxu1 %v3274_v55 }
 0x6e3   :  { %2512 = vmatprep.subr.mxu1 %v2840_v0 }
 0x6e4   :  { %2513 = vmatpush3.msra.mxu1 %v3279_v56 }
 0x6e5   :  { %2514 = vmatprep.subr.mxu1 %v2840_v0 }
 0x6e6   :  { %2515 = vmatpush3.msra.mxu1 %v3285_v57 }
 0x6e7   :  { %2516 = vmatprep.subr.mxu1 %v2840_v0 }
 0x6e8   :  { %2517 = vmatpush3.msra.mxu1 %v3291_v58 }
 0x6e9   :  { %2518 = vmatprep.subr.mxu1 %v2840_v0 }
 0x6ea   :  { %2519 = vmatpush3.msra.mxu1 %v3297_v59 }
 0x6eb   :  { %2520 = vmatprep.subr.mxu1 %v2840_v0 }
 0x6ec   :  { %2521 = vmatpush3.msra.mxu1 %v3303_v60 }
 0x6ed   :  { %2522 = vmatprep.subr.mxu1 %v2840_v0 }
 0x6ee   :  { %2523 = vmatpush3.msra.mxu1 %v3309_v61 }
 0x6ef   :  { %2524 = vmatprep.subr.mxu1 %v2840_v0 }
 0x6f0   :  { %2525 = vmatpush3.msra.mxu1 %v3352_v31 }
 0x6f1   :  { %2526 = vmatprep.subr.mxu1 %v2840_v0 }
 0x6f2   :  { %2527 = vmatpush3.msra.mxu1 %v3357_v33 }
 0x6f3   :  { %2566 = vmatprep.subr.mxu1 %v2840_v0 }
 0x793   :  { %v1099_v27 = vpop.f32.mrf.mxu1 }
 0x794   :  { %v1103_v29 = vadd.f32 %v1099_v27, %v210_v62 }
 0x795   :  { %v2460_v30 = vpop.f32.mrf.mxu1 }
 0x796   :  { %2732 = vtanh.f32 %v1103_v29 }
 0x7a3   :  { %v2733_v32 = vpop.eup %2732 }
 0x7a4   :  { %v1106_v34 = vpack.c.bf16 %v2733_v32, %v2733_v32  ;;  %2494 = vmatmul.mubr.f32.vlgmr.msra.gmra.mxu0 %v2733_v32 }
 0x7a5   :  { %2532 = vmatpush3.msra.mxu0 %v3228_v14  ;;  %2563 = vmatprep.mubr.msk.f32.mxu0 %vm2841_vm0, %v2840_v0 }
 0x7a6   :  { %1108 = vst [vmem:[#allocation10 + $0x20] sm:$0xf] %v1106_v34  ;;  %2533 = vmatprep.subr.mxu0 %v2840_v0 }
 0x7a7   :  { %2534 = vmatpush3.msra.mxu0 %v3230_v16 }
 0x7a8   :  { %2535 = vmatprep.subr.mxu0 %v2840_v0 }
 0x7a9   :  { %2536 = vmatpush3.msra.mxu0 %v3234_v18 }
 0x7aa   :  { %2537 = vmatprep.subr.mxu0 %v2840_v0 }
 0x7ab   :  { %2538 = vmatpush3.msra.mxu0 %v3238_v20 }
 0x7ac   :  { %2539 = vmatprep.subr.mxu0 %v2840_v0 }
 0x7ad   :  { %2540 = vmatpush3.msra.mxu0 %v3242_v22 }
 0x7ae   :  { %2541 = vmatprep.subr.mxu0 %v2840_v0 }
 0x7af   :  { %2542 = vmatpush3.msra.mxu0 %v3246_v24 }
 0x7b0   :  { %2543 = vmatprep.subr.mxu0 %v2840_v0 }
 0x7b1   :  { %2544 = vmatpush3.msra.mxu0 %v3250_v26 }
 0x7b2   :  { %2545 = vmatprep.subr.mxu0 %v2840_v0 }
 0x7b3   :  { %2546 = vmatpush3.msra.mxu0 %v3274_v55 }
 0x7b4   :  { %2547 = vmatprep.subr.mxu0 %v2840_v0 }
 0x7b5   :  { %2548 = vmatpush3.msra.mxu0 %v3279_v56 }
 0x7b6   :  { %2549 = vmatprep.subr.mxu0 %v2840_v0 }
 0x7b7   :  { %2550 = vmatpush3.msra.mxu0 %v3285_v57 }
 0x7b8   :  { %2551 = vmatprep.subr.mxu0 %v2840_v0 }
 0x7b9   :  { %2552 = vmatpush3.msra.mxu0 %v3291_v58 }
 0x7ba   :  { %2553 = vmatprep.subr.mxu0 %v2840_v0 }
 0x7bb   :  { %2554 = vmatpush3.msra.mxu0 %v3297_v59 }
 0x7bc   :  { %2555 = vmatprep.subr.mxu0 %v2840_v0 }
 0x7bd   :  { %2556 = vmatpush3.msra.mxu0 %v3303_v60 }
 0x7be   :  { %2557 = vmatprep.subr.mxu0 %v2840_v0 }
 0x7bf   :  { %2558 = vmatpush3.msra.mxu0 %v3309_v61 }
 0x7c0   :  { %2559 = vmatprep.subr.mxu0 %v2840_v0 }
 0x7c1   :  { %2560 = vmatpush3.msra.mxu0 %v3352_v31 }
 0x7c2   :  { %2561 = vmatprep.subr.mxu0 %v2840_v0 }
 0x7c3   :  { %2562 = vmatpush3.msra.mxu0 %v3357_v33 }
 0x7c4   :  { %2601 = vmatprep.subr.mxu0 %v2840_v0 }
 0x864   :  { %v1193_v35 = vpop.f32.mrf.mxu0 }
 0x865   :  { %v1197_v36 = vadd.f32 %v1193_v35, %v215_v2 }
 0x866   :  { %v2495_v37 = vpop.f32.mrf.mxu0 }
 0x867   :  { %2734 = vtanh.f32 %v1197_v36 }
 0x874   :  { %v2735_v38 = vpop.eup %2734 }
 0x875   :  { %v1200_v39 = vpack.c.bf16 %v2735_v38, %v2735_v38  ;;  %2529 = vmatmul.mubr.f32.vlgmr.msra.gmra.mxu1 %v2735_v38 }
 0x876   :  { %2567 = vmatpush3.msra.mxu1 %v3228_v14  ;;  %2598 = vmatprep.mubr.msk.f32.mxu1 %vm2841_vm0, %v2840_v0 }
 0x877   :  { %1202 = vst [vmem:[#allocation10 + $0x24] sm:$0xf] %v1200_v39  ;;  %2568 = vmatprep.subr.mxu1 %v2840_v0 }
 0x878   :  { %2569 = vmatpush3.msra.mxu1 %v3230_v16 }
 0x879   :  { %2570 = vmatprep.subr.mxu1 %v2840_v0 }
 0x87a   :  { %2571 = vmatpush3.msra.mxu1 %v3234_v18 }
 0x87b   :  { %2572 = vmatprep.subr.mxu1 %v2840_v0 }
 0x87c   :  { %2573 = vmatpush3.msra.mxu1 %v3238_v20 }
 0x87d   :  { %2574 = vmatprep.subr.mxu1 %v2840_v0 }
 0x87e   :  { %2575 = vmatpush3.msra.mxu1 %v3242_v22 }
 0x87f   :  { %2576 = vmatprep.subr.mxu1 %v2840_v0 }
 0x880   :  { %2577 = vmatpush3.msra.mxu1 %v3246_v24 }
 0x881   :  { %2578 = vmatprep.subr.mxu1 %v2840_v0 }
 0x882   :  { %2579 = vmatpush3.msra.mxu1 %v3250_v26 }
 0x883   :  { %2580 = vmatprep.subr.mxu1 %v2840_v0 }
 0x884   :  { %2581 = vmatpush3.msra.mxu1 %v3274_v55 }
 0x885   :  { %2582 = vmatprep.subr.mxu1 %v2840_v0 }
 0x886   :  { %2583 = vmatpush3.msra.mxu1 %v3279_v56 }
 0x887   :  { %2584 = vmatprep.subr.mxu1 %v2840_v0 }
 0x888   :  { %2585 = vmatpush3.msra.mxu1 %v3285_v57 }
 0x889   :  { %2586 = vmatprep.subr.mxu1 %v2840_v0 }
 0x88a   :  { %2587 = vmatpush3.msra.mxu1 %v3291_v58 }
 0x88b   :  { %2588 = vmatprep.subr.mxu1 %v2840_v0 }
 0x88c   :  { %2589 = vmatpush3.msra.mxu1 %v3297_v59 }
 0x88d   :  { %2590 = vmatprep.subr.mxu1 %v2840_v0 }
 0x88e   :  { %2591 = vmatpush3.msra.mxu1 %v3303_v60 }
 0x88f   :  { %2592 = vmatprep.subr.mxu1 %v2840_v0 }
 0x890   :  { %2593 = vmatpush3.msra.mxu1 %v3309_v61 }
 0x891   :  { %2594 = vmatprep.subr.mxu1 %v2840_v0 }
 0x892   :  { %2595 = vmatpush3.msra.mxu1 %v3352_v31 }
 0x893   :  { %2596 = vmatprep.subr.mxu1 %v2840_v0 }
 0x894   :  { %2597 = vmatpush3.msra.mxu1 %v3357_v33 }
 0x895   :  { %2636 = vmatprep.subr.mxu1 %v2840_v0 }
 0x935   :  { %v1287_v40 = vpop.f32.mrf.mxu1 }
 0x936   :  { %v1291_v41 = vadd.f32 %v1287_v40, %v220_v1 }
 0x937   :  { %v2530_v42 = vpop.f32.mrf.mxu1 }
 0x938   :  { %2736 = vtanh.f32 %v1291_v41 }
 0x945   :  { %v2737_v43 = vpop.eup %2736 }
 0x946   :  { %v1294_v44 = vpack.c.bf16 %v2737_v43, %v2737_v43  ;;  %2564 = vmatmul.mubr.f32.vlgmr.msra.gmra.mxu0 %v2737_v43 }
 0x947   :  { %2602 = vmatpush3.msra.mxu0 %v3228_v14  ;;  %2633 = vmatprep.mubr.msk.f32.mxu0 %vm2841_vm0, %v2840_v0 }
 0x948   :  { %1296 = vst [vmem:[#allocation10 + $0x28] sm:$0xf] %v1294_v44  ;;  %2603 = vmatprep.subr.mxu0 %v2840_v0 }
 0x949   :  { %2604 = vmatpush3.msra.mxu0 %v3230_v16 }
 0x94a   :  { %2605 = vmatprep.subr.mxu0 %v2840_v0 }
 0x94b   :  { %2606 = vmatpush3.msra.mxu0 %v3234_v18 }
 0x94c   :  { %2607 = vmatprep.subr.mxu0 %v2840_v0 }
 0x94d   :  { %2608 = vmatpush3.msra.mxu0 %v3238_v20 }
 0x94e   :  { %2609 = vmatprep.subr.mxu0 %v2840_v0 }
 0x94f   :  { %2610 = vmatpush3.msra.mxu0 %v3242_v22 }
 0x950   :  { %2611 = vmatprep.subr.mxu0 %v2840_v0 }
 0x951   :  { %2612 = vmatpush3.msra.mxu0 %v3246_v24 }
 0x952   :  { %2613 = vmatprep.subr.mxu0 %v2840_v0 }
 0x953   :  { %2614 = vmatpush3.msra.mxu0 %v3250_v26 }
 0x954   :  { %2615 = vmatprep.subr.mxu0 %v2840_v0 }
 0x955   :  { %2616 = vmatpush3.msra.mxu0 %v3274_v55 }
 0x956   :  { %2617 = vmatprep.subr.mxu0 %v2840_v0 }
 0x957   :  { %2618 = vmatpush3.msra.mxu0 %v3279_v56 }
 0x958   :  { %2619 = vmatprep.subr.mxu0 %v2840_v0 }
 0x959   :  { %2620 = vmatpush3.msra.mxu0 %v3285_v57 }
 0x95a   :  { %2621 = vmatprep.subr.mxu0 %v2840_v0 }
 0x95b   :  { %2622 = vmatpush3.msra.mxu0 %v3291_v58 }
 0x95c   :  { %2623 = vmatprep.subr.mxu0 %v2840_v0 }
 0x95d   :  { %2624 = vmatpush3.msra.mxu0 %v3297_v59 }
 0x95e   :  { %2625 = vmatprep.subr.mxu0 %v2840_v0 }
 0x95f   :  { %2626 = vmatpush3.msra.mxu0 %v3303_v60 }
 0x960   :  { %2627 = vmatprep.subr.mxu0 %v2840_v0 }
 0x961   :  { %2628 = vmatpush3.msra.mxu0 %v3309_v61 }
 0x962   :  { %2629 = vmatprep.subr.mxu0 %v2840_v0 }
 0x963   :  { %2630 = vmatpush3.msra.mxu0 %v3352_v31 }
 0x964   :  { %2631 = vmatprep.subr.mxu0 %v2840_v0 }
 0x965   :  { %2632 = vmatpush3.msra.mxu0 %v3357_v33 }
 0x966   :  { %2671 = vmatprep.subr.mxu0 %v2840_v0 }
 0xa06   :  { %v1381_v45 = vpop.f32.mrf.mxu0 }
 0xa07   :  { %v1385_v46 = vadd.f32 %v1381_v45, %v225_v7 }
 0xa08   :  { %v2565_v47 = vpop.f32.mrf.mxu0 }
 0xa09   :  { %2738 = vtanh.f32 %v1385_v46 }
 0xa16   :  { %v2739_v48 = vpop.eup %2738 }
 0xa17   :  { %v1388_v3 = vpack.c.bf16 %v2739_v48, %v2739_v48  ;;  %2599 = vmatmul.mubr.f32.vlgmr.msra.gmra.mxu1 %v2739_v48 }
 0xa18   :  { %2637 = vmatpush3.msra.mxu1 %v3228_v14  ;;  %2668 = vmatprep.mubr.msk.f32.mxu1 %vm2841_vm0, %v2840_v0 }
 0xa19   :  { %1390 = vst [vmem:[#allocation10 + $0x2c] sm:$0xf] %v1388_v3  ;;  %2638 = vmatprep.subr.mxu1 %v2840_v0 }
 0xa1a   :  { %2639 = vmatpush3.msra.mxu1 %v3230_v16 }
 0xa1b   :  { %2640 = vmatprep.subr.mxu1 %v2840_v0 }
 0xa1c   :  { %2641 = vmatpush3.msra.mxu1 %v3234_v18 }
 0xa1d   :  { %2642 = vmatprep.subr.mxu1 %v2840_v0 }
 0xa1e   :  { %2643 = vmatpush3.msra.mxu1 %v3238_v20 }
 0xa1f   :  { %2644 = vmatprep.subr.mxu1 %v2840_v0 }
 0xa20   :  { %2645 = vmatpush3.msra.mxu1 %v3242_v22 }
 0xa21   :  { %2646 = vmatprep.subr.mxu1 %v2840_v0 }
 0xa22   :  { %2647 = vmatpush3.msra.mxu1 %v3246_v24 }
 0xa23   :  { %2648 = vmatprep.subr.mxu1 %v2840_v0 }
 0xa24   :  { %2649 = vmatpush3.msra.mxu1 %v3250_v26 }
 0xa25   :  { %2650 = vmatprep.subr.mxu1 %v2840_v0 }
 0xa26   :  { %2651 = vmatpush3.msra.mxu1 %v3274_v55 }
 0xa27   :  { %2652 = vmatprep.subr.mxu1 %v2840_v0 }
 0xa28   :  { %2653 = vmatpush3.msra.mxu1 %v3279_v56 }
 0xa29   :  { %2654 = vmatprep.subr.mxu1 %v2840_v0 }
 0xa2a   :  { %2655 = vmatpush3.msra.mxu1 %v3285_v57 }
 0xa2b   :  { %2656 = vmatprep.subr.mxu1 %v2840_v0 }
 0xa2c   :  { %2657 = vmatpush3.msra.mxu1 %v3291_v58 }
 0xa2d   :  { %2658 = vmatprep.subr.mxu1 %v2840_v0 }
 0xa2e   :  { %2659 = vmatpush3.msra.mxu1 %v3297_v59 }
 0xa2f   :  { %2660 = vmatprep.subr.mxu1 %v2840_v0 }
 0xa30   :  { %2661 = vmatpush3.msra.mxu1 %v3303_v60 }
 0xa31   :  { %2662 = vmatprep.subr.mxu1 %v2840_v0 }
 0xa32   :  { %2663 = vmatpush3.msra.mxu1 %v3309_v61 }
 0xa33   :  { %2664 = vmatprep.subr.mxu1 %v2840_v0 }
 0xa34   :  { %2665 = vmatpush3.msra.mxu1 %v3352_v31 }
 0xa35   :  { %2666 = vmatprep.subr.mxu1 %v2840_v0 }
 0xa36   :  { %2667 = vmatpush3.msra.mxu1 %v3357_v33 }
 0xad7   :  { %v1475_v4 = vpop.f32.mrf.mxu1 }
 0xad8   :  { %v1479_v6 = vadd.f32 %v1475_v4, %v230_v5 }
 0xad9   :  { %v2600_v8 = vpop.f32.mrf.mxu1 }
 0xada   :  { %2740 = vtanh.f32 %v1479_v6 }
 0xae7   :  { %v2741_v10 = vpop.eup %2740 }
 0xae8   :  { %v1482_v12 = vpack.c.bf16 %v2741_v10, %v2741_v10  ;;  %2634 = vmatmul.mubr.f32.vlgmr.msra.gmra.mxu0 %v2741_v10 }
 0xae9   :  { %2672 = vmatpush3.msra.mxu0 %v3228_v14  ;;  %2703 = vmatprep.mubr.msk.f32.mxu0 %vm2841_vm0, %v2840_v0 }
 0xaea   :  { %1484 = vst [vmem:[#allocation10 + $0x30] sm:$0xf] %v1482_v12  ;;  %2673 = vmatprep.subr.mxu0 %v2840_v0 }
 0xaeb   :  { %2674 = vmatpush3.msra.mxu0 %v3230_v16 }
 0xaec   :  { %2675 = vmatprep.subr.mxu0 %v2840_v0 }
 0xaed   :  { %2676 = vmatpush3.msra.mxu0 %v3234_v18 }
 0xaee   :  { %2677 = vmatprep.subr.mxu0 %v2840_v0 }
 0xaef   :  { %2678 = vmatpush3.msra.mxu0 %v3238_v20 }
 0xaf0   :  { %2679 = vmatprep.subr.mxu0 %v2840_v0 }
 0xaf1   :  { %2680 = vmatpush3.msra.mxu0 %v3242_v22 }
 0xaf2   :  { %2681 = vmatprep.subr.mxu0 %v2840_v0 }
 0xaf3   :  { %2682 = vmatpush3.msra.mxu0 %v3246_v24  ;;  %v240_v24 = vadd.f32 %v2748_v51, %v3080_v15 }
 0xaf4   :  { %2683 = vmatprep.subr.mxu0 %v2840_v0 }
 0xaf5   :  { %2684 = vmatpush3.msra.mxu0 %v3250_v26 }
 0xaf6   :  { %2685 = vmatprep.subr.mxu0 %v2840_v0 }
 0xaf7   :  { %2686 = vmatpush3.msra.mxu0 %v3274_v55 }
 0xaf8   :  { %2687 = vmatprep.subr.mxu0 %v2840_v0 }
 0xaf9   :  { %2688 = vmatpush3.msra.mxu0 %v3279_v56 }
 0xafa   :  { %2689 = vmatprep.subr.mxu0 %v2840_v0 }
 0xafb   :  { %2690 = vmatpush3.msra.mxu0 %v3285_v57 }
 0xafc   :  { %2691 = vmatprep.subr.mxu0 %v2840_v0 }
 0xafd   :  { %2692 = vmatpush3.msra.mxu0 %v3291_v58 }
 0xafe   :  { %2693 = vmatprep.subr.mxu0 %v2840_v0 }
 0xaff   :  { %2694 = vmatpush3.msra.mxu0 %v3297_v59 }
 0xb00   :  { %2695 = vmatprep.subr.mxu0 %v2840_v0 }
 0xb01   :  { %2696 = vmatpush3.msra.mxu0 %v3303_v60 }
 0xb02   :  { %2697 = vmatprep.subr.mxu0 %v2840_v0 }
 0xb03   :  { %2698 = vmatpush3.msra.mxu0 %v3309_v61 }
 0xb04   :  { %2699 = vmatprep.subr.mxu0 %v2840_v0 }
 0xb05   :  { %2700 = vmatpush3.msra.mxu0 %v3352_v31 }
 0xb06   :  { %2701 = vmatprep.subr.mxu0 %v2840_v0 }
 0xb07   :  { %2702 = vmatpush3.msra.mxu0 %v3357_v33 }
 0xba8   :  { %v1569_v14 = vpop.f32.mrf.mxu0 }
 0xba9   :  { %v1573_v16 = vadd.f32 %v1569_v14, %v235_v11 }
 0xbaa   :  { %v2635_v18 = vpop.f32.mrf.mxu0 }
 0xbab   :  { %2742 = vtanh.f32 %v1573_v16 }
 0xbb8   :  { %v2743_v20 = vpop.eup %2742 }
 0xbb9   :  { %v1576_v22 = vpack.c.bf16 %v2743_v20, %v2743_v20  ;;  %2669 = vmatmul.mubr.f32.vlgmr.msra.gmra.mxu1 %v2743_v20 }
 0xbbb   :  { %1578 = vst [vmem:[#allocation10 + $0x34] sm:$0xf] %v1576_v22 }
 0xc79   :  { %v1663_v26 = vpop.f32.mrf.mxu1 }
 0xc7a   :  { %v1667_v28 = vadd.f32 %v1663_v26, %v240_v24 }
 0xc7b   :  { %v2670_v49 = vpop.f32.mrf.mxu1 }
 0xc7c   :  { %2744 = vtanh.f32 %v1667_v28 }
 0xc89   :  { %v2745_v50 = vpop.eup %2744 }
 0xc8a   :  { %v1670_v0 = vpack.c.bf16 %v2745_v50, %v2745_v50  ;;  %2704 = vmatmul.mubr.f32.vlgmr.msra.gmra.mxu0 %v2745_v50 }
 0xc8c   :  { %1672 = vst [vmem:[#allocation10 + $0x38] sm:$0xf] %v1670_v0 }
 0xd4a   :  { %v1757_v52 = vpop.f32.mrf.mxu0 }
 0xd4b   :  { %v1761_v53 = vadd.f32 %v1757_v52, %v245_v9 }
 0xd4c   :  { %v2705_v54 = vpop.f32.mrf.mxu0 }
 0xd4d   :  { %2746 = vtanh.f32 %v1761_v53 }
 0xd5a   :  { %v2747_v55 = vpop.eup %2746 }
 0xd5b   :  { %v1764_v56 = vpack.c.bf16 %v2747_v55, %v2747_v55 }
 0xd5d   :  { %1766 = vst [vmem:[#allocation10 + $0x3c] sm:$0xf] %v1764_v56 }
 0xd5e   :  { %2820 = shalt.err (!%p2817_p5)
}
 0xd5f   :  { %s2843_s9 = smov 64   ;;  %s2844_s10 = smov 4  }
 0xd60   :  { %1778 = dma.vmem_to_hbm [thread:$0]  %s1773_s7, 1024, %s3554_s4, [#allocation6], %s2843_s9, %s2843_s9, %s2844_s10  }
 0xd61   :  { %2833 = dma.done.wait [#allocation6], 1024  }
 0xd62   :  { %2834 = vsyncadd [#allocation6], 4294966272 }
 0xd63   :  { %1782 = vsyncpa [#allocation5], 1 }
 0xd64   :  { %1783 = vsyncpa [#allocation8], 1 }
 0xd65   :  { %1784 = vsyncpa [#allocation6], 1 }

// kernel: tpu_custom_call.1
= control target key start
LH: loop header
LB: loop body
LE: loop exit
PB: predicated region body
PF: predicated region fallthrough
CT: control target
= control target key end

     0   :  { %9 = vsyncpa [#allocation5], 0  ;;  %s3550_s0 = inlined_call_operand.hbm [shape: f32[16,8,128], index: 0, kind: input, shape index: {}]   ;;  %s3551_s1 = inlined_call_operand.hbm [shape: f32[128,128], index: 1, kind: input, shape index: {}]   ;;  %s3552_s2 = inlined_call_operand.hbm [shape: f32[128,128], index: 2, kind: input, shape index: {}]   ;;  %s3553_s3 = inlined_call_operand.vmem [shape: f32[1,128], index: 3, kind: input, shape index: {}]   ;;  %s3554_s4 = inlined_call_operand.hbm [shape: bf16[16,8,128], index: 4, kind: output, shape index: {}]  }
   0x1   :  { %10 = vsyncpa [#allocation8], 0 }
   0x2   :  { %11 = vsyncpa [#allocation6], 0  ;;  %s2835_s15 = smov [#allocation7]   ;;  %s2836_s17 = smov [#allocation4]  }
   0x3   :  { %s29_s16 = sshll.u32 %s2835_s15, 4  ;;  %s17_s18 = sshll.u32 %s2836_s17, 4  ;;  %s30_s16 = int_to_ptr.vmem [resolvable:$true] %s29_s16  ;;  %s18_s18 = int_to_ptr.vmem [resolvable:$true] %s17_s18 }
   0x4   :  { %s2757_s19 = scalar_lea.vmem %s30_s16, 2048  ;;  %p2762_p1 = scmp.lt.s32.totalorder %s30_s16, %s30_s16 }
   0x5   :  { %p2758_p0 = scmp.ne.s32.totalorder %s30_s16, %s2757_s19  ;;  %p2763_p2 = scmp.lt.s32.totalorder %s2757_s19, %s2757_s19 }
   0x7   :  { %p2764_p3 = por %p2763_p2, %p2762_p1 }
   0x9   :  { %p2765_p4 = pnand %p2764_p3, %p2758_p0 }
   0xb   :  { %2768 = shalt.err (!%p2765_p4)
}
   0xc   :  { %s2837_s20 = smov 128   ;;  %s2838_s21 = smov 8  }
   0xd   :  { %35 = dma.hbm_to_vmem [thread:$0]  %s3551_s1, 2048, %s30_s16, [#allocation8], %s2837_s20, %s2837_s20, %s2838_s21  }
   0xe   :  { %s2777_s24 = scalar_lea.vmem %s18_s18, 2048  ;;  %p2782_p6 = scmp.lt.s32.totalorder %s18_s18, %s18_s18 }
   0xf   :  { %p2778_p5 = scmp.ne.s32.totalorder %s18_s18, %s2777_s24  ;;  %p2783_p7 = scmp.lt.s32.totalorder %s2777_s24, %s2777_s24 }
  0x11   :  { %p2784_p8 = por %p2783_p7, %p2782_p6 }
  0x13   :  { %p2785_p9 = pnand %p2784_p8, %p2778_p5 }
  0x15   :  { %2788 = shalt.err (!%p2785_p9)
}
  0x16   :  { %23 = dma.hbm_to_vmem [thread:$0]  %s3550_s0, 2048, %s18_s18, [#allocation5], %s2837_s20, %s2837_s20, %s2838_s21  }
  0x17   :  { %s2839_s27 = smov [#allocation9]  }
  0x18   :  { %s41_s28 = sshll.u32 %s2839_s27, 4  ;;  %s42_s28 = int_to_ptr.vmem [resolvable:$true] %s41_s28 }
  0x19   :  { %s2797_s29 = scalar_lea.vmem %s42_s28, 2048  ;;  %p2802_p11 = scmp.lt.s32.totalorder %s42_s28, %s42_s28 }
  0x1a   :  { %p2798_p10 = scmp.ne.s32.totalorder %s42_s28, %s2797_s29  ;;  %p2803_p12 = scmp.lt.s32.totalorder %s2797_s29, %s2797_s29 }
  0x1c   :  { %p2804_p13 = por %p2803_p12, %p2802_p11 }
  0x1e   :  { %p2805_p0 = pnand %p2804_p13, %p2798_p10 }
  0x20   :  { %2808 = shalt.err (!%p2805_p0)
}
  0x21   :  { %47 = dma.hbm_to_vmem [thread:$0]  %s3552_s2, 2048, %s42_s28, [#allocation8], %s2837_s20, %s2837_s20, %s2838_s21  }
  0x22   :  { %2829 = dma.done.wait [#allocation5], 2048  }
  0x23   :  { %2830 = vsyncadd [#allocation5], 4294965248 }
  0x24   :  { %2831 = dma.done.wait [#allocation8], 4096  }
  0x25   :  { %2832 = vsyncadd [#allocation8], 4294963200  ;;  %v2840_v0 = vmov 0.0   ;;  %vm2841_vm0 = vmmov 0   ;;  %v95_v1 = vld [vmem:[#allocation7 + $0x78] sm:$0xff]  ;;  %v94_v2 = vld [vmem:[#allocation7 + $0x70] sm:$0xff] }
  0x26   :  { %2146 = vmatprep.subr.mxu1 %v2840_v0  ;;  %2178 = vmatprep.mubr.msk.f32.mxu1 %vm2841_vm0, %v2840_v0  ;;  %v2882_v3 = vld [vmem:[#allocation9 + $0x78] sm:$0xff]  ;;  %v2885_v4 = vld [vmem:[#allocation9 + $0x70] sm:$0xff]  ;;  %v93_v5 = vld [vmem:[#allocation7 + $0x68] sm:$0xff] }
  0x27   :  { %2090 = vmatprep.subr.mxu0 %v95_v1  ;;  %2147 = vmatpush3.msra.mxu1 %v2882_v3  ;;  %v2888_v6 = vld [vmem:[#allocation9 + $0x68] sm:$0xff]  ;;  %v92_v7 = vld [vmem:[#allocation7 + $0x60] sm:$0xff]  ;;  %v91_v9 = vld [vmem:[#allocation7 + $0x58] sm:$0xff] }
  0x28   :  { %2091 = vmatpush3.msra.mxu0 %v95_v1  ;;  %2148 = vmatprep.subr.mxu1 %v2840_v0  ;;  %v2892_v8 = vld [vmem:[#allocation9 + $0x60] sm:$0xff]  ;;  %v2896_v10 = vld [vmem:[#allocation9 + $0x58] sm:$0xff]  ;;  %v90_v11 = vld [vmem:[#allocation7 + $0x50] sm:$0xff] }
  0x29   :  { %2092 = vmatprep.subr.mxu0 %v94_v2  ;;  %2149 = vmatpush3.msra.mxu1 %v2885_v4  ;;  %v2900_v12 = vld [vmem:[#allocation9 + $0x50] sm:$0xff]  ;;  %v89_v13 = vld [vmem:[#allocation7 + $0x48] sm:$0xff]  ;;  %v88_v15 = vld [vmem:[#allocation7 + $0x40] sm:$0xff] }
  0x2a   :  { %2093 = vmatpush3.msra.mxu0 %v94_v2  ;;  %2150 = vmatprep.subr.mxu1 %v2840_v0  ;;  %v2904_v14 = vld [vmem:[#allocation9 + $0x48] sm:$0xff]  ;;  %v2908_v16 = vld [vmem:[#allocation9 + $0x40] sm:$0xff]  ;;  %v87_v17 = vld [vmem:[#allocation7 + $0x38] sm:$0xff] }
  0x2b   :  { %2094 = vmatprep.subr.mxu0 %v93_v5  ;;  %2151 = vmatpush3.msra.mxu1 %v2888_v6  ;;  %v2912_v18 = vld [vmem:[#allocation9 + $0x38] sm:$0xff]  ;;  %v86_v19 = vld [vmem:[#allocation7 + $0x30] sm:$0xff]  ;;  %v85_v21 = vld [vmem:[#allocation7 + $0x28] sm:$0xff] }
  0x2c   :  { %2095 = vmatpush3.msra.mxu0 %v93_v5  ;;  %2152 = vmatprep.subr.mxu1 %v2840_v0  ;;  %v2916_v20 = vld [vmem:[#allocation9 + $0x30] sm:$0xff]  ;;  %v2920_v22 = vld [vmem:[#allocation9 + $0x28] sm:$0xff]  ;;  %v84_v23 = vld [vmem:[#allocation7 + $0x20] sm:$0xff] }
  0x2d   :  { %2096 = vmatprep.subr.mxu0 %v92_v7  ;;  %2153 = vmatpush3.msra.mxu1 %v2892_v8  ;;  %v2924_v24 = vld [vmem:[#allocation9 + $0x20] sm:$0xff]  ;;  %v83_v25 = vld [vmem:[#allocation7 + $0x18] sm:$0xff]  ;;  %v82_v27 = vld [vmem:[#allocation7 + $0x10] sm:$0xff] }
  0x2e   :  { %2097 = vmatpush3.msra.mxu0 %v92_v7  ;;  %2154 = vmatprep.subr.mxu1 %v2840_v0  ;;  %v2928_v26 = vld [vmem:[#allocation9 + $0x18] sm:$0xff]  ;;  %v2932_v28 = vld [vmem:[#allocation9 + $0x10] sm:$0xff]  ;;  %v81_v29 = vld [vmem:[#allocation7 + $0x8] sm:$0xff] }
  0x2f   :  { %2098 = vmatprep.subr.mxu0 %v91_v9  ;;  %2155 = vmatpush3.msra.mxu1 %v2896_v10  ;;  %v64_v30 = vld [vmem:[#allocation4] sm:$0xff]  ;;  %v2937_v31 = vld [vmem:[#allocation9 + $0x8] sm:$0xff]  ;;  %v66_v35 = vld [vmem:[#allocation4 + $0x10] sm:$0xff] }
  0x30   :  { %2099 = vmatpush3.msra.mxu0 %v91_v9  ;;  %2156 = vmatprep.subr.mxu1 %v2840_v0  ;;  %v80_v32 = vld [vmem:[#allocation7] sm:$0xff]  ;;  %v65_v34 = vld [vmem:[#allocation4 + $0x8] sm:$0xff]  ;;  %v67_v36 = vld [vmem:[#allocation4 + $0x18] sm:$0xff] }
  0x31   :  { %2100 = vmatprep.subr.mxu0 %v90_v11  ;;  %2157 = vmatpush3.msra.mxu1 %v2900_v12  ;;  %v2940_v33 = vld [vmem:[#allocation9] sm:$0xff]  ;;  %v69_v38 = vld [vmem:[#allocation4 + $0x28] sm:$0xff]  ;;  %v70_v39 = vld [vmem:[#allocation4 + $0x30] sm:$0xff] }
  0x32   :  { %2101 = vmatpush3.msra.mxu0 %v90_v11  ;;  %2158 = vmatprep.subr.mxu1 %v2840_v0  ;;  %v68_v37 = vld [vmem:[#allocation4 + $0x20] sm:$0xff]  ;;  %v71_v40 = vld [vmem:[#allocation4 + $0x38] sm:$0xff]  ;;  %v73_v42 = vld [vmem:[#allocation4 + $0x48] sm:$0xff] }
  0x33   :  { %2102 = vmatprep.subr.mxu0 %v89_v13  ;;  %2159 = vmatpush3.msra.mxu1 %v2904_v14  ;;  %v72_v41 = vld [vmem:[#allocation4 + $0x40] sm:$0xff]  ;;  %v74_v43 = vld [vmem:[#allocation4 + $0x50] sm:$0xff]  ;;  %v75_v44 = vld [vmem:[#allocation4 + $0x58] sm:$0xff] }
  0x34   :  { %2103 = vmatpush3.msra.mxu0 %v89_v13  ;;  %2160 = vmatprep.subr.mxu1 %v2840_v0  ;;  %v76_v45 = vld [vmem:[#allocation4 + $0x60] sm:$0xff]  ;;  %v77_v46 = vld [vmem:[#allocation4 + $0x68] sm:$0xff]  ;;  %v78_v47 = vld [vmem:[#allocation4 + $0x70] sm:$0xff] }
  0x35   :  { %2104 = vmatprep.subr.mxu0 %v88_v15  ;;  %2161 = vmatpush3.msra.mxu1 %v2908_v16  ;;  %v79_v48 = vld [vmem:[#allocation4 + $0x78] sm:$0xff]  ;;  %v3019_v51 = vld [vmem:[%s3553_s3] ss:$0 sm:$0xff] }
  0x36   :  { %2105 = vmatpush3.msra.mxu0 %v88_v15  ;;  %2162 = vmatprep.subr.mxu1 %v2840_v0 }
  0x37   :  { %2106 = vmatprep.subr.mxu0 %v87_v17  ;;  %2163 = vmatpush3.msra.mxu1 %v2912_v18 }
  0x38   :  { %2107 = vmatpush3.msra.mxu0 %v87_v17  ;;  %2164 = vmatprep.subr.mxu1 %v2840_v0 }
  0x39   :  { %2108 = vmatprep.subr.mxu0 %v86_v19  ;;  %2165 = vmatpush3.msra.mxu1 %v2916_v20 }
  0x3a   :  { %2109 = vmatpush3.msra.mxu0 %v86_v19  ;;  %2166 = vmatprep.subr.mxu1 %v2840_v0 }
  0x3b   :  { %2110 = vmatprep.subr.mxu0 %v85_v21  ;;  %2167 = vmatpush3.msra.mxu1 %v2920_v22 }
  0x3c   :  { %2111 = vmatpush3.msra.mxu0 %v85_v21  ;;  %2168 = vmatprep.subr.mxu1 %v2840_v0 }
  0x3d   :  { %2112 = vmatprep.subr.mxu0 %v84_v23  ;;  %2169 = vmatpush3.msra.mxu1 %v2924_v24 }
  0x3e   :  { %2113 = vmatpush3.msra.mxu0 %v84_v23  ;;  %2170 = vmatprep.subr.mxu1 %v2840_v0 }
  0x3f   :  { %2114 = vmatprep.subr.mxu0 %v83_v25  ;;  %2171 = vmatpush3.msra.mxu1 %v2928_v26 }
  0x40   :  { %2115 = vmatpush3.msra.mxu0 %v83_v25  ;;  %2172 = vmatprep.subr.mxu1 %v2840_v0 }
  0x41   :  { %2116 = vmatprep.subr.mxu0 %v82_v27  ;;  %2173 = vmatpush3.msra.mxu1 %v2932_v28 }
  0x42   :  { %2117 = vmatpush3.msra.mxu0 %v82_v27  ;;  %2174 = vmatprep.subr.mxu1 %v2840_v0 }
  0x43   :  { %2118 = vmatprep.subr.mxu0 %v81_v29  ;;  %2122 = vmatprep.mubr.f32.mxu0 %v64_v30 }
  0x44   :  { %2119 = vmatpush3.msra.mxu0 %v81_v29  ;;  %2175 = vmatpush3.msra.mxu1 %v2937_v31 }
  0x45   :  { %2120 = vmatprep.subr.mxu0 %v80_v32  ;;  %2176 = vmatprep.subr.mxu1 %v2840_v0 }
  0x46   :  { %2121 = vmatpush3.msra.mxu0 %v80_v32  ;;  %2177 = vmatpush3.msra.mxu1 %v2940_v33 }
  0x47   :  { %2123 = vmatmul.mubr.f32.vlgmr.msra.gmra.mxu0 %v65_v34  ;;  %2179 = vmatmul.mubr.f32.vlgmr.msra.gmra.mxu1 %v2840_v0 }
  0x48   :  { %2181 = vmatprep.subr.mxu0 %v2840_v0  ;;  %2125 = vmatprep.mubr.f32.mxu0 %v66_v35 }
  0x49   :  { %2182 = vmatpush3.msra.mxu0 %v2882_v3  ;;  %2216 = vmatprep.subr.mxu1 %v2840_v0 }
  0x4a   :  { %2183 = vmatprep.subr.mxu0 %v2840_v0  ;;  %2217 = vmatpush3.msra.mxu1 %v2882_v3 }
  0x4b   :  { %2126 = vmatmul.mubr.f32.gmra.mxu0 %v67_v36  ;;  %2218 = vmatprep.subr.mxu1 %v2840_v0 }
  0x4c   :  { %2184 = vmatpush3.msra.mxu0 %v2885_v4  ;;  %2128 = vmatprep.mubr.f32.mxu0 %v68_v37 }
  0x4d   :  { %2185 = vmatprep.subr.mxu0 %v2840_v0  ;;  %2219 = vmatpush3.msra.mxu1 %v2885_v4 }
  0x4e   :  { %2186 = vmatpush3.msra.mxu0 %v2888_v6  ;;  %2220 = vmatprep.subr.mxu1 %v2840_v0 }
  0x4f   :  { %2187 = vmatprep.subr.mxu0 %v2840_v0  ;;  %2129 = vmatmul.mubr.f32.gmra.mxu0 %v69_v38 }
  0x50   :  { %2188 = vmatpush3.msra.mxu0 %v2892_v8  ;;  %2131 = vmatprep.mubr.f32.mxu0 %v70_v39 }
  0x51   :  { %2189 = vmatprep.subr.mxu0 %v2840_v0  ;;  %2221 = vmatpush3.msra.mxu1 %v2888_v6 }
  0x52   :  { %2190 = vmatpush3.msra.mxu0 %v2896_v10  ;;  %2222 = vmatprep.subr.mxu1 %v2840_v0 }
  0x53   :  { %2191 = vmatprep.subr.mxu0 %v2840_v0  ;;  %2132 = vmatmul.mubr.f32.gmra.mxu0 %v71_v40 }
  0x54   :  { %2192 = vmatpush3.msra.mxu0 %v2900_v12  ;;  %2223 = vmatpush3.msra.mxu1 %v2892_v8 }
  0x55   :  { %2193 = vmatprep.subr.mxu0 %v2840_v0  ;;  %2224 = vmatprep.subr.mxu1 %v2840_v0 }
  0x56   :  { %2194 = vmatpush3.msra.mxu0 %v2904_v14  ;;  %2225 = vmatpush3.msra.mxu1 %v2896_v10 }
  0x57   :  { %2195 = vmatprep.subr.mxu0 %v2840_v0  ;;  %2226 = vmatprep.subr.mxu1 %v2840_v0 }
  0x58   :  { %2196 = vmatpush3.msra.mxu0 %v2908_v16  ;;  %2227 = vmatpush3.msra.mxu1 %v2900_v12 }
  0x59   :  { %2197 = vmatprep.subr.mxu0 %v2840_v0  ;;  %2228 = vmatprep.subr.mxu1 %v2840_v0 }
  0x5a   :  { %2198 = vmatpush3.msra.mxu0 %v2912_v18  ;;  %2229 = vmatpush3.msra.mxu1 %v2904_v14 }
  0x5b   :  { %2199 = vmatprep.subr.mxu0 %v2840_v0  ;;  %2230 = vmatprep.subr.mxu1 %v2840_v0 }
  0x5c   :  { %2200 = vmatpush3.msra.mxu0 %v2916_v20  ;;  %2231 = vmatpush3.msra.mxu1 %v2908_v16 }
  0x5d   :  { %2201 = vmatprep.subr.mxu0 %v2840_v0  ;;  %2232 = vmatprep.subr.mxu1 %v2840_v0 }
  0x5e   :  { %2202 = vmatpush3.msra.mxu0 %v2920_v22  ;;  %2233 = vmatpush3.msra.mxu1 %v2912_v18 }
  0x5f   :  { %2203 = vmatprep.subr.mxu0 %v2840_v0  ;;  %2234 = vmatprep.subr.mxu1 %v2840_v0 }
  0x60   :  { %2204 = vmatpush3.msra.mxu0 %v2924_v24  ;;  %2235 = vmatpush3.msra.mxu1 %v2916_v20 }
  0x61   :  { %2205 = vmatprep.subr.mxu0 %v2840_v0  ;;  %2236 = vmatprep.subr.mxu1 %v2840_v0 }
  0x62   :  { %2206 = vmatpush3.msra.mxu0 %v2928_v26  ;;  %2237 = vmatpush3.msra.mxu1 %v2920_v22 }
  0x63   :  { %2207 = vmatprep.subr.mxu0 %v2840_v0  ;;  %2238 = vmatprep.subr.mxu1 %v2840_v0 }
  0x64   :  { %2208 = vmatpush3.msra.mxu0 %v2932_v28  ;;  %2239 = vmatpush3.msra.mxu1 %v2924_v24 }
  0x65   :  { %2209 = vmatprep.subr.mxu0 %v2840_v0  ;;  %2240 = vmatprep.subr.mxu1 %v2840_v0 }
  0x66   :  { %2210 = vmatpush3.msra.mxu0 %v2937_v31  ;;  %2241 = vmatpush3.msra.mxu1 %v2928_v26 }
  0x67   :  { %2211 = vmatprep.subr.mxu0 %v2840_v0  ;;  %2242 = vmatprep.subr.mxu1 %v2840_v0 }
  0x68   :  { %2212 = vmatpush3.msra.mxu0 %v2940_v33  ;;  %2243 = vmatpush3.msra.mxu1 %v2932_v28 }
  0x69   :  { %2244 = vmatprep.subr.mxu1 %v2840_v0  ;;  %2248 = vmatprep.mubr.msk.f32.mxu1 %vm2841_vm0, %v2840_v0 }
  0x6a   :  { %2245 = vmatpush3.msra.mxu1 %v2937_v31  ;;  %2251 = vmatprep.subr.mxu0 %v2840_v0 }
  0x6b   :  { %2246 = vmatprep.subr.mxu1 %v2840_v0  ;;  %2134 = vmatprep.mubr.f32.mxu0 %v72_v41 }
  0x6c   :  { %2247 = vmatpush3.msra.mxu1 %v2940_v33  ;;  %2135 = vmatmul.mubr.f32.gmra.mxu0 %v73_v42 }
  0x6d   :  { %2286 = vmatprep.subr.mxu1 %v2840_v0  ;;  %2137 = vmatprep.mubr.f32.mxu0 %v74_v43 }
  0x70   :  { %2138 = vmatmul.mubr.f32.gmra.mxu0 %v75_v44 }
  0x71   :  { %2140 = vmatprep.mubr.f32.mxu0 %v76_v45 }
  0x74   :  { %2141 = vmatmul.mubr.f32.gmra.mxu0 %v77_v46 }
  0x75   :  { %2143 = vmatprep.mubr.f32.mxu0 %v78_v47 }
  0x78   :  { %2144 = vmatmul.mubr.f32.gmra.mxu0 %v79_v48 }
  0x79   :  { %2213 = vmatprep.mubr.msk.f32.mxu0 %vm2841_vm0, %v2840_v0 }
 0x107   :  { %v2124_v49 = vpop.f32.mrf.mxu0  ;;  %v348_v50 = vpop.f32.mrf.mxu1 }
 0x108   :  { %v175_v17 = vadd.f32 %v2124_v49, %v3019_v51 }
 0x109   :  { %v169_v52 = vpop.f32.mrf.mxu0  ;;  %v2180_v53 = vpop.f32.mrf.mxu1 }
 0x10a   :  { %v170_v54 = vadd.f32 %v3019_v51, %v169_v52 }
 0x10b   :  { %v3056_v58 = vpop.f32.mrf.mxu0 }
 0x10c   :  { %v352_v55 = vadd.f32 %v348_v50, %v170_v54  ;;  %v185_v37 = vadd.f32 %v3056_v58, %v3019_v51  ;;  %v3291_v58 = vld [vmem:[#allocation9 + $0x28] sm:$0xff] }
 0x10d   :  { %v179_v59 = vpop.f32.mrf.mxu0 }
 0x10e   :  { %2716 = vtanh.f32 %v352_v55  ;;  %v180_v29 = vadd.f32 %v3019_v51, %v179_v59  ;;  %v3274_v55 = vld [vmem:[#allocation9 + $0x40] sm:$0xff] }
 0x10f   :  { %v3058_v60 = vpop.f32.mrf.mxu0  ;;  %v3297_v59 = vld [vmem:[#allocation9 + $0x20] sm:$0xff] }
 0x111   :  { %v3060_v61 = vpop.f32.mrf.mxu0 }
 0x112   :  { %v190_v43 = vadd.f32 %v3019_v51, %v3060_v61  ;;  %v3309_v61 = vld [vmem:[#allocation9 + $0x10] sm:$0xff] }
 0x113   :  { %v3062_v62 = vpop.f32.mrf.mxu0 }
 0x115   :  { %v3064_v63 = vpop.f32.mrf.mxu0 }
 0x11b   :  { %v2717_v56 = vpop.eup %2716 }
 0x11c   :  { %v355_v57 = vpack.c.bf16 %v2717_v56, %v2717_v56  ;;  %2214 = vmatmul.mubr.f32.vlgmr.msra.gmra.mxu0 %v2717_v56  ;;  %v3279_v56 = vld [vmem:[#allocation9 + $0x38] sm:$0xff] }
 0x11d   :  { %2252 = vmatpush3.msra.mxu0 %v2882_v3  ;;  %2283 = vmatprep.mubr.msk.f32.mxu0 %vm2841_vm0, %v2840_v0 }
 0x11e   :  { %356 = vst [vmem:[#allocation10] sm:$0xf] %v355_v57  ;;  %2253 = vmatprep.subr.mxu0 %v2840_v0  ;;  %v3285_v57 = vld [vmem:[#allocation9 + $0x30] sm:$0xff] }
 0x11f   :  { %2254 = vmatpush3.msra.mxu0 %v2885_v4 }
 0x120   :  { %2255 = vmatprep.subr.mxu0 %v2840_v0 }
 0x121   :  { %2256 = vmatpush3.msra.mxu0 %v2888_v6 }
 0x122   :  { %2257 = vmatprep.subr.mxu0 %v2840_v0 }
 0x123   :  { %2258 = vmatpush3.msra.mxu0 %v2892_v8 }
 0x124   :  { %2259 = vmatprep.subr.mxu0 %v2840_v0 }
 0x125   :  { %2260 = vmatpush3.msra.mxu0 %v2896_v10 }
 0x126   :  { %2261 = vmatprep.subr.mxu0 %v2840_v0 }
 0x127   :  { %2262 = vmatpush3.msra.mxu0 %v2900_v12 }
 0x128   :  { %2263 = vmatprep.subr.mxu0 %v2840_v0 }
 0x129   :  { %2264 = vmatpush3.msra.mxu0 %v2904_v14 }
 0x12a   :  { %2265 = vmatprep.subr.mxu0 %v2840_v0 }
 0x12b   :  { %2266 = vmatpush3.msra.mxu0 %v2908_v16 }
 0x12c   :  { %2267 = vmatprep.subr.mxu0 %v2840_v0  ;;  %v3066_v1 = vpop.f32.mrf.mxu0 }
 0x12d   :  { %2268 = vmatpush3.msra.mxu0 %v2912_v18 }
 0x12e   :  { %2269 = vmatprep.subr.mxu0 %v2840_v0  ;;  %v3068_v2 = vpop.f32.mrf.mxu0 }
 0x12f   :  { %2270 = vmatpush3.msra.mxu0 %v2916_v20 }
 0x130   :  { %2271 = vmatprep.subr.mxu0 %v2840_v0  ;;  %v3070_v5 = vpop.f32.mrf.mxu0 }
 0x131   :  { %2272 = vmatpush3.msra.mxu0 %v2920_v22 }
 0x132   :  { %2273 = vmatprep.subr.mxu0 %v2840_v0  ;;  %v3072_v7 = vpop.f32.mrf.mxu0 }
 0x133   :  { %2274 = vmatpush3.msra.mxu0 %v2924_v24 }
 0x134   :  { %2275 = vmatprep.subr.mxu0 %v2840_v0  ;;  %v3074_v9 = vpop.f32.mrf.mxu0 }
 0x135   :  { %2276 = vmatpush3.msra.mxu0 %v2928_v26 }
 0x136   :  { %2277 = vmatprep.subr.mxu0 %v2840_v0  ;;  %v3076_v11 = vpop.f32.mrf.mxu0 }
 0x137   :  { %2278 = vmatpush3.msra.mxu0 %v2932_v28 }
 0x138   :  { %2279 = vmatprep.subr.mxu0 %v2840_v0  ;;  %v3078_v13 = vpop.f32.mrf.mxu0 }
 0x139   :  { %2280 = vmatpush3.msra.mxu0 %v2937_v31 }
 0x13a   :  { %2281 = vmatprep.subr.mxu0 %v2840_v0  ;;  %v3080_v15 = vpop.f32.mrf.mxu0 }
 0x13b   :  { %2282 = vmatpush3.msra.mxu0 %v2940_v33 }
 0x13c   :  { %2321 = vmatprep.subr.mxu0 %v2840_v0 }
 0x1dc   :  { %v441_v19 = vpop.f32.mrf.mxu0 }
 0x1dd   :  { %v445_v21 = vadd.f32 %v441_v19, %v175_v17 }
 0x1de   :  { %v2215_v23 = vpop.f32.mrf.mxu0 }
 0x1df   :  { %2718 = vtanh.f32 %v445_v21 }
 0x1ec   :  { %v2719_v25 = vpop.eup %2718 }
 0x1ed   :  { %v448_v27 = vpack.c.bf16 %v2719_v25, %v2719_v25  ;;  %2249 = vmatmul.mubr.f32.vlgmr.msra.gmra.mxu1 %v2719_v25 }
 0x1ee   :  { %2287 = vmatpush3.msra.mxu1 %v2882_v3  ;;  %2318 = vmatprep.mubr.msk.f32.mxu1 %vm2841_vm0, %v2840_v0 }
 0x1ef   :  { %450 = vst [vmem:[#allocation10 + $0x4] sm:$0xf] %v448_v27  ;;  %2288 = vmatprep.subr.mxu1 %v2840_v0 }
 0x1f0   :  { %2289 = vmatpush3.msra.mxu1 %v2885_v4 }
 0x1f1   :  { %2290 = vmatprep.subr.mxu1 %v2840_v0 }
 0x1f2   :  { %2291 = vmatpush3.msra.mxu1 %v2888_v6 }
 0x1f3   :  { %2292 = vmatprep.subr.mxu1 %v2840_v0 }
 0x1f4   :  { %2293 = vmatpush3.msra.mxu1 %v2892_v8 }
 0x1f5   :  { %2294 = vmatprep.subr.mxu1 %v2840_v0 }
 0x1f6   :  { %2295 = vmatpush3.msra.mxu1 %v2896_v10 }
 0x1f7   :  { %2296 = vmatprep.subr.mxu1 %v2840_v0 }
 0x1f8   :  { %2297 = vmatpush3.msra.mxu1 %v2900_v12 }
 0x1f9   :  { %2298 = vmatprep.subr.mxu1 %v2840_v0 }
 0x1fa   :  { %2299 = vmatpush3.msra.mxu1 %v2904_v14 }
 0x1fb   :  { %2300 = vmatprep.subr.mxu1 %v2840_v0 }
 0x1fc   :  { %2301 = vmatpush3.msra.mxu1 %v2908_v16 }
 0x1fd   :  { %2302 = vmatprep.subr.mxu1 %v2840_v0 }
 0x1fe   :  { %2303 = vmatpush3.msra.mxu1 %v2912_v18 }
 0x1ff   :  { %2304 = vmatprep.subr.mxu1 %v2840_v0 }
 0x200   :  { %2305 = vmatpush3.msra.mxu1 %v2916_v20 }
 0x201   :  { %2306 = vmatprep.subr.mxu1 %v2840_v0 }
 0x202   :  { %2307 = vmatpush3.msra.mxu1 %v2920_v22 }
 0x203   :  { %2308 = vmatprep.subr.mxu1 %v2840_v0 }
 0x204   :  { %2309 = vmatpush3.msra.mxu1 %v2924_v24 }
 0x205   :  { %2310 = vmatprep.subr.mxu1 %v2840_v0 }
 0x206   :  { %2311 = vmatpush3.msra.mxu1 %v2928_v26 }
 0x207   :  { %2312 = vmatprep.subr.mxu1 %v2840_v0 }
 0x208   :  { %2313 = vmatpush3.msra.mxu1 %v2932_v28 }
 0x209   :  { %2314 = vmatprep.subr.mxu1 %v2840_v0 }
 0x20a   :  { %2315 = vmatpush3.msra.mxu1 %v2937_v31 }
 0x20b   :  { %2316 = vmatprep.subr.mxu1 %v2840_v0 }
 0x20c   :  { %2317 = vmatpush3.msra.mxu1 %v2940_v33 }
 0x20d   :  { %2356 = vmatprep.subr.mxu1 %v2840_v0 }
 0x2ad   :  { %v535_v30 = vpop.f32.mrf.mxu1 }
 0x2ae   :  { %v539_v32 = vadd.f32 %v535_v30, %v180_v29 }
 0x2af   :  { %v2250_v34 = vpop.f32.mrf.mxu1 }
 0x2b0   :  { %2720 = vtanh.f32 %v539_v32 }
 0x2bd   :  { %v2721_v35 = vpop.eup %2720 }
 0x2be   :  { %v542_v36 = vpack.c.bf16 %v2721_v35, %v2721_v35  ;;  %2284 = vmatmul.mubr.f32.vlgmr.msra.gmra.mxu0 %v2721_v35 }
 0x2bf   :  { %2322 = vmatpush3.msra.mxu0 %v2882_v3  ;;  %2353 = vmatprep.mubr.msk.f32.mxu0 %vm2841_vm0, %v2840_v0 }
 0x2c0   :  { %544 = vst [vmem:[#allocation10 + $0x8] sm:$0xf] %v542_v36  ;;  %2323 = vmatprep.subr.mxu0 %v2840_v0 }
 0x2c1   :  { %2324 = vmatpush3.msra.mxu0 %v2885_v4 }
 0x2c2   :  { %2325 = vmatprep.subr.mxu0 %v2840_v0 }
 0x2c3   :  { %2326 = vmatpush3.msra.mxu0 %v2888_v6 }
 0x2c4   :  { %2327 = vmatprep.subr.mxu0 %v2840_v0 }
 0x2c5   :  { %2328 = vmatpush3.msra.mxu0 %v2892_v8 }
 0x2c6   :  { %2329 = vmatprep.subr.mxu0 %v2840_v0 }
 0x2c7   :  { %2330 = vmatpush3.msra.mxu0 %v2896_v10 }
 0x2c8   :  { %2331 = vmatprep.subr.mxu0 %v2840_v0 }
 0x2c9   :  { %2332 = vmatpush3.msra.mxu0 %v2900_v12 }
 0x2ca   :  { %2333 = vmatprep.subr.mxu0 %v2840_v0 }
 0x2cb   :  { %2334 = vmatpush3.msra.mxu0 %v2904_v14 }
 0x2cc   :  { %2335 = vmatprep.subr.mxu0 %v2840_v0 }
 0x2cd   :  { %2336 = vmatpush3.msra.mxu0 %v2908_v16 }
 0x2ce   :  { %2337 = vmatprep.subr.mxu0 %v2840_v0 }
 0x2cf   :  { %2338 = vmatpush3.msra.mxu0 %v2912_v18 }
 0x2d0   :  { %2339 = vmatprep.subr.mxu0 %v2840_v0 }
 0x2d1   :  { %2340 = vmatpush3.msra.mxu0 %v2916_v20 }
 0x2d2   :  { %2341 = vmatprep.subr.mxu0 %v2840_v0 }
 0x2d3   :  { %2342 = vmatpush3.msra.mxu0 %v2920_v22 }
 0x2d4   :  { %2343 = vmatprep.subr.mxu0 %v2840_v0 }
 0x2d5   :  { %2344 = vmatpush3.msra.mxu0 %v2924_v24 }
 0x2d6   :  { %2345 = vmatprep.subr.mxu0 %v2840_v0 }
 0x2d7   :  { %2346 = vmatpush3.msra.mxu0 %v2928_v26 }
 0x2d8   :  { %2347 = vmatprep.subr.mxu0 %v2840_v0 }
 0x2d9   :  { %2348 = vmatpush3.msra.mxu0 %v2932_v28 }
 0x2da   :  { %2349 = vmatprep.subr.mxu0 %v2840_v0 }
 0x2db   :  { %2350 = vmatpush3.msra.mxu0 %v2937_v31 }
 0x2dc   :  { %2351 = vmatprep.subr.mxu0 %v2840_v0 }
 0x2dd   :  { %2352 = vmatpush3.msra.mxu0 %v2940_v33 }
 0x2de   :  { %2391 = vmatprep.subr.mxu0 %v2840_v0 }
 0x37e   :  { %v629_v38 = vpop.f32.mrf.mxu0 }
 0x37f   :  { %v633_v39 = vadd.f32 %v629_v38, %v185_v37 }
 0x380   :  { %v2285_v40 = vpop.f32.mrf.mxu0 }
 0x381   :  { %2722 = vtanh.f32 %v633_v39 }
 0x38e   :  { %v2723_v41 = vpop.eup %2722 }
 0x38f   :  { %v636_v42 = vpack.c.bf16 %v2723_v41, %v2723_v41  ;;  %2319 = vmatmul.mubr.f32.vlgmr.msra.gmra.mxu1 %v2723_v41 }
 0x390   :  { %2357 = vmatpush3.msra.mxu1 %v2882_v3  ;;  %2388 = vmatprep.mubr.msk.f32.mxu1 %vm2841_vm0, %v2840_v0 }
 0x391   :  { %638 = vst [vmem:[#allocation10 + $0xc] sm:$0xf] %v636_v42  ;;  %2358 = vmatprep.subr.mxu1 %v2840_v0 }
 0x392   :  { %2359 = vmatpush3.msra.mxu1 %v2885_v4 }
 0x393   :  { %2360 = vmatprep.subr.mxu1 %v2840_v0 }
 0x394   :  { %2361 = vmatpush3.msra.mxu1 %v2888_v6 }
 0x395   :  { %2362 = vmatprep.subr.mxu1 %v2840_v0 }
 0x396   :  { %2363 = vmatpush3.msra.mxu1 %v2892_v8 }
 0x397   :  { %2364 = vmatprep.subr.mxu1 %v2840_v0 }
 0x398   :  { %2365 = vmatpush3.msra.mxu1 %v2896_v10 }
 0x399   :  { %2366 = vmatprep.subr.mxu1 %v2840_v0 }
 0x39a   :  { %2367 = vmatpush3.msra.mxu1 %v2900_v12 }
 0x39b   :  { %2368 = vmatprep.subr.mxu1 %v2840_v0 }
 0x39c   :  { %2369 = vmatpush3.msra.mxu1 %v2904_v14 }
 0x39d   :  { %2370 = vmatprep.subr.mxu1 %v2840_v0 }
 0x39e   :  { %2371 = vmatpush3.msra.mxu1 %v2908_v16 }
 0x39f   :  { %2372 = vmatprep.subr.mxu1 %v2840_v0 }
 0x3a0   :  { %2373 = vmatpush3.msra.mxu1 %v2912_v18 }
 0x3a1   :  { %2374 = vmatprep.subr.mxu1 %v2840_v0 }
 0x3a2   :  { %2375 = vmatpush3.msra.mxu1 %v2916_v20 }
 0x3a3   :  { %2376 = vmatprep.subr.mxu1 %v2840_v0 }
 0x3a4   :  { %2377 = vmatpush3.msra.mxu1 %v2920_v22 }
 0x3a5   :  { %2378 = vmatprep.subr.mxu1 %v2840_v0 }
 0x3a6   :  { %2379 = vmatpush3.msra.mxu1 %v2924_v24 }
 0x3a7   :  { %2380 = vmatprep.subr.mxu1 %v2840_v0 }
 0x3a8   :  { %2381 = vmatpush3.msra.mxu1 %v2928_v26 }
 0x3a9   :  { %2382 = vmatprep.subr.mxu1 %v2840_v0 }
 0x3aa   :  { %2383 = vmatpush3.msra.mxu1 %v2932_v28 }
 0x3ab   :  { %2384 = vmatprep.subr.mxu1 %v2840_v0 }
 0x3ac   :  { %2385 = vmatpush3.msra.mxu1 %v2937_v31 }
 0x3ad   :  { %2386 = vmatprep.subr.mxu1 %v2840_v0 }
 0x3ae   :  { %2387 = vmatpush3.msra.mxu1 %v2940_v33 }
 0x3af   :  { %2426 = vmatprep.subr.mxu1 %v2840_v0 }
 0x44f   :  { %v723_v44 = vpop.f32.mrf.mxu1 }
 0x450   :  { %v727_v45 = vadd.f32 %v723_v44, %v190_v43 }
 0x451   :  { %v2320_v46 = vpop.f32.mrf.mxu1 }
 0x452   :  { %2724 = vtanh.f32 %v727_v45 }
 0x45f   :  { %v2725_v47 = vpop.eup %2724 }
 0x460   :  { %v730_v48 = vpack.c.bf16 %v2725_v47, %v2725_v47  ;;  %2354 = vmatmul.mubr.f32.vlgmr.msra.gmra.mxu0 %v2725_v47 }
 0x461   :  { %2392 = vmatpush3.msra.mxu0 %v2882_v3  ;;  %2423 = vmatprep.mubr.msk.f32.mxu0 %vm2841_vm0, %v2840_v0  ;;  %v195_v3 = vadd.f32 %v3058_v60, %v3019_v51  ;;  %v3303_v60 = vld [vmem:[#allocation9 + $0x18] sm:$0xff] }
 0x462   :  { %732 = vst [vmem:[#allocation10 + $0x10] sm:$0xf] %v730_v48  ;;  %2393 = vmatprep.subr.mxu0 %v2840_v0 }
 0x463   :  { %2394 = vmatpush3.msra.mxu0 %v2885_v4 }
 0x464   :  { %2395 = vmatprep.subr.mxu0 %v2840_v0 }
 0x465   :  { %2396 = vmatpush3.msra.mxu0 %v2888_v6 }
 0x466   :  { %2397 = vmatprep.subr.mxu0 %v2840_v0 }
 0x467   :  { %2398 = vmatpush3.msra.mxu0 %v2892_v8 }
 0x468   :  { %2399 = vmatprep.subr.mxu0 %v2840_v0 }
 0x469   :  { %2400 = vmatpush3.msra.mxu0 %v2896_v10 }
 0x46a   :  { %2401 = vmatprep.subr.mxu0 %v2840_v0 }
 0x46b   :  { %2402 = vmatpush3.msra.mxu0 %v2900_v12 }
 0x46c   :  { %2403 = vmatprep.subr.mxu0 %v2840_v0 }
 0x46d   :  { %2404 = vmatpush3.msra.mxu0 %v2904_v14  ;;  %v3228_v14 = vld [vmem:[#allocation9 + $0x78] sm:$0xff] }
 0x46e   :  { %2405 = vmatprep.subr.mxu0 %v2840_v0 }
 0x46f   :  { %2406 = vmatpush3.msra.mxu0 %v2908_v16  ;;  %v3230_v16 = vld [vmem:[#allocation9 + $0x70] sm:$0xff] }
 0x470   :  { %2407 = vmatprep.subr.mxu0 %v2840_v0 }
 0x471   :  { %2408 = vmatpush3.msra.mxu0 %v2912_v18  ;;  %v3234_v18 = vld [vmem:[#allocation9 + $0x68] sm:$0xff] }
 0x472   :  { %2409 = vmatprep.subr.mxu0 %v2840_v0 }
 0x473   :  { %2410 = vmatpush3.msra.mxu0 %v2916_v20  ;;  %v3238_v20 = vld [vmem:[#allocation9 + $0x60] sm:$0xff] }
 0x474   :  { %2411 = vmatprep.subr.mxu0 %v2840_v0 }
 0x475   :  { %2412 = vmatpush3.msra.mxu0 %v2920_v22  ;;  %v3242_v22 = vld [vmem:[#allocation9 + $0x58] sm:$0xff] }
 0x476   :  { %2413 = vmatprep.subr.mxu0 %v2840_v0 }
 0x477   :  { %2414 = vmatpush3.msra.mxu0 %v2924_v24  ;;  %v3246_v24 = vld [vmem:[#allocation9 + $0x50] sm:$0xff] }
 0x478   :  { %2415 = vmatprep.subr.mxu0 %v2840_v0 }
 0x479   :  { %2416 = vmatpush3.msra.mxu0 %v2928_v26  ;;  %v3250_v26 = vld [vmem:[#allocation9 + $0x48] sm:$0xff] }
 0x47a   :  { %2417 = vmatprep.subr.mxu0 %v2840_v0 }
 0x47b   :  { %2418 = vmatpush3.msra.mxu0 %v2932_v28  ;;  %v200_v28 = vadd.f32 %v3019_v51, %v3064_v63  ;;  %v205_v63 = vadd.f32 %v3062_v62, %v3019_v51  ;;  %v210_v62 = vadd.f32 %v3019_v51, %v3068_v2  ;;  %v215_v2 = vadd.f32 %v3066_v1, %v3019_v51 }
 0x47c   :  { %2419 = vmatprep.subr.mxu0 %v2840_v0  ;;  %v220_v1 = vadd.f32 %v3019_v51, %v3072_v7  ;;  %v225_v7 = vadd.f32 %v3070_v5, %v3019_v51  ;;  %v2748_v51 = vld [vmem:[%s3553_s3] ss:$0 sm:$0xff]  ;;  %s2842_s3 = smov [#allocation10]  }
 0x47d   :  { %2420 = vmatpush3.msra.mxu0 %v2937_v31  ;;  %v230_v5 = vadd.f32 %v2748_v51, %v3076_v11  ;;  %v235_v11 = vadd.f32 %v2748_v51, %v3074_v9  ;;  %v245_v9 = vadd.f32 %v2748_v51, %v3078_v13  ;;  %s1772_s7 = sshll.u32 %s2842_s3, 4  ;;  %s1773_s7 = int_to_ptr.vmem [resolvable:$true] %s1772_s7 }
 0x47e   :  { %2421 = vmatprep.subr.mxu0 %v2840_v0  ;;  %s2809_s8 = scalar_lea.vmem %s1773_s7, 1024  ;;  %p2814_p2 = scmp.lt.s32.totalorder %s1773_s7, %s1773_s7 }
 0x47f   :  { %2422 = vmatpush3.msra.mxu0 %v2940_v33  ;;  %p2810_p1 = scmp.ne.s32.totalorder %s1773_s7, %s2809_s8  ;;  %p2815_p3 = scmp.lt.s32.totalorder %s2809_s8, %s2809_s8 }
 0x480   :  { %2461 = vmatprep.subr.mxu0 %v2840_v0 }
 0x481   :  { %p2816_p4 = por %p2815_p3, %p2814_p2 }
 0x483   :  { %p2817_p5 = pnand %p2816_p4, %p2810_p1 }
 0x520   :  { %v817_v4 = vpop.f32.mrf.mxu0 }
 0x521   :  { %v821_v6 = vadd.f32 %v817_v4, %v195_v3 }
 0x522   :  { %v2355_v8 = vpop.f32.mrf.mxu0 }
 0x523   :  { %2726 = vtanh.f32 %v821_v6 }
 0x530   :  { %v2727_v10 = vpop.eup %2726 }
 0x531   :  { %v824_v12 = vpack.c.bf16 %v2727_v10, %v2727_v10  ;;  %2389 = vmatmul.mubr.f32.vlgmr.msra.gmra.mxu1 %v2727_v10 }
 0x532   :  { %2458 = vmatprep.mubr.msk.f32.mxu1 %vm2841_vm0, %v2840_v0  ;;  %2427 = vmatpush3.msra.mxu1 %v3228_v14 }
 0x533   :  { %826 = vst [vmem:[#allocation10 + $0x14] sm:$0xf] %v824_v12  ;;  %2428 = vmatprep.subr.mxu1 %v2840_v0 }
 0x534   :  { %2429 = vmatpush3.msra.mxu1 %v3230_v16 }
 0x535   :  { %2430 = vmatprep.subr.mxu1 %v2840_v0 }
 0x536   :  { %2431 = vmatpush3.msra.mxu1 %v3234_v18 }
 0x537   :  { %2432 = vmatprep.subr.mxu1 %v2840_v0 }
 0x538   :  { %2433 = vmatpush3.msra.mxu1 %v3238_v20 }
 0x539   :  { %2434 = vmatprep.subr.mxu1 %v2840_v0 }
 0x53a   :  { %2435 = vmatpush3.msra.mxu1 %v3242_v22 }
 0x53b   :  { %2436 = vmatprep.subr.mxu1 %v2840_v0 }
 0x53c   :  { %2437 = vmatpush3.msra.mxu1 %v3246_v24 }
 0x53d   :  { %2438 = vmatprep.subr.mxu1 %v2840_v0 }
 0x53e   :  { %2439 = vmatpush3.msra.mxu1 %v3250_v26 }
 0x53f   :  { %2440 = vmatprep.subr.mxu1 %v2840_v0 }
 0x540   :  { %2441 = vmatpush3.msra.mxu1 %v3274_v55 }
 0x541   :  { %2442 = vmatprep.subr.mxu1 %v2840_v0 }
 0x542   :  { %2443 = vmatpush3.msra.mxu1 %v3279_v56 }
 0x543   :  { %2444 = vmatprep.subr.mxu1 %v2840_v0 }
 0x544   :  { %2445 = vmatpush3.msra.mxu1 %v3285_v57 }
 0x545   :  { %2446 = vmatprep.subr.mxu1 %v2840_v0 }
 0x546   :  { %2447 = vmatpush3.msra.mxu1 %v3291_v58 }
 0x547   :  { %2448 = vmatprep.subr.mxu1 %v2840_v0 }
 0x548   :  { %2449 = vmatpush3.msra.mxu1 %v3297_v59 }
 0x549   :  { %2450 = vmatprep.subr.mxu1 %v2840_v0 }
 0x54a   :  { %2451 = vmatpush3.msra.mxu1 %v3303_v60 }
 0x54b   :  { %2452 = vmatprep.subr.mxu1 %v2840_v0 }
 0x54c   :  { %2453 = vmatpush3.msra.mxu1 %v3309_v61 }
 0x54d   :  { %2454 = vmatprep.subr.mxu1 %v2840_v0 }
 0x54e   :  { %2455 = vmatpush3.msra.mxu1 %v2937_v31  ;;  %v3352_v31 = vld [vmem:[#allocation9 + $0x8] sm:$0xff] }
 0x54f   :  { %2456 = vmatprep.subr.mxu1 %v2840_v0 }
 0x550   :  { %2457 = vmatpush3.msra.mxu1 %v2940_v33  ;;  %v3357_v33 = vld [vmem:[#allocation9] sm:$0xff] }
 0x551   :  { %2496 = vmatprep.subr.mxu1 %v2840_v0 }
 0x5f1   :  { %v911_v49 = vpop.f32.mrf.mxu1 }
 0x5f2   :  { %v915_v50 = vadd.f32 %v911_v49, %v200_v28 }
 0x5f3   :  { %v2390_v52 = vpop.f32.mrf.mxu1 }
 0x5f4   :  { %2728 = vtanh.f32 %v915_v50 }
 0x601   :  { %v2729_v53 = vpop.eup %2728 }
 0x602   :  { %v918_v54 = vpack.c.bf16 %v2729_v53, %v2729_v53  ;;  %2424 = vmatmul.mubr.f32.vlgmr.msra.gmra.mxu0 %v2729_v53 }
 0x603   :  { %2462 = vmatpush3.msra.mxu0 %v3228_v14  ;;  %2493 = vmatprep.mubr.msk.f32.mxu0 %vm2841_vm0, %v2840_v0 }
 0x604   :  { %920 = vst [vmem:[#allocation10 + $0x18] sm:$0xf] %v918_v54  ;;  %2463 = vmatprep.subr.mxu0 %v2840_v0 }
 0x605   :  { %2464 = vmatpush3.msra.mxu0 %v3230_v16 }
 0x606   :  { %2465 = vmatprep.subr.mxu0 %v2840_v0 }
 0x607   :  { %2466 = vmatpush3.msra.mxu0 %v3234_v18 }
 0x608   :  { %2467 = vmatprep.subr.mxu0 %v2840_v0 }
 0x609   :  { %2468 = vmatpush3.msra.mxu0 %v3238_v20 }
 0x60a   :  { %2469 = vmatprep.subr.mxu0 %v2840_v0 }
 0x60b   :  { %2470 = vmatpush3.msra.mxu0 %v3242_v22 }
 0x60c   :  { %2471 = vmatprep.subr.mxu0 %v2840_v0 }
 0x60d   :  { %2472 = vmatpush3.msra.mxu0 %v3246_v24 }
 0x60e   :  { %2473 = vmatprep.subr.mxu0 %v2840_v0 }
 0x60f   :  { %2474 = vmatpush3.msra.mxu0 %v3250_v26 }
 0x610   :  { %2475 = vmatprep.subr.mxu0 %v2840_v0 }
 0x611   :  { %2476 = vmatpush3.msra.mxu0 %v3274_v55 }
 0x612   :  { %2477 = vmatprep.subr.mxu0 %v2840_v0 }
 0x613   :  { %2478 = vmatpush3.msra.mxu0 %v3279_v56 }
 0x614   :  { %2479 = vmatprep.subr.mxu0 %v2840_v0 }
 0x615   :  { %2480 = vmatpush3.msra.mxu0 %v3285_v57 }
 0x616   :  { %2481 = vmatprep.subr.mxu0 %v2840_v0 }
 0x617   :  { %2482 = vmatpush3.msra.mxu0 %v3291_v58 }
 0x618   :  { %2483 = vmatprep.subr.mxu0 %v2840_v0 }
 0x619   :  { %2484 = vmatpush3.msra.mxu0 %v3297_v59 }
 0x61a   :  { %2485 = vmatprep.subr.mxu0 %v2840_v0 }
 0x61b   :  { %2486 = vmatpush3.msra.mxu0 %v3303_v60 }
 0x61c   :  { %2487 = vmatprep.subr.mxu0 %v2840_v0 }
 0x61d   :  { %2488 = vmatpush3.msra.mxu0 %v3309_v61 }
 0x61e   :  { %2489 = vmatprep.subr.mxu0 %v2840_v0 }
 0x61f   :  { %2490 = vmatpush3.msra.mxu0 %v3352_v31 }
 0x620   :  { %2491 = vmatprep.subr.mxu0 %v2840_v0 }
 0x621   :  { %2492 = vmatpush3.msra.mxu0 %v3357_v33 }
 0x622   :  { %2531 = vmatprep.subr.mxu0 %v2840_v0 }
 0x6c2   :  { %v1005_v17 = vpop.f32.mrf.mxu0 }
 0x6c3   :  { %v1009_v19 = vadd.f32 %v1005_v17, %v205_v63 }
 0x6c4   :  { %v2425_v21 = vpop.f32.mrf.mxu0 }
 0x6c5   :  { %2730 = vtanh.f32 %v1009_v19 }
 0x6d2   :  { %v2731_v23 = vpop.eup %2730 }
 0x6d3   :  { %v1012_v25 = vpack.c.bf16 %v2731_v23, %v2731_v23  ;;  %2459 = vmatmul.mubr.f32.vlgmr.msra.gmra.mxu1 %v2731_v23 }
 0x6d4   :  { %2497 = vmatpush3.msra.mxu1 %v3228_v14  ;;  %2528 = vmatprep.mubr.msk.f32.mxu1 %vm2841_vm0, %v2840_v0 }
 0x6d5   :  { %1014 = vst [vmem:[#allocation10 + $0x1c] sm:$0xf] %v1012_v25  ;;  %2498 = vmatprep.subr.mxu1 %v2840_v0 }
 0x6d6   :  { %2499 = vmatpush3.msra.mxu1 %v3230_v16 }
 0x6d7   :  { %2500 = vmatprep.subr.mxu1 %v2840_v0 }
 0x6d8   :  { %2501 = vmatpush3.msra.mxu1 %v3234_v18 }
 0x6d9   :  { %2502 = vmatprep.subr.mxu1 %v2840_v0 }
 0x6da   :  { %2503 = vmatpush3.msra.mxu1 %v3238_v20 }
 0x6db   :  { %2504 = vmatprep.subr.mxu1 %v2840_v0 }
 0x6dc   :  { %2505 = vmatpush3.msra.mxu1 %v3242_v22 }
 0x6dd   :  { %2506 = vmatprep.subr.mxu1 %v2840_v0 }
 0x6de   :  { %2507 = vmatpush3.msra.mxu1 %v3246_v24 }
 0x6df   :  { %2508 = vmatprep.subr.mxu1 %v2840_v0 }
 0x6e0   :  { %2509 = vmatpush3.msra.mxu1 %v3250_v26 }
 0x6e1   :  { %2510 = vmatprep.subr.mxu1 %v2840_v0 }
 0x6e2   :  { %2511 = vmatpush3.msra.mxu1 %v3274_v55 }
 0x6e3   :  { %2512 = vmatprep.subr.mxu1 %v2840_v0 }
 0x6e4   :  { %2513 = vmatpush3.msra.mxu1 %v3279_v56 }
 0x6e5   :  { %2514 = vmatprep.subr.mxu1 %v2840_v0 }
 0x6e6   :  { %2515 = vmatpush3.msra.mxu1 %v3285_v57 }
 0x6e7   :  { %2516 = vmatprep.subr.mxu1 %v2840_v0 }
 0x6e8   :  { %2517 = vmatpush3.msra.mxu1 %v3291_v58 }
 0x6e9   :  { %2518 = vmatprep.subr.mxu1 %v2840_v0 }
 0x6ea   :  { %2519 = vmatpush3.msra.mxu1 %v3297_v59 }
 0x6eb   :  { %2520 = vmatprep.subr.mxu1 %v2840_v0 }
 0x6ec   :  { %2521 = vmatpush3.msra.mxu1 %v3303_v60 }
 0x6ed   :  { %2522 = vmatprep.subr.mxu1 %v2840_v0 }
 0x6ee   :  { %2523 = vmatpush3.msra.mxu1 %v3309_v61 }
 0x6ef   :  { %2524 = vmatprep.subr.mxu1 %v2840_v0 }
 0x6f0   :  { %2525 = vmatpush3.msra.mxu1 %v3352_v31 }
 0x6f1   :  { %2526 = vmatprep.subr.mxu1 %v2840_v0 }
 0x6f2   :  { %2527 = vmatpush3.msra.mxu1 %v3357_v33 }
 0x6f3   :  { %2566 = vmatprep.subr.mxu1 %v2840_v0 }
 0x793   :  { %v1099_v27 = vpop.f32.mrf.mxu1 }
 0x794   :  { %v1103_v29 = vadd.f32 %v1099_v27, %v210_v62 }
 0x795   :  { %v2460_v30 = vpop.f32.mrf.mxu1 }
 0x796   :  { %2732 = vtanh.f32 %v1103_v29 }
 0x7a3   :  { %v2733_v32 = vpop.eup %2732 }
 0x7a4   :  { %v1106_v34 = vpack.c.bf16 %v2733_v32, %v2733_v32  ;;  %2494 = vmatmul.mubr.f32.vlgmr.msra.gmra.mxu0 %v2733_v32 }
 0x7a5   :  { %2532 = vmatpush3.msra.mxu0 %v3228_v14  ;;  %2563 = vmatprep.mubr.msk.f32.mxu0 %vm2841_vm0, %v2840_v0 }
 0x7a6   :  { %1108 = vst [vmem:[#allocation10 + $0x20] sm:$0xf] %v1106_v34  ;;  %2533 = vmatprep.subr.mxu0 %v2840_v0 }
 0x7a7   :  { %2534 = vmatpush3.msra.mxu0 %v3230_v16 }
 0x7a8   :  { %2535 = vmatprep.subr.mxu0 %v2840_v0 }
 0x7a9   :  { %2536 = vmatpush3.msra.mxu0 %v3234_v18 }
 0x7aa   :  { %2537 = vmatprep.subr.mxu0 %v2840_v0 }
 0x7ab   :  { %2538 = vmatpush3.msra.mxu0 %v3238_v20 }
 0x7ac   :  { %2539 = vmatprep.subr.mxu0 %v2840_v0 }
 0x7ad   :  { %2540 = vmatpush3.msra.mxu0 %v3242_v22 }
 0x7ae   :  { %2541 = vmatprep.subr.mxu0 %v2840_v0 }
 0x7af   :  { %2542 = vmatpush3.msra.mxu0 %v3246_v24 }
 0x7b0   :  { %2543 = vmatprep.subr.mxu0 %v2840_v0 }
 0x7b1   :  { %2544 = vmatpush3.msra.mxu0 %v3250_v26 }
 0x7b2   :  { %2545 = vmatprep.subr.mxu0 %v2840_v0 }
 0x7b3   :  { %2546 = vmatpush3.msra.mxu0 %v3274_v55 }
 0x7b4   :  { %2547 = vmatprep.subr.mxu0 %v2840_v0 }
 0x7b5   :  { %2548 = vmatpush3.msra.mxu0 %v3279_v56 }
 0x7b6   :  { %2549 = vmatprep.subr.mxu0 %v2840_v0 }
 0x7b7   :  { %2550 = vmatpush3.msra.mxu0 %v3285_v57 }
 0x7b8   :  { %2551 = vmatprep.subr.mxu0 %v2840_v0 }
 0x7b9   :  { %2552 = vmatpush3.msra.mxu0 %v3291_v58 }
 0x7ba   :  { %2553 = vmatprep.subr.mxu0 %v2840_v0 }
 0x7bb   :  { %2554 = vmatpush3.msra.mxu0 %v3297_v59 }
 0x7bc   :  { %2555 = vmatprep.subr.mxu0 %v2840_v0 }
 0x7bd   :  { %2556 = vmatpush3.msra.mxu0 %v3303_v60 }
 0x7be   :  { %2557 = vmatprep.subr.mxu0 %v2840_v0 }
 0x7bf   :  { %2558 = vmatpush3.msra.mxu0 %v3309_v61 }
 0x7c0   :  { %2559 = vmatprep.subr.mxu0 %v2840_v0 }
 0x7c1   :  { %2560 = vmatpush3.msra.mxu0 %v3352_v31 }
 0x7c2   :  { %2561 = vmatprep.subr.mxu0 %v2840_v0 }
 0x7c3   :  { %2562 = vmatpush3.msra.mxu0 %v3357_v33 }
 0x7c4   :  { %2601 = vmatprep.subr.mxu0 %v2840_v0 }
 0x864   :  { %v1193_v35 = vpop.f32.mrf.mxu0 }
 0x865   :  { %v1197_v36 = vadd.f32 %v1193_v35, %v215_v2 }
 0x866   :  { %v2495_v37 = vpop.f32.mrf.mxu0 }
 0x867   :  { %2734 = vtanh.f32 %v1197_v36 }
 0x874   :  { %v2735_v38 = vpop.eup %2734 }
 0x875   :  { %v1200_v39 = vpack.c.bf16 %v2735_v38, %v2735_v38  ;;  %2529 = vmatmul.mubr.f32.vlgmr.msra.gmra.mxu1 %v2735_v38 }
 0x876   :  { %2567 = vmatpush3.msra.mxu1 %v3228_v14  ;;  %2598 = vmatprep.mubr.msk.f32.mxu1 %vm2841_vm0, %v2840_v0 }
 0x877   :  { %1202 = vst [vmem:[#allocation10 + $0x24] sm:$0xf] %v1200_v39  ;;  %2568 = vmatprep.subr.mxu1 %v2840_v0 }
 0x878   :  { %2569 = vmatpush3.msra.mxu1 %v3230_v16 }
 0x879   :  { %2570 = vmatprep.subr.mxu1 %v2840_v0 }
 0x87a   :  { %2571 = vmatpush3.msra.mxu1 %v3234_v18 }
 0x87b   :  { %2572 = vmatprep.subr.mxu1 %v2840_v0 }
 0x87c   :  { %2573 = vmatpush3.msra.mxu1 %v3238_v20 }
 0x87d   :  { %2574 = vmatprep.subr.mxu1 %v2840_v0 }
 0x87e   :  { %2575 = vmatpush3.msra.mxu1 %v3242_v22 }
 0x87f   :  { %2576 = vmatprep.subr.mxu1 %v2840_v0 }
 0x880   :  { %2577 = vmatpush3.msra.mxu1 %v3246_v24 }
 0x881   :  { %2578 = vmatprep.subr.mxu1 %v2840_v0 }
 0x882   :  { %2579 = vmatpush3.msra.mxu1 %v3250_v26 }
 0x883   :  { %2580 = vmatprep.subr.mxu1 %v2840_v0 }
 0x884   :  { %2581 = vmatpush3.msra.mxu1 %v3274_v55 }
 0x885   :  { %2582 = vmatprep.subr.mxu1 %v2840_v0 }
 0x886   :  { %2583 = vmatpush3.msra.mxu1 %v3279_v56 }
 0x887   :  { %2584 = vmatprep.subr.mxu1 %v2840_v0 }
 0x888   :  { %2585 = vmatpush3.msra.mxu1 %v3285_v57 }
 0x889   :  { %2586 = vmatprep.subr.mxu1 %v2840_v0 }
 0x88a   :  { %2587 = vmatpush3.msra.mxu1 %v3291_v58 }
 0x88b   :  { %2588 = vmatprep.subr.mxu1 %v2840_v0 }
 0x88c   :  { %2589 = vmatpush3.msra.mxu1 %v3297_v59 }
 0x88d   :  { %2590 = vmatprep.subr.mxu1 %v2840_v0 }
 0x88e   :  { %2591 = vmatpush3.msra.mxu1 %v3303_v60 }
 0x88f   :  { %2592 = vmatprep.subr.mxu1 %v2840_v0 }
 0x890   :  { %2593 = vmatpush3.msra.mxu1 %v3309_v61 }
 0x891   :  { %2594 = vmatprep.subr.mxu1 %v2840_v0 }
 0x892   :  { %2595 = vmatpush3.msra.mxu1 %v3352_v31 }
 0x893   :  { %2596 = vmatprep.subr.mxu1 %v2840_v0 }
 0x894   :  { %2597 = vmatpush3.msra.mxu1 %v3357_v33 }
 0x895   :  { %2636 = vmatprep.subr.mxu1 %v2840_v0 }
 0x935   :  { %v1287_v40 = vpop.f32.mrf.mxu1 }
 0x936   :  { %v1291_v41 = vadd.f32 %v1287_v40, %v220_v1 }
 0x937   :  { %v2530_v42 = vpop.f32.mrf.mxu1 }
 0x938   :  { %2736 = vtanh.f32 %v1291_v41 }
 0x945   :  { %v2737_v43 = vpop.eup %2736 }
 0x946   :  { %v1294_v44 = vpack.c.bf16 %v2737_v43, %v2737_v43  ;;  %2564 = vmatmul.mubr.f32.vlgmr.msra.gmra.mxu0 %v2737_v43 }
 0x947   :  { %2602 = vmatpush3.msra.mxu0 %v3228_v14  ;;  %2633 = vmatprep.mubr.msk.f32.mxu0 %vm2841_vm0, %v2840_v0 }
 0x948   :  { %1296 = vst [vmem:[#allocation10 + $0x28] sm:$0xf] %v1294_v44  ;;  %2603 = vmatprep.subr.mxu0 %v2840_v0 }
 0x949   :  { %2604 = vmatpush3.msra.mxu0 %v3230_v16 }
 0x94a   :  { %2605 = vmatprep.subr.mxu0 %v2840_v0 }
 0x94b   :  { %2606 = vmatpush3.msra.mxu0 %v3234_v18 }
 0x94c   :  { %2607 = vmatprep.subr.mxu0 %v2840_v0 }
 0x94d   :  { %2608 = vmatpush3.msra.mxu0 %v3238_v20 }
 0x94e   :  { %2609 = vmatprep.subr.mxu0 %v2840_v0 }
 0x94f   :  { %2610 = vmatpush3.msra.mxu0 %v3242_v22 }
 0x950   :  { %2611 = vmatprep.subr.mxu0 %v2840_v0 }
 0x951   :  { %2612 = vmatpush3.msra.mxu0 %v3246_v24 }
 0x952   :  { %2613 = vmatprep.subr.mxu0 %v2840_v0 }
 0x953   :  { %2614 = vmatpush3.msra.mxu0 %v3250_v26 }
 0x954   :  { %2615 = vmatprep.subr.mxu0 %v2840_v0 }
 0x955   :  { %2616 = vmatpush3.msra.mxu0 %v3274_v55 }
 0x956   :  { %2617 = vmatprep.subr.mxu0 %v2840_v0 }
 0x957   :  { %2618 = vmatpush3.msra.mxu0 %v3279_v56 }
 0x958   :  { %2619 = vmatprep.subr.mxu0 %v2840_v0 }
 0x959   :  { %2620 = vmatpush3.msra.mxu0 %v3285_v57 }
 0x95a   :  { %2621 = vmatprep.subr.mxu0 %v2840_v0 }
 0x95b   :  { %2622 = vmatpush3.msra.mxu0 %v3291_v58 }
 0x95c   :  { %2623 = vmatprep.subr.mxu0 %v2840_v0 }
 0x95d   :  { %2624 = vmatpush3.msra.mxu0 %v3297_v59 }
 0x95e   :  { %2625 = vmatprep.subr.mxu0 %v2840_v0 }
 0x95f   :  { %2626 = vmatpush3.msra.mxu0 %v3303_v60 }
 0x960   :  { %2627 = vmatprep.subr.mxu0 %v2840_v0 }
 0x961   :  { %2628 = vmatpush3.msra.mxu0 %v3309_v61 }
 0x962   :  { %2629 = vmatprep.subr.mxu0 %v2840_v0 }
 0x963   :  { %2630 = vmatpush3.msra.mxu0 %v3352_v31 }
 0x964   :  { %2631 = vmatprep.subr.mxu0 %v2840_v0 }
 0x965   :  { %2632 = vmatpush3.msra.mxu0 %v3357_v33 }
 0x966   :  { %2671 = vmatprep.subr.mxu0 %v2840_v0 }
 0xa06   :  { %v1381_v45 = vpop.f32.mrf.mxu0 }
 0xa07   :  { %v1385_v46 = vadd.f32 %v1381_v45, %v225_v7 }
 0xa08   :  { %v2565_v47 = vpop.f32.mrf.mxu0 }
 0xa09   :  { %2738 = vtanh.f32 %v1385_v46 }
 0xa16   :  { %v2739_v48 = vpop.eup %2738 }
 0xa17   :  { %v1388_v3 = vpack.c.bf16 %v2739_v48, %v2739_v48  ;;  %2599 = vmatmul.mubr.f32.vlgmr.msra.gmra.mxu1 %v2739_v48 }
 0xa18   :  { %2637 = vmatpush3.msra.mxu1 %v3228_v14  ;;  %2668 = vmatprep.mubr.msk.f32.mxu1 %vm2841_vm0, %v2840_v0 }
 0xa19   :  { %1390 = vst [vmem:[#allocation10 + $0x2c] sm:$0xf] %v1388_v3  ;;  %2638 = vmatprep.subr.mxu1 %v2840_v0 }
 0xa1a   :  { %2639 = vmatpush3.msra.mxu1 %v3230_v16 }
 0xa1b   :  { %2640 = vmatprep.subr.mxu1 %v2840_v0 }
 0xa1c   :  { %2641 = vmatpush3.msra.mxu1 %v3234_v18 }
 0xa1d   :  { %2642 = vmatprep.subr.mxu1 %v2840_v0 }
 0xa1e   :  { %2643 = vmatpush3.msra.mxu1 %v3238_v20 }
 0xa1f   :  { %2644 = vmatprep.subr.mxu1 %v2840_v0 }
 0xa20   :  { %2645 = vmatpush3.msra.mxu1 %v3242_v22 }
 0xa21   :  { %2646 = vmatprep.subr.mxu1 %v2840_v0 }
 0xa22   :  { %2647 = vmatpush3.msra.mxu1 %v3246_v24 }
 0xa23   :  { %2648 = vmatprep.subr.mxu1 %v2840_v0 }
 0xa24   :  { %2649 = vmatpush3.msra.mxu1 %v3250_v26 }
 0xa25   :  { %2650 = vmatprep.subr.mxu1 %v2840_v0 }
 0xa26   :  { %2651 = vmatpush3.msra.mxu1 %v3274_v55 }
 0xa27   :  { %2652 = vmatprep.subr.mxu1 %v2840_v0 }
 0xa28   :  { %2653 = vmatpush3.msra.mxu1 %v3279_v56 }
 0xa29   :  { %2654 = vmatprep.subr.mxu1 %v2840_v0 }
 0xa2a   :  { %2655 = vmatpush3.msra.mxu1 %v3285_v57 }
 0xa2b   :  { %2656 = vmatprep.subr.mxu1 %v2840_v0 }
 0xa2c   :  { %2657 = vmatpush3.msra.mxu1 %v3291_v58 }
 0xa2d   :  { %2658 = vmatprep.subr.mxu1 %v2840_v0 }
 0xa2e   :  { %2659 = vmatpush3.msra.mxu1 %v3297_v59 }
 0xa2f   :  { %2660 = vmatprep.subr.mxu1 %v2840_v0 }
 0xa30   :  { %2661 = vmatpush3.msra.mxu1 %v3303_v60 }
 0xa31   :  { %2662 = vmatprep.subr.mxu1 %v2840_v0 }
 0xa32   :  { %2663 = vmatpush3.msra.mxu1 %v3309_v61 }
 0xa33   :  { %2664 = vmatprep.subr.mxu1 %v2840_v0 }
 0xa34   :  { %2665 = vmatpush3.msra.mxu1 %v3352_v31 }
 0xa35   :  { %2666 = vmatprep.subr.mxu1 %v2840_v0 }
 0xa36   :  { %2667 = vmatpush3.msra.mxu1 %v3357_v33 }
 0xad7   :  { %v1475_v4 = vpop.f32.mrf.mxu1 }
 0xad8   :  { %v1479_v6 = vadd.f32 %v1475_v4, %v230_v5 }
 0xad9   :  { %v2600_v8 = vpop.f32.mrf.mxu1 }
 0xada   :  { %2740 = vtanh.f32 %v1479_v6 }
 0xae7   :  { %v2741_v10 = vpop.eup %2740 }
 0xae8   :  { %v1482_v12 = vpack.c.bf16 %v2741_v10, %v2741_v10  ;;  %2634 = vmatmul.mubr.f32.vlgmr.msra.gmra.mxu0 %v2741_v10 }
 0xae9   :  { %2672 = vmatpush3.msra.mxu0 %v3228_v14  ;;  %2703 = vmatprep.mubr.msk.f32.mxu0 %vm2841_vm0, %v2840_v0 }
 0xaea   :  { %1484 = vst [vmem:[#allocation10 + $0x30] sm:$0xf] %v1482_v12  ;;  %2673 = vmatprep.subr.mxu0 %v2840_v0 }
 0xaeb   :  { %2674 = vmatpush3.msra.mxu0 %v3230_v16 }
 0xaec   :  { %2675 = vmatprep.subr.mxu0 %v2840_v0 }
 0xaed   :  { %2676 = vmatpush3.msra.mxu0 %v3234_v18 }
 0xaee   :  { %2677 = vmatprep.subr.mxu0 %v2840_v0 }
 0xaef   :  { %2678 = vmatpush3.msra.mxu0 %v3238_v20 }
 0xaf0   :  { %2679 = vmatprep.subr.mxu0 %v2840_v0 }
 0xaf1   :  { %2680 = vmatpush3.msra.mxu0 %v3242_v22 }
 0xaf2   :  { %2681 = vmatprep.subr.mxu0 %v2840_v0 }
 0xaf3   :  { %2682 = vmatpush3.msra.mxu0 %v3246_v24  ;;  %v240_v24 = vadd.f32 %v2748_v51, %v3080_v15 }
 0xaf4   :  { %2683 = vmatprep.subr.mxu0 %v2840_v0 }
 0xaf5   :  { %2684 = vmatpush3.msra.mxu0 %v3250_v26 }
 0xaf6   :  { %2685 = vmatprep.subr.mxu0 %v2840_v0 }
 0xaf7   :  { %2686 = vmatpush3.msra.mxu0 %v3274_v55 }
 0xaf8   :  { %2687 = vmatprep.subr.mxu0 %v2840_v0 }
 0xaf9   :  { %2688 = vmatpush3.msra.mxu0 %v3279_v56 }
 0xafa   :  { %2689 = vmatprep.subr.mxu0 %v2840_v0 }
 0xafb   :  { %2690 = vmatpush3.msra.mxu0 %v3285_v57 }
 0xafc   :  { %2691 = vmatprep.subr.mxu0 %v2840_v0 }
 0xafd   :  { %2692 = vmatpush3.msra.mxu0 %v3291_v58 }
 0xafe   :  { %2693 = vmatprep.subr.mxu0 %v2840_v0 }
 0xaff   :  { %2694 = vmatpush3.msra.mxu0 %v3297_v59 }
 0xb00   :  { %2695 = vmatprep.subr.mxu0 %v2840_v0 }
 0xb01   :  { %2696 = vmatpush3.msra.mxu0 %v3303_v60 }
 0xb02   :  { %2697 = vmatprep.subr.mxu0 %v2840_v0 }
 0xb03   :  { %2698 = vmatpush3.msra.mxu0 %v3309_v61 }
 0xb04   :  { %2699 = vmatprep.subr.mxu0 %v2840_v0 }
 0xb05   :  { %2700 = vmatpush3.msra.mxu0 %v3352_v31 }
 0xb06   :  { %2701 = vmatprep.subr.mxu0 %v2840_v0 }
 0xb07   :  { %2702 = vmatpush3.msra.mxu0 %v3357_v33 }
 0xba8   :  { %v1569_v14 = vpop.f32.mrf.mxu0 }
 0xba9   :  { %v1573_v16 = vadd.f32 %v1569_v14, %v235_v11 }
 0xbaa   :  { %v2635_v18 = vpop.f32.mrf.mxu0 }
 0xbab   :  { %2742 = vtanh.f32 %v1573_v16 }
 0xbb8   :  { %v2743_v20 = vpop.eup %2742 }
 0xbb9   :  { %v1576_v22 = vpack.c.bf16 %v2743_v20, %v2743_v20  ;;  %2669 = vmatmul.mubr.f32.vlgmr.msra.gmra.mxu1 %v2743_v20 }
 0xbbb   :  { %1578 = vst [vmem:[#allocation10 + $0x34] sm:$0xf] %v1576_v22 }
 0xc79   :  { %v1663_v26 = vpop.f32.mrf.mxu1 }
 0xc7a   :  { %v1667_v28 = vadd.f32 %v1663_v26, %v240_v24 }
 0xc7b   :  { %v2670_v49 = vpop.f32.mrf.mxu1 }
 0xc7c   :  { %2744 = vtanh.f32 %v1667_v28 }
 0xc89   :  { %v2745_v50 = vpop.eup %2744 }
 0xc8a   :  { %v1670_v0 = vpack.c.bf16 %v2745_v50, %v2745_v50  ;;  %2704 = vmatmul.mubr.f32.vlgmr.msra.gmra.mxu0 %v2745_v50 }
 0xc8c   :  { %1672 = vst [vmem:[#allocation10 + $0x38] sm:$0xf] %v1670_v0 }
 0xd4a   :  { %v1757_v52 = vpop.f32.mrf.mxu0 }
 0xd4b   :  { %v1761_v53 = vadd.f32 %v1757_v52, %v245_v9 }
 0xd4c   :  { %v2705_v54 = vpop.f32.mrf.mxu0 }
 0xd4d   :  { %2746 = vtanh.f32 %v1761_v53 }
 0xd5a   :  { %v2747_v55 = vpop.eup %2746 }
 0xd5b   :  { %v1764_v56 = vpack.c.bf16 %v2747_v55, %v2747_v55 }
 0xd5d   :  { %1766 = vst [vmem:[#allocation10 + $0x3c] sm:$0xf] %v1764_v56 }
 0xd5e   :  { %2820 = shalt.err (!%p2817_p5)
}
 0xd5f   :  { %s2843_s9 = smov 64   ;;  %s2844_s10 = smov 4  }
 0xd60   :  { %1778 = dma.vmem_to_hbm [thread:$0]  %s1773_s7, 1024, %s3554_s4, [#allocation6], %s2843_s9, %s2843_s9, %s2844_s10  }
 0xd61   :  { %2833 = dma.done.wait [#allocation6], 1024  }
 0xd62   :  { %2834 = vsyncadd [#allocation6], 4294966272 }
 0xd63   :  { %1782 = vsyncpa [#allocation5], 1 }
 0xd64   :  { %1783 = vsyncpa [#allocation8], 1 }
 0xd65   :  { %1784 = vsyncpa [#allocation6], 1 }

</bundles_post_ra>
